<compile_context>
chip_gen: v6e
topology: v6e:2x2x1
jax: 0.10.0
libtpu: 0.0.40
codegen_flags: <defaults>
</compile_context>

<pallas_src>
import functools

import jax
import jax.numpy as jnp
from jax.experimental import pallas as pl
from jax.experimental.pallas import tpu as pltpu


def _round_up(a, m):
    return (a + m - 1) // m * m


def _vmem_limit_bytes():
    # Generation-aware scoped-VMEM cap (v7x has only 64 MiB/TC).
    try:
        cap = int(pltpu.get_tpu_info().vmem_capacity_bytes)
    except Exception:
        cap = 64 * 1024 * 1024
    return max(16 * 1024 * 1024, min(cap // 2, 64 * 1024 * 1024))


def _choose_tile_g(G, C, Mp, heads, hd, tile_g, vmem_budget):
    t = max(128, _round_up(tile_g, 128))
    t = min(t, _round_up(max(G, 1), 128))
    # keep >= 2 grid blocks when the problem allows it (v7x 2 TCs / megacore)
    t = min(t, max(128, _round_up(pl.cdiv(max(G, 1), 2), 128)))

    def footprint(tt):
        ntok = 9 * tt
        return (ntok * C * (2 * 2 + 4 + 4 + 2)   # x blocks (bf16, 2x buf) + f32 x/z + bf16 z
                + ntok * Mp * 4                   # f32 qkv^T
                + 2 * tt * heads * 9 * 4          # sphere-score blocks
                + 2 * tt * hd * 4                 # output blocks
                + tt * (hd + 8 * 9) * 4)          # per-head temporaries (rough)

    while t > 128 and footprint(t) > vmem_budget:
        t -= 128
    return t


def _attn_sphere_kernel(x_ref, sp_ref, w_ref, b_ref, o_ref, *,
                        heads, dim_head, tile_g, ln_eps):
    n_tok = 9
    d = dim_head
    hd = heads * d
    tg = tile_g

    # ---- LayerNorm over channels; channels on sublanes, tokens lane-dense ----
    x = x_ref[...].astype(jnp.float32)                      # (C, 9*tg)
    mu = jnp.mean(x, axis=0, keepdims=True)
    xc = x - mu
    var = jnp.mean(xc * xc, axis=0, keepdims=True)
    z = xc * jax.lax.rsqrt(var + ln_eps)                    # gamma/beta folded into w/b

    # ---- one MXU matmul: rows = [q | k | v | v-score] of all heads ----
    qkvT = jnp.dot(w_ref[...], z.astype(w_ref.dtype),
                   preferred_element_type=jnp.float32)      # (Mp, 9*tg)
    qkvT = qkvT + b_ref[...]                                 # folded beta @ W bias

    for h in range(heads):
        q = qkvT[h * d:(h + 1) * d, :]                       # (d, 9*tg), scale folded
        k = qkvT[hd + h * d:hd + (h + 1) * d, :]
        v = qkvT[2 * hd + h * d:2 * hd + (h + 1) * d, :]
        vrow = qkvT[3 * hd + h:3 * hd + h + 1, :]            # (1, 9*tg), w_v folded

        # ---- feature score softmax over the 9 window tokens (rows) ----
        fscore = jnp.concatenate(
            [vrow[:, a * tg:(a + 1) * tg] for a in range(n_tok)], axis=0)   # (9, tg)
        fscore = fscore + sp_ref[h * n_tok:(h + 1) * n_tok, :].astype(jnp.float32)
        fmean = jnp.mean(fscore, axis=0, keepdims=True)
        fc = fscore - fmean
        fvar = jnp.sum(fc * fc, axis=0, keepdims=True) * (1.0 / (n_tok - 1))
        # standardized -> zero mean, |.| <= sqrt(8): no max-subtraction needed
        fsn = fc * jax.lax.rsqrt(fvar + 1e-12)               # eps guards padded rows
        fexp = jnp.exp(fsn)
        fs = fexp * pl.reciprocal(jnp.sum(fexp, axis=0, keepdims=True), approx=True)

        # ---- window attention fused with the feature score (group axis on lanes)
        #      wgt[k,g] = sum_q fs[q,g] * softmax_k(q·k)[q,k,g]
        wgt = jnp.zeros((n_tok, tg), jnp.float32)
        for a in range(n_tok):
            qa = q[:, a * tg:(a + 1) * tg]                   # (d, tg)
            rows = [jnp.sum(qa * k[:, b * tg:(b + 1) * tg], axis=0, keepdims=True)
                    for b in range(n_tok)]                   # 9 x (1, tg)
            m = rows[0]
            for b in range(1, n_tok):
                m = jnp.maximum(m, rows[b])
            p = jnp.exp(jnp.concatenate(rows, axis=0) - m)   # (9, tg)
            l = jnp.sum(p, axis=0, keepdims=True)
            coef = fs[a:a + 1, :] * pl.reciprocal(l, approx=True)
            wgt = wgt + p * coef
        # TODO(synk): nn.Dropout(p=0.0) on attn is the identity in eval mode; omitted.

        # ---- out[c,g] = sum_k wgt[k,g] * v[c, k*tg + g] ----
        acc = jnp.zeros((d, tg), jnp.float32)
        for b in range(n_tok):
            acc = acc + v[:, b * tg:(b + 1) * tg] * wgt[b:b + 1, :]
        o_ref[h * d:(h + 1) * d, :] = acc.astype(o_ref.dtype)


def _attention_sphere_cm(x_cm, sphere_point, params, *, heads, dim_head,
                         tile_g, mxu_dtype):
    """Channel-major single layer: x_cm (C, B, H_, W_) -> (C, B, H_/3, W_/3)."""
    C, B, H_, W_ = x_cm.shape
    assert H_ % 3 == 0 and W_ % 3 == 0, "spatial dims must be multiples of 3"
    H, W = H_ // 3, W_ // 3
    d = dim_head
    hd = heads * d
    assert C == hd, "module requires dim == heads * dim_head"
    G = B * H * W
    scale = float(d) ** -0.5

    # ---- fold LayerNorm affine, attention scale and v_proj into one weight ----
    gamma = params["gamma"].reshape(-1).astype(jnp.float32)
    beta = params["beta"].reshape(-1).astype(jnp.float32)
    w = params["w_qkv"].astype(jnp.float32)                  # (C, 3*hd)
    w_v = params["w_v"].reshape(-1).astype(jnp.float32)      # (d,)
    w_p = params["w_p"].reshape(-1).astype(jnp.float32)      # (d,)

    w_q = gamma[:, None] * w[:, :hd] * scale
    w_k = gamma[:, None] * w[:, hd:2 * hd]
    w_vv = gamma[:, None] * w[:, 2 * hd:]
    b_q = (beta @ w[:, :hd]) * scale
    b_k = beta @ w[:, hd:2 * hd]
    b_v = beta @ w[:, 2 * hd:]
    # fold v_proj: one extra "v-score" output row per head
    wsc = jnp.concatenate(
        [w_vv[:, h * d:(h + 1) * d] @ w_v[:, None] for h in range(heads)], axis=1)
    bsc = jnp.stack([b_v[h * d:(h + 1) * d] @ w_v for h in range(heads)])

    rows = 3 * hd + heads
    Mp = _round_up(rows, 8)
    w_all = jnp.concatenate([w_q, w_k, w_vv, wsc], axis=1)   # (C, rows)
    b_all = jnp.concatenate([b_q, b_k, b_v, bsc])            # (rows,)
    wT = jnp.zeros((Mp, C), jnp.float32).at[:rows].set(w_all.T).astype(mxu_dtype)
    bT = jnp.zeros((Mp, 1), jnp.float32).at[:rows, 0].set(b_all)

    # ---- sphere-point projection hoisted out of the kernel (score only) ----
    sp = sphere_point.astype(jnp.float32).reshape(B, heads, d, H, 3, W, 3)
    sps = jnp.einsum('bhdyrxc,d->bhyxrc', sp, w_p)           # (B, heads, H, W, 3, 3)
    sps = jnp.transpose(sps, (1, 4, 5, 0, 2, 3)).reshape(heads * 9, G)

    # ---- tiling ----
    vmem_limit = _vmem_limit_bytes()
    tg = _choose_tile_g(G, C, Mp, heads, hd, tile_g, vmem_limit // 2)
    Gp = _round_up(G, tg)
    n_t = Gp // tg

    # ---- window/token layout: columns = (tile, token a=r*3+c, group-in-tile) ----
    xw = x_cm.reshape(C, B, H, 3, W, 3)
    xw = jnp.transpose(xw, (0, 1, 2, 4, 3, 5)).reshape(C, G, 9)
    if Gp != G:
        xw = jnp.pad(xw, ((0, 0), (0, Gp - G), (0, 0)))
        sps = jnp.pad(sps, ((0, 0), (0, Gp - G)))
    xk = jnp.transpose(xw.reshape(C, n_t, tg, 9), (0, 1, 3, 2))
    xk = xk.reshape(C, n_t * 9 * tg).astype(mxu_dtype)

    kernel = functools.partial(_attn_sphere_kernel, heads=heads, dim_head=d,
                               tile_g=tg, ln_eps=1e-5)
    out = pl.pallas_call(
        kernel,
        out_shape=jax.ShapeDtypeStruct((hd, Gp), x_cm.dtype),
        grid=(n_t,),
        in_specs=[
            pl.BlockSpec((C, 9 * tg), lambda i: (0, i)),
            pl.BlockSpec((heads * 9, tg), lambda i: (0, i)),
            pl.BlockSpec((Mp, C), lambda i: (0, 0)),
            pl.BlockSpec((Mp, 1), lambda i: (0, 0)),
        ],
        out_specs=pl.BlockSpec((hd, tg), lambda i: (0, i)),
        compiler_params=pltpu.CompilerParams(
            dimension_semantics=("parallel",),
            vmem_limit_bytes=vmem_limit),
    )(xk, sps, wT, bT)

    return out[:, :G].reshape(hd, B, H, W)                    # channel-major


def attention_sphere(x, sphere_point, params, *, heads, dim_head,
                     tile_g=512, mxu_dtype=jnp.bfloat16):
    x_cm = jnp.transpose(x, (1, 0, 2, 3))
    out_cm = _attention_sphere_cm(x_cm, sphere_point, params, heads=heads,
                                  dim_head=dim_head, tile_g=tile_g,
                                  mxu_dtype=mxu_dtype)
    return jnp.transpose(out_cm, (1, 0, 2, 3))


def attention_block(x, sphere_point, layer_params, *, heads, dim_head,
                    tile_g=512, mxu_dtype=jnp.bfloat16):
    # NOTE: AttentionBlock.__init__ defines self.norm but never uses it in
    # forward, so it is intentionally omitted.  Activations stay channel-major
    # between layers (no NCHW<->NHWC round trip per layer).
    x_cm = jnp.transpose(x, (1, 0, 2, 3))
    for p in layer_params:
        x_cm = _attention_sphere_cm(x_cm, sphere_point, p, heads=heads,
                                    dim_head=dim_head, tile_g=tile_g,
                                    mxu_dtype=mxu_dtype)
    return jnp.transpose(x_cm, (1, 0, 2, 3))


def init_attention_sphere_params(key, dim, heads, dim_head):
    inner = heads * dim_head
    k1, k2, k3, k4, k5 = jax.random.split(key, 5)
    return {
        # LayerNorm affine
        "gamma": 1.0 + 0.1 * jax.random.normal(k1, (1, dim), jnp.float32),
        "beta": 0.1 * jax.random.normal(k2, (1, dim), jnp.float32),
        # effective (in, out) matrix of nn.Linear(dim, 3*inner, bias=False)
        "w_qkv": jax.random.normal(k3, (dim, 3 * inner), jnp.float32)
        / jnp.sqrt(dim),
        # nn.Linear(dim_head, 1, bias=False) weights
        "w_v": jax.random.normal(k4, (1, dim_head), jnp.float32)
        / jnp.sqrt(dim_head),
        "w_p": jax.random.normal(k5, (1, dim_head), jnp.float32)
        / jnp.sqrt(dim_head),
    }


# ----------------------- pure-JAX reference (for checking) -----------------------
def attention_sphere_ref(x, sphere_point, params, *, heads, dim_head):
    B, C, H_, W_ = x.shape
    H, W = H_ // 3, W_ // 3
    d = dim_head
    xt = jnp.transpose(x, (0, 2, 3, 1)).reshape(B, H_ * W_, C)
    mu = jnp.mean(xt, axis=-1, keepdims=True)
    var = jnp.mean((xt - mu) ** 2, axis=-1, keepdims=True)
    xn = (xt - mu) / jnp.sqrt(var + 1e-5) * params["gamma"][0] + params["beta"][0]
    qkv = xn @ params["w_qkv"]
    hd = heads * d
    q, k, v = qkv[..., :hd], qkv[..., hd:2 * hd], qkv[..., 2 * hd:]

    def to_groups(t):
        t = t.reshape(B, H_ * W_, heads, d).transpose(0, 2, 1, 3)
        t = t.reshape(B, heads, H, 3, W, 3, d).transpose(0, 1, 2, 4, 3, 5, 6)
        return t.reshape(-1, 9, d)

    q_, k_, v_ = to_groups(q), to_groups(k), to_groups(v)
    sp = sphere_point.reshape(B, heads, d, H, 3, W, 3)
    sp = jnp.transpose(sp, (0, 1, 3, 5, 4, 6, 2)).reshape(-1, 9, d)

    fs = (jnp.einsum('gnd,d->gn', v_, params["w_v"][0])
          + jnp.einsum('gnd,d->gn', sp, params["w_p"][0]))
    fm = jnp.mean(fs, axis=1, keepdims=True)
    fstd = jnp.sqrt(jnp.sum((fs - fm) ** 2, axis=1, keepdims=True) / (9 - 1))
    fs = jax.nn.softmax((fs - fm) / fstd, axis=-1)

    dots = jnp.einsum('gqd,gkd->gqk', q_, k_) * (d ** -0.5)
    attn = jax.nn.softmax(dots, axis=-1)
    out = jnp.einsum('gqk,gkd->gqd', attn, v_)
    out = jnp.einsum('gq,gqd->gd', fs, out)
    out = out.reshape(B, heads, H, W, d).transpose(0, 2, 3, 1, 4)
    out = out.reshape(B, H, W, heads * d)
    return jnp.transpose(out, (0, 3, 1, 2))


if __name__ == "__main__":
    def _run_case(case_idx, B, heads, dim_head, H_, W_, depth=1):
        dim = heads * dim_head
        key = jax.random.fold_in(jax.random.PRNGKey(0), case_idx)
        kx, ks, kp = jax.random.split(key, 3)
        x = jax.random.normal(kx, (B, dim, H_, W_), jnp.float32)
        sphere_point = jax.random.normal(ks, (B, dim, H_, W_), jnp.float32)
        layer_params = [
            init_attention_sphere_params(jax.random.fold_in(kp, i), dim, heads,
                                         dim_head)
            for i in range(depth)
        ]

        run = jax.jit(functools.partial(attention_block, heads=heads,
                                        dim_head=dim_head))
        out = jax.block_until_ready(run(x, sphere_point, layer_params))

        ref = x
        for p in layer_params:
            ref = attention_sphere_ref(ref, sphere_point, p, heads=heads,
                                       dim_head=dim_head)
        assert out.shape == (B, dim, H_ // 3, W_ // 3), out.shape
        max_err = float(jnp.max(jnp.abs(out - ref)))
        assert jnp.allclose(out, ref, rtol=5e-2, atol=5e-2), max_err
        return max_err

    _run_case(0, B=2, heads=1, dim_head=32, H_=9, W_=9)   # exercises pad-to-tile
    _run_case(1, B=2, heads=2, dim_head=16, H_=9, W_=9)   # multi-head path
    print("KERNEL_OK")
</pallas_src>

<mosaic_0001>
module attributes {stable_mosaic.version = 11 : i64} {
  func.func @_attn_sphere_kernel(%arg0: i32, %arg1: memref<32x1152xbf16, #tpu.memory_space<vmem>>, %arg2: memref<9x128xf32, #tpu.memory_space<vmem>>, %arg3: memref<104x32xbf16, #tpu.memory_space<vmem>>, %arg4: memref<104x1xf32, #tpu.memory_space<vmem>>, %arg5: memref<32x128xf32, #tpu.memory_space<vmem>>) attributes {dimension_semantics = [#tpu.dimension_semantics<parallel>], iteration_bounds = array<i64: 1>, scalar_prefetch = 0 : i64, scratch_operands = 0 : i64, tpu.core_type = #tpu.core_type<tc>, window_params = [{transform_indices = @transform_0, window_bounds = array<i64: 32, 1152>}, {transform_indices = @transform_1, window_bounds = array<i64: 9, 128>}, {pipeline_mode = #tpu.pipeline_mode<synchronous>, transform_indices = @transform_2, window_bounds = array<i64: 104, 32>}, {pipeline_mode = #tpu.pipeline_mode<synchronous>, transform_indices = @transform_3, window_bounds = array<i64: 104, 1>}, {transform_indices = @transform_4, window_bounds = array<i64: 32, 128>}]} {
    %c0 = arith.constant 0 : index
    %c0_0 = arith.constant 0 : index
    %0 = vector.load %arg1[%c0, %c0_0] : memref<32x1152xbf16, #tpu.memory_space<vmem>>, vector<32x1152xbf16>
    %1 = arith.extf %0 : vector<32x1152xbf16> to vector<32x1152xf32>
    %cst = arith.constant dense<0.000000e+00> : vector<1152xf32>
    %2 = vector.multi_reduction <add>, %1, %cst [0] : vector<32x1152xf32> to vector<1152xf32>
    %3 = vector.shape_cast %2 : vector<1152xf32> to vector<1x1152xf32>
    %cst_1 = arith.constant 3.200000e+01 : f32
    %4 = vector.broadcast %cst_1 : f32 to vector<1x1152xf32>
    %5 = arith.divf %3, %4 : vector<1x1152xf32>
    %6 = vector.broadcast %5 : vector<1x1152xf32> to vector<32x1152xf32>
    %7 = arith.subf %1, %6 : vector<32x1152xf32>
    %8 = arith.mulf %7, %7 : vector<32x1152xf32>
    %cst_2 = arith.constant dense<0.000000e+00> : vector<1152xf32>
    %9 = vector.multi_reduction <add>, %8, %cst_2 [0] : vector<32x1152xf32> to vector<1152xf32>
    %10 = vector.shape_cast %9 : vector<1152xf32> to vector<1x1152xf32>
    %cst_3 = arith.constant 3.200000e+01 : f32
    %11 = vector.broadcast %cst_3 : f32 to vector<1x1152xf32>
    %12 = arith.divf %10, %11 : vector<1x1152xf32>
    %cst_4 = arith.constant 9.99999974E-6 : f32
    %13 = vector.broadcast %cst_4 : f32 to vector<1x1152xf32>
    %14 = arith.addf %12, %13 : vector<1x1152xf32>
    %15 = math.rsqrt %14 : vector<1x1152xf32>
    %16 = vector.broadcast %15 : vector<1x1152xf32> to vector<32x1152xf32>
    %17 = arith.mulf %7, %16 : vector<32x1152xf32>
    %c0_5 = arith.constant 0 : index
    %c0_6 = arith.constant 0 : index
    %18 = vector.load %arg3[%c0_5, %c0_6] : memref<104x32xbf16, #tpu.memory_space<vmem>>, vector<104x32xbf16>
    %19 = arith.truncf %17 : vector<32x1152xf32> to vector<32x1152xbf16>
    %cst_7 = arith.constant dense<0.000000e+00> : vector<104x1152xf32>
    %20 = tpu.matmul %18, %19, %cst_7 {dimension_numbers = #tpu.dot_dimension_numbers<[1], [0], [0], [1], [0, 0, 1, 1], [], []>} : vector<104x32xbf16>, vector<32x1152xbf16>, vector<104x1152xf32> -> vector<104x1152xf32>
    %c0_8 = arith.constant 0 : index
    %c0_9 = arith.constant 0 : index
    %21 = vector.load %arg4[%c0_8, %c0_9] : memref<104x1xf32, #tpu.memory_space<vmem>>, vector<104x1xf32>
    %22 = vector.broadcast %21 : vector<104x1xf32> to vector<104x1152xf32>
    %23 = arith.addf %20, %22 : vector<104x1152xf32>
    %24 = vector.extract_strided_slice %23 {offsets = [0, 0], sizes = [32, 1152], strides = [1, 1]} : vector<104x1152xf32> to vector<32x1152xf32>
    %25 = vector.extract_strided_slice %23 {offsets = [32, 0], sizes = [32, 1152], strides = [1, 1]} : vector<104x1152xf32> to vector<32x1152xf32>
    %26 = vector.extract_strided_slice %23 {offsets = [64, 0], sizes = [32, 1152], strides = [1, 1]} : vector<104x1152xf32> to vector<32x1152xf32>
    %27 = vector.extract_strided_slice %23 {offsets = [96, 0], sizes = [1, 1152], strides = [1, 1]} : vector<104x1152xf32> to vector<1x1152xf32>
    %28 = vector.extract_strided_slice %27 {offsets = [0, 0], sizes = [1, 128], strides = [1, 1]} : vector<1x1152xf32> to vector<1x128xf32>
    %29 = vector.extract_strided_slice %27 {offsets = [0, 128], sizes = [1, 128], strides = [1, 1]} : vector<1x1152xf32> to vector<1x128xf32>
    %30 = vector.extract_strided_slice %27 {offsets = [0, 256], sizes = [1, 128], strides = [1, 1]} : vector<1x1152xf32> to vector<1x128xf32>
    %31 = vector.extract_strided_slice %27 {offsets = [0, 384], sizes = [1, 128], strides = [1, 1]} : vector<1x1152xf32> to vector<1x128xf32>
    %32 = vector.extract_strided_slice %27 {offsets = [0, 512], sizes = [1, 128], strides = [1, 1]} : vector<1x1152xf32> to vector<1x128xf32>
    %33 = vector.extract_strided_slice %27 {offsets = [0, 640], sizes = [1, 128], strides = [1, 1]} : vector<1x1152xf32> to vector<1x128xf32>
    %34 = vector.extract_strided_slice %27 {offsets = [0, 768], sizes = [1, 128], strides = [1, 1]} : vector<1x1152xf32> to vector<1x128xf32>
    %35 = vector.extract_strided_slice %27 {offsets = [0, 896], sizes = [1, 128], strides = [1, 1]} : vector<1x1152xf32> to vector<1x128xf32>
    %36 = vector.extract_strided_slice %27 {offsets = [0, 1024], sizes = [1, 128], strides = [1, 1]} : vector<1x1152xf32> to vector<1x128xf32>
    %37 = tpu.concatenate %28, %29, %30, %31, %32, %33, %34, %35, %36 in 0 : vector<1x128xf32>, vector<1x128xf32>, vector<1x128xf32>, vector<1x128xf32>, vector<1x128xf32>, vector<1x128xf32>, vector<1x128xf32>, vector<1x128xf32>, vector<1x128xf32> -> vector<9x128xf32>
    %c0_10 = arith.constant 0 : index
    %c0_11 = arith.constant 0 : index
    %38 = vector.load %arg2[%c0_10, %c0_11] : memref<9x128xf32, #tpu.memory_space<vmem>>, vector<9x128xf32>
    %39 = arith.addf %37, %38 : vector<9x128xf32>
    %cst_12 = arith.constant dense<0.000000e+00> : vector<128xf32>
    %40 = vector.multi_reduction <add>, %39, %cst_12 [0] : vector<9x128xf32> to vector<128xf32>
    %41 = vector.shape_cast %40 : vector<128xf32> to vector<1x128xf32>
    %cst_13 = arith.constant 9.000000e+00 : f32
    %42 = vector.broadcast %cst_13 : f32 to vector<1x128xf32>
    %43 = arith.divf %41, %42 : vector<1x128xf32>
    %44 = vector.broadcast %43 : vector<1x128xf32> to vector<9x128xf32>
    %45 = arith.subf %39, %44 : vector<9x128xf32>
    %46 = arith.mulf %45, %45 : vector<9x128xf32>
    %cst_14 = arith.constant dense<0.000000e+00> : vector<128xf32>
    %47 = vector.multi_reduction <add>, %46, %cst_14 [0] : vector<9x128xf32> to vector<128xf32>
    %48 = vector.shape_cast %47 : vector<128xf32> to vector<1x128xf32>
    %cst_15 = arith.constant 1.250000e-01 : f32
    %49 = vector.broadcast %cst_15 : f32 to vector<1x128xf32>
    %50 = arith.mulf %48, %49 : vector<1x128xf32>
    %cst_16 = arith.constant 9.99999996E-13 : f32
    %51 = vector.broadcast %cst_16 : f32 to vector<1x128xf32>
    %52 = arith.addf %50, %51 : vector<1x128xf32>
    %53 = math.rsqrt %52 : vector<1x128xf32>
    %54 = vector.broadcast %53 : vector<1x128xf32> to vector<9x128xf32>
    %55 = arith.mulf %45, %54 : vector<9x128xf32>
    %56 = math.exp %55 : vector<9x128xf32>
    %cst_17 = arith.constant dense<0.000000e+00> : vector<128xf32>
    %57 = vector.multi_reduction <add>, %56, %cst_17 [0] : vector<9x128xf32> to vector<128xf32>
    %58 = vector.shape_cast %57 : vector<128xf32> to vector<1x128xf32>
    %59 = tpu.reciprocal %58 {approx = true} : vector<1x128xf32> -> vector<1x128xf32>
    %60 = vector.broadcast %59 : vector<1x128xf32> to vector<9x128xf32>
    %61 = arith.mulf %56, %60 : vector<9x128xf32>
    %cst_18 = arith.constant 0.000000e+00 : f32
    %62 = vector.broadcast %cst_18 : f32 to vector<9x128xf32>
    %63 = vector.extract_strided_slice %24 {offsets = [0, 0], sizes = [32, 128], strides = [1, 1]} : vector<32x1152xf32> to vector<32x128xf32>
    %64 = vector.extract_strided_slice %25 {offsets = [0, 0], sizes = [32, 128], strides = [1, 1]} : vector<32x1152xf32> to vector<32x128xf32>
    %65 = arith.mulf %63, %64 : vector<32x128xf32>
    %cst_19 = arith.constant dense<0.000000e+00> : vector<128xf32>
    %66 = vector.multi_reduction <add>, %65, %cst_19 [0] : vector<32x128xf32> to vector<128xf32>
    %67 = vector.shape_cast %66 : vector<128xf32> to vector<1x128xf32>
    %68 = vector.extract_strided_slice %25 {offsets = [0, 128], sizes = [32, 128], strides = [1, 1]} : vector<32x1152xf32> to vector<32x128xf32>
    %69 = arith.mulf %63, %68 : vector<32x128xf32>
    %cst_20 = arith.constant dense<0.000000e+00> : vector<128xf32>
    %70 = vector.multi_reduction <add>, %69, %cst_20 [0] : vector<32x128xf32> to vector<128xf32>
    %71 = vector.shape_cast %70 : vector<128xf32> to vector<1x128xf32>
    %72 = vector.extract_strided_slice %25 {offsets = [0, 256], sizes = [32, 128], strides = [1, 1]} : vector<32x1152xf32> to vector<32x128xf32>
    %73 = arith.mulf %63, %72 : vector<32x128xf32>
    %cst_21 = arith.constant dense<0.000000e+00> : vector<128xf32>
    %74 = vector.multi_reduction <add>, %73, %cst_21 [0] : vector<32x128xf32> to vector<128xf32>
    %75 = vector.shape_cast %74 : vector<128xf32> to vector<1x128xf32>
    %76 = vector.extract_strided_slice %25 {offsets = [0, 384], sizes = [32, 128], strides = [1, 1]} : vector<32x1152xf32> to vector<32x128xf32>
    %77 = arith.mulf %63, %76 : vector<32x128xf32>
    %cst_22 = arith.constant dense<0.000000e+00> : vector<128xf32>
    %78 = vector.multi_reduction <add>, %77, %cst_22 [0] : vector<32x128xf32> to vector<128xf32>
    %79 = vector.shape_cast %78 : vector<128xf32> to vector<1x128xf32>
    %80 = vector.extract_strided_slice %25 {offsets = [0, 512], sizes = [32, 128], strides = [1, 1]} : vector<32x1152xf32> to vector<32x128xf32>
    %81 = arith.mulf %63, %80 : vector<32x128xf32>
    %cst_23 = arith.constant dense<0.000000e+00> : vector<128xf32>
    %82 = vector.multi_reduction <add>, %81, %cst_23 [0] : vector<32x128xf32> to vector<128xf32>
    %83 = vector.shape_cast %82 : vector<128xf32> to vector<1x128xf32>
    %84 = vector.extract_strided_slice %25 {offsets = [0, 640], sizes = [32, 128], strides = [1, 1]} : vector<32x1152xf32> to vector<32x128xf32>
    %85 = arith.mulf %63, %84 : vector<32x128xf32>
    %cst_24 = arith.constant dense<0.000000e+00> : vector<128xf32>
    %86 = vector.multi_reduction <add>, %85, %cst_24 [0] : vector<32x128xf32> to vector<128xf32>
    %87 = vector.shape_cast %86 : vector<128xf32> to vector<1x128xf32>
    %88 = vector.extract_strided_slice %25 {offsets = [0, 768], sizes = [32, 128], strides = [1, 1]} : vector<32x1152xf32> to vector<32x128xf32>
    %89 = arith.mulf %63, %88 : vector<32x128xf32>
    %cst_25 = arith.constant dense<0.000000e+00> : vector<128xf32>
    %90 = vector.multi_reduction <add>, %89, %cst_25 [0] : vector<32x128xf32> to vector<128xf32>
    %91 = vector.shape_cast %90 : vector<128xf32> to vector<1x128xf32>
    %92 = vector.extract_strided_slice %25 {offsets = [0, 896], sizes = [32, 128], strides = [1, 1]} : vector<32x1152xf32> to vector<32x128xf32>
    %93 = arith.mulf %63, %92 : vector<32x128xf32>
    %cst_26 = arith.constant dense<0.000000e+00> : vector<128xf32>
    %94 = vector.multi_reduction <add>, %93, %cst_26 [0] : vector<32x128xf32> to vector<128xf32>
    %95 = vector.shape_cast %94 : vector<128xf32> to vector<1x128xf32>
    %96 = vector.extract_strided_slice %25 {offsets = [0, 1024], sizes = [32, 128], strides = [1, 1]} : vector<32x1152xf32> to vector<32x128xf32>
    %97 = arith.mulf %63, %96 : vector<32x128xf32>
    %cst_27 = arith.constant dense<0.000000e+00> : vector<128xf32>
    %98 = vector.multi_reduction <add>, %97, %cst_27 [0] : vector<32x128xf32> to vector<128xf32>
    %99 = vector.shape_cast %98 : vector<128xf32> to vector<1x128xf32>
    %100 = arith.maximumf %67, %71 : vector<1x128xf32>
    %101 = arith.maximumf %100, %75 : vector<1x128xf32>
    %102 = arith.maximumf %101, %79 : vector<1x128xf32>
    %103 = arith.maximumf %102, %83 : vector<1x128xf32>
    %104 = arith.maximumf %103, %87 : vector<1x128xf32>
    %105 = arith.maximumf %104, %91 : vector<1x128xf32>
    %106 = arith.maximumf %105, %95 : vector<1x128xf32>
    %107 = arith.maximumf %106, %99 : vector<1x128xf32>
    %108 = tpu.concatenate %67, %71, %75, %79, %83, %87, %91, %95, %99 in 0 : vector<1x128xf32>, vector<1x128xf32>, vector<1x128xf32>, vector<1x128xf32>, vector<1x128xf32>, vector<1x128xf32>, vector<1x128xf32>, vector<1x128xf32>, vector<1x128xf32> -> vector<9x128xf32>
    %109 = vector.broadcast %107 : vector<1x128xf32> to vector<9x128xf32>
    %110 = arith.subf %108, %109 : vector<9x128xf32>
    %111 = math.exp %110 : vector<9x128xf32>
    %cst_28 = arith.constant dense<0.000000e+00> : vector<128xf32>
    %112 = vector.multi_reduction <add>, %111, %cst_28 [0] : vector<9x128xf32> to vector<128xf32>
    %113 = vector.shape_cast %112 : vector<128xf32> to vector<1x128xf32>
    %114 = vector.extract_strided_slice %61 {offsets = [0, 0], sizes = [1, 128], strides = [1, 1]} : vector<9x128xf32> to vector<1x128xf32>
    %115 = tpu.reciprocal %113 {approx = true} : vector<1x128xf32> -> vector<1x128xf32>
    %116 = arith.mulf %114, %115 : vector<1x128xf32>
    %117 = vector.broadcast %116 : vector<1x128xf32> to vector<9x128xf32>
    %118 = arith.mulf %111, %117 : vector<9x128xf32>
    %119 = arith.addf %62, %118 : vector<9x128xf32>
    %120 = vector.extract_strided_slice %24 {offsets = [0, 128], sizes = [32, 128], strides = [1, 1]} : vector<32x1152xf32> to vector<32x128xf32>
    %121 = vector.extract_strided_slice %25 {offsets = [0, 0], sizes = [32, 128], strides = [1, 1]} : vector<32x1152xf32> to vector<32x128xf32>
    %122 = arith.mulf %120, %121 : vector<32x128xf32>
    %cst_29 = arith.constant dense<0.000000e+00> : vector<128xf32>
    %123 = vector.multi_reduction <add>, %122, %cst_29 [0] : vector<32x128xf32> to vector<128xf32>
    %124 = vector.shape_cast %123 : vector<128xf32> to vector<1x128xf32>
    %125 = vector.extract_strided_slice %25 {offsets = [0, 128], sizes = [32, 128], strides = [1, 1]} : vector<32x1152xf32> to vector<32x128xf32>
    %126 = arith.mulf %120, %125 : vector<32x128xf32>
    %cst_30 = arith.constant dense<0.000000e+00> : vector<128xf32>
    %127 = vector.multi_reduction <add>, %126, %cst_30 [0] : vector<32x128xf32> to vector<128xf32>
    %128 = vector.shape_cast %127 : vector<128xf32> to vector<1x128xf32>
    %129 = vector.extract_strided_slice %25 {offsets = [0, 256], sizes = [32, 128], strides = [1, 1]} : vector<32x1152xf32> to vector<32x128xf32>
    %130 = arith.mulf %120, %129 : vector<32x128xf32>
    %cst_31 = arith.constant dense<0.000000e+00> : vector<128xf32>
    %131 = vector.multi_reduction <add>, %130, %cst_31 [0] : vector<32x128xf32> to vector<128xf32>
    %132 = vector.shape_cast %131 : vector<128xf32> to vector<1x128xf32>
    %133 = vector.extract_strided_slice %25 {offsets = [0, 384], sizes = [32, 128], strides = [1, 1]} : vector<32x1152xf32> to vector<32x128xf32>
    %134 = arith.mulf %120, %133 : vector<32x128xf32>
    %cst_32 = arith.constant dense<0.000000e+00> : vector<128xf32>
    %135 = vector.multi_reduction <add>, %134, %cst_32 [0] : vector<32x128xf32> to vector<128xf32>
    %136 = vector.shape_cast %135 : vector<128xf32> to vector<1x128xf32>
    %137 = vector.extract_strided_slice %25 {offsets = [0, 512], sizes = [32, 128], strides = [1, 1]} : vector<32x1152xf32> to vector<32x128xf32>
    %138 = arith.mulf %120, %137 : vector<32x128xf32>
    %cst_33 = arith.constant dense<0.000000e+00> : vector<128xf32>
    %139 = vector.multi_reduction <add>, %138, %cst_33 [0] : vector<32x128xf32> to vector<128xf32>
    %140 = vector.shape_cast %139 : vector<128xf32> to vector<1x128xf32>
    %141 = vector.extract_strided_slice %25 {offsets = [0, 640], sizes = [32, 128], strides = [1, 1]} : vector<32x1152xf32> to vector<32x128xf32>
    %142 = arith.mulf %120, %141 : vector<32x128xf32>
    %cst_34 = arith.constant dense<0.000000e+00> : vector<128xf32>
    %143 = vector.multi_reduction <add>, %142, %cst_34 [0] : vector<32x128xf32> to vector<128xf32>
    %144 = vector.shape_cast %143 : vector<128xf32> to vector<1x128xf32>
    %145 = vector.extract_strided_slice %25 {offsets = [0, 768], sizes = [32, 128], strides = [1, 1]} : vector<32x1152xf32> to vector<32x128xf32>
    %146 = arith.mulf %120, %145 : vector<32x128xf32>
    %cst_35 = arith.constant dense<0.000000e+00> : vector<128xf32>
    %147 = vector.multi_reduction <add>, %146, %cst_35 [0] : vector<32x128xf32> to vector<128xf32>
    %148 = vector.shape_cast %147 : vector<128xf32> to vector<1x128xf32>
    %149 = vector.extract_strided_slice %25 {offsets = [0, 896], sizes = [32, 128], strides = [1, 1]} : vector<32x1152xf32> to vector<32x128xf32>
    %150 = arith.mulf %120, %149 : vector<32x128xf32>
    %cst_36 = arith.constant dense<0.000000e+00> : vector<128xf32>
    %151 = vector.multi_reduction <add>, %150, %cst_36 [0] : vector<32x128xf32> to vector<128xf32>
    %152 = vector.shape_cast %151 : vector<128xf32> to vector<1x128xf32>
    %153 = vector.extract_strided_slice %25 {offsets = [0, 1024], sizes = [32, 128], strides = [1, 1]} : vector<32x1152xf32> to vector<32x128xf32>
    %154 = arith.mulf %120, %153 : vector<32x128xf32>
    %cst_37 = arith.constant dense<0.000000e+00> : vector<128xf32>
    %155 = vector.multi_reduction <add>, %154, %cst_37 [0] : vector<32x128xf32> to vector<128xf32>
    %156 = vector.shape_cast %155 : vector<128xf32> to vector<1x128xf32>
    %157 = arith.maximumf %124, %128 : vector<1x128xf32>
    %158 = arith.maximumf %157, %132 : vector<1x128xf32>
    %159 = arith.maximumf %158, %136 : vector<1x128xf32>
    %160 = arith.maximumf %159, %140 : vector<1x128xf32>
    %161 = arith.maximumf %160, %144 : vector<1x128xf32>
    %162 = arith.maximumf %161, %148 : vector<1x128xf32>
    %163 = arith.maximumf %162, %152 : vector<1x128xf32>
    %164 = arith.maximumf %163, %156 : vector<1x128xf32>
    %165 = tpu.concatenate %124, %128, %132, %136, %140, %144, %148, %152, %156 in 0 : vector<1x128xf32>, vector<1x128xf32>, vector<1x128xf32>, vector<1x128xf32>, vector<1x128xf32>, vector<1x128xf32>, vector<1x128xf32>, vector<1x128xf32>, vector<1x128xf32> -> vector<9x128xf32>
    %166 = vector.broadcast %164 : vector<1x128xf32> to vector<9x128xf32>
    %167 = arith.subf %165, %166 : vector<9x128xf32>
    %168 = math.exp %167 : vector<9x128xf32>
    %cst_38 = arith.constant dense<0.000000e+00> : vector<128xf32>
    %169 = vector.multi_reduction <add>, %168, %cst_38 [0] : vector<9x128xf32> to vector<128xf32>
    %170 = vector.shape_cast %169 : vector<128xf32> to vector<1x128xf32>
    %171 = vector.extract_strided_slice %61 {offsets = [1, 0], sizes = [1, 128], strides = [1, 1]} : vector<9x128xf32> to vector<1x128xf32>
    %172 = tpu.reciprocal %170 {approx = true} : vector<1x128xf32> -> vector<1x128xf32>
    %173 = arith.mulf %171, %172 : vector<1x128xf32>
    %174 = vector.broadcast %173 : vector<1x128xf32> to vector<9x128xf32>
    %175 = arith.mulf %168, %174 : vector<9x128xf32>
    %176 = arith.addf %119, %175 : vector<9x128xf32>
    %177 = vector.extract_strided_slice %24 {offsets = [0, 256], sizes = [32, 128], strides = [1, 1]} : vector<32x1152xf32> to vector<32x128xf32>
    %178 = vector.extract_strided_slice %25 {offsets = [0, 0], sizes = [32, 128], strides = [1, 1]} : vector<32x1152xf32> to vector<32x128xf32>
    %179 = arith.mulf %177, %178 : vector<32x128xf32>
    %cst_39 = arith.constant dense<0.000000e+00> : vector<128xf32>
    %180 = vector.multi_reduction <add>, %179, %cst_39 [0] : vector<32x128xf32> to vector<128xf32>
    %181 = vector.shape_cast %180 : vector<128xf32> to vector<1x128xf32>
    %182 = vector.extract_strided_slice %25 {offsets = [0, 128], sizes = [32, 128], strides = [1, 1]} : vector<32x1152xf32> to vector<32x128xf32>
    %183 = arith.mulf %177, %182 : vector<32x128xf32>
    %cst_40 = arith.constant dense<0.000000e+00> : vector<128xf32>
    %184 = vector.multi_reduction <add>, %183, %cst_40 [0] : vector<32x128xf32> to vector<128xf32>
    %185 = vector.shape_cast %184 : vector<128xf32> to vector<1x128xf32>
    %186 = vector.extract_strided_slice %25 {offsets = [0, 256], sizes = [32, 128], strides = [1, 1]} : vector<32x1152xf32> to vector<32x128xf32>
    %187 = arith.mulf %177, %186 : vector<32x128xf32>
    %cst_41 = arith.constant dense<0.000000e+00> : vector<128xf32>
    %188 = vector.multi_reduction <add>, %187, %cst_41 [0] : vector<32x128xf32> to vector<128xf32>
    %189 = vector.shape_cast %188 : vector<128xf32> to vector<1x128xf32>
    %190 = vector.extract_strided_slice %25 {offsets = [0, 384], sizes = [32, 128], strides = [1, 1]} : vector<32x1152xf32> to vector<32x128xf32>
    %191 = arith.mulf %177, %190 : vector<32x128xf32>
    %cst_42 = arith.constant dense<0.000000e+00> : vector<128xf32>
    %192 = vector.multi_reduction <add>, %191, %cst_42 [0] : vector<32x128xf32> to vector<128xf32>
    %193 = vector.shape_cast %192 : vector<128xf32> to vector<1x128xf32>
    %194 = vector.extract_strided_slice %25 {offsets = [0, 512], sizes = [32, 128], strides = [1, 1]} : vector<32x1152xf32> to vector<32x128xf32>
    %195 = arith.mulf %177, %194 : vector<32x128xf32>
    %cst_43 = arith.constant dense<0.000000e+00> : vector<128xf32>
    %196 = vector.multi_reduction <add>, %195, %cst_43 [0] : vector<32x128xf32> to vector<128xf32>
    %197 = vector.shape_cast %196 : vector<128xf32> to vector<1x128xf32>
    %198 = vector.extract_strided_slice %25 {offsets = [0, 640], sizes = [32, 128], strides = [1, 1]} : vector<32x1152xf32> to vector<32x128xf32>
    %199 = arith.mulf %177, %198 : vector<32x128xf32>
    %cst_44 = arith.constant dense<0.000000e+00> : vector<128xf32>
    %200 = vector.multi_reduction <add>, %199, %cst_44 [0] : vector<32x128xf32> to vector<128xf32>
    %201 = vector.shape_cast %200 : vector<128xf32> to vector<1x128xf32>
    %202 = vector.extract_strided_slice %25 {offsets = [0, 768], sizes = [32, 128], strides = [1, 1]} : vector<32x1152xf32> to vector<32x128xf32>
    %203 = arith.mulf %177, %202 : vector<32x128xf32>
    %cst_45 = arith.constant dense<0.000000e+00> : vector<128xf32>
    %204 = vector.multi_reduction <add>, %203, %cst_45 [0] : vector<32x128xf32> to vector<128xf32>
    %205 = vector.shape_cast %204 : vector<128xf32> to vector<1x128xf32>
    %206 = vector.extract_strided_slice %25 {offsets = [0, 896], sizes = [32, 128], strides = [1, 1]} : vector<32x1152xf32> to vector<32x128xf32>
    %207 = arith.mulf %177, %206 : vector<32x128xf32>
    %cst_46 = arith.constant dense<0.000000e+00> : vector<128xf32>
    %208 = vector.multi_reduction <add>, %207, %cst_46 [0] : vector<32x128xf32> to vector<128xf32>
    %209 = vector.shape_cast %208 : vector<128xf32> to vector<1x128xf32>
    %210 = vector.extract_strided_slice %25 {offsets = [0, 1024], sizes = [32, 128], strides = [1, 1]} : vector<32x1152xf32> to vector<32x128xf32>
    %211 = arith.mulf %177, %210 : vector<32x128xf32>
    %cst_47 = arith.constant dense<0.000000e+00> : vector<128xf32>
    %212 = vector.multi_reduction <add>, %211, %cst_47 [0] : vector<32x128xf32> to vector<128xf32>
    %213 = vector.shape_cast %212 : vector<128xf32> to vector<1x128xf32>
    %214 = arith.maximumf %181, %185 : vector<1x128xf32>
    %215 = arith.maximumf %214, %189 : vector<1x128xf32>
    %216 = arith.maximumf %215, %193 : vector<1x128xf32>
    %217 = arith.maximumf %216, %197 : vector<1x128xf32>
    %218 = arith.maximumf %217, %201 : vector<1x128xf32>
    %219 = arith.maximumf %218, %205 : vector<1x128xf32>
    %220 = arith.maximumf %219, %209 : vector<1x128xf32>
    %221 = arith.maximumf %220, %213 : vector<1x128xf32>
    %222 = tpu.concatenate %181, %185, %189, %193, %197, %201, %205, %209, %213 in 0 : vector<1x128xf32>, vector<1x128xf32>, vector<1x128xf32>, vector<1x128xf32>, vector<1x128xf32>, vector<1x128xf32>, vector<1x128xf32>, vector<1x128xf32>, vector<1x128xf32> -> vector<9x128xf32>
    %223 = vector.broadcast %221 : vector<1x128xf32> to vector<9x128xf32>
    %224 = arith.subf %222, %223 : vector<9x128xf32>
    %225 = math.exp %224 : vector<9x128xf32>
    %cst_48 = arith.constant dense<0.000000e+00> : vector<128xf32>
    %226 = vector.multi_reduction <add>, %225, %cst_48 [0] : vector<9x128xf32> to vector<128xf32>
    %227 = vector.shape_cast %226 : vector<128xf32> to vector<1x128xf32>
    %228 = vector.extract_strided_slice %61 {offsets = [2, 0], sizes = [1, 128], strides = [1, 1]} : vector<9x128xf32> to vector<1x128xf32>
    %229 = tpu.reciprocal %227 {approx = true} : vector<1x128xf32> -> vector<1x128xf32>
    %230 = arith.mulf %228, %229 : vector<1x128xf32>
    %231 = vector.broadcast %230 : vector<1x128xf32> to vector<9x128xf32>
    %232 = arith.mulf %225, %231 : vector<9x128xf32>
    %233 = arith.addf %176, %232 : vector<9x128xf32>
    %234 = vector.extract_strided_slice %24 {offsets = [0, 384], sizes = [32, 128], strides = [1, 1]} : vector<32x1152xf32> to vector<32x128xf32>
    %235 = vector.extract_strided_slice %25 {offsets = [0, 0], sizes = [32, 128], strides = [1, 1]} : vector<32x1152xf32> to vector<32x128xf32>
    %236 = arith.mulf %234, %235 : vector<32x128xf32>
    %cst_49 = arith.constant dense<0.000000e+00> : vector<128xf32>
    %237 = vector.multi_reduction <add>, %236, %cst_49 [0] : vector<32x128xf32> to vector<128xf32>
    %238 = vector.shape_cast %237 : vector<128xf32> to vector<1x128xf32>
    %239 = vector.extract_strided_slice %25 {offsets = [0, 128], sizes = [32, 128], strides = [1, 1]} : vector<32x1152xf32> to vector<32x128xf32>
    %240 = arith.mulf %234, %239 : vector<32x128xf32>
    %cst_50 = arith.constant dense<0.000000e+00> : vector<128xf32>
    %241 = vector.multi_reduction <add>, %240, %cst_50 [0] : vector<32x128xf32> to vector<128xf32>
    %242 = vector.shape_cast %241 : vector<128xf32> to vector<1x128xf32>
    %243 = vector.extract_strided_slice %25 {offsets = [0, 256], sizes = [32, 128], strides = [1, 1]} : vector<32x1152xf32> to vector<32x128xf32>
    %244 = arith.mulf %234, %243 : vector<32x128xf32>
    %cst_51 = arith.constant dense<0.000000e+00> : vector<128xf32>
    %245 = vector.multi_reduction <add>, %244, %cst_51 [0] : vector<32x128xf32> to vector<128xf32>
    %246 = vector.shape_cast %245 : vector<128xf32> to vector<1x128xf32>
    %247 = vector.extract_strided_slice %25 {offsets = [0, 384], sizes = [32, 128], strides = [1, 1]} : vector<32x1152xf32> to vector<32x128xf32>
    %248 = arith.mulf %234, %247 : vector<32x128xf32>
    %cst_52 = arith.constant dense<0.000000e+00> : vector<128xf32>
    %249 = vector.multi_reduction <add>, %248, %cst_52 [0] : vector<32x128xf32> to vector<128xf32>
    %250 = vector.shape_cast %249 : vector<128xf32> to vector<1x128xf32>
    %251 = vector.extract_strided_slice %25 {offsets = [0, 512], sizes = [32, 128], strides = [1, 1]} : vector<32x1152xf32> to vector<32x128xf32>
    %252 = arith.mulf %234, %251 : vector<32x128xf32>
    %cst_53 = arith.constant dense<0.000000e+00> : vector<128xf32>
    %253 = vector.multi_reduction <add>, %252, %cst_53 [0] : vector<32x128xf32> to vector<128xf32>
    %254 = vector.shape_cast %253 : vector<128xf32> to vector<1x128xf32>
    %255 = vector.extract_strided_slice %25 {offsets = [0, 640], sizes = [32, 128], strides = [1, 1]} : vector<32x1152xf32> to vector<32x128xf32>
    %256 = arith.mulf %234, %255 : vector<32x128xf32>
    %cst_54 = arith.constant dense<0.000000e+00> : vector<128xf32>
    %257 = vector.multi_reduction <add>, %256, %cst_54 [0] : vector<32x128xf32> to vector<128xf32>
    %258 = vector.shape_cast %257 : vector<128xf32> to vector<1x128xf32>
    %259 = vector.extract_strided_slice %25 {offsets = [0, 768], sizes = [32, 128], strides = [1, 1]} : vector<32x1152xf32> to vector<32x128xf32>
    %260 = arith.mulf %234, %259 : vector<32x128xf32>
    %cst_55 = arith.constant dense<0.000000e+00> : vector<128xf32>
    %261 = vector.multi_reduction <add>, %260, %cst_55 [0] : vector<32x128xf32> to vector<128xf32>
    %262 = vector.shape_cast %261 : vector<128xf32> to vector<1x128xf32>
    %263 = vector.extract_strided_slice %25 {offsets = [0, 896], sizes = [32, 128], strides = [1, 1]} : vector<32x1152xf32> to vector<32x128xf32>
    %264 = arith.mulf %234, %263 : vector<32x128xf32>
    %cst_56 = arith.constant dense<0.000000e+00> : vector<128xf32>
    %265 = vector.multi_reduction <add>, %264, %cst_56 [0] : vector<32x128xf32> to vector<128xf32>
    %266 = vector.shape_cast %265 : vector<128xf32> to vector<1x128xf32>
    %267 = vector.extract_strided_slice %25 {offsets = [0, 1024], sizes = [32, 128], strides = [1, 1]} : vector<32x1152xf32> to vector<32x128xf32>
    %268 = arith.mulf %234, %267 : vector<32x128xf32>
    %cst_57 = arith.constant dense<0.000000e+00> : vector<128xf32>
    %269 = vector.multi_reduction <add>, %268, %cst_57 [0] : vector<32x128xf32> to vector<128xf32>
    %270 = vector.shape_cast %269 : vector<128xf32> to vector<1x128xf32>
    %271 = arith.maximumf %238, %242 : vector<1x128xf32>
    %272 = arith.maximumf %271, %246 : vector<1x128xf32>
    %273 = arith.maximumf %272, %250 : vector<1x128xf32>
    %274 = arith.maximumf %273, %254 : vector<1x128xf32>
    %275 = arith.maximumf %274, %258 : vector<1x128xf32>
    %276 = arith.maximumf %275, %262 : vector<1x128xf32>
    %277 = arith.maximumf %276, %266 : vector<1x128xf32>
    %278 = arith.maximumf %277, %270 : vector<1x128xf32>
    %279 = tpu.concatenate %238, %242, %246, %250, %254, %258, %262, %266, %270 in 0 : vector<1x128xf32>, vector<1x128xf32>, vector<1x128xf32>, vector<1x128xf32>, vector<1x128xf32>, vector<1x128xf32>, vector<1x128xf32>, vector<1x128xf32>, vector<1x128xf32> -> vector<9x128xf32>
    %280 = vector.broadcast %278 : vector<1x128xf32> to vector<9x128xf32>
    %281 = arith.subf %279, %280 : vector<9x128xf32>
    %282 = math.exp %281 : vector<9x128xf32>
    %cst_58 = arith.constant dense<0.000000e+00> : vector<128xf32>
    %283 = vector.multi_reduction <add>, %282, %cst_58 [0] : vector<9x128xf32> to vector<128xf32>
    %284 = vector.shape_cast %283 : vector<128xf32> to vector<1x128xf32>
    %285 = vector.extract_strided_slice %61 {offsets = [3, 0], sizes = [1, 128], strides = [1, 1]} : vector<9x128xf32> to vector<1x128xf32>
    %286 = tpu.reciprocal %284 {approx = true} : vector<1x128xf32> -> vector<1x128xf32>
    %287 = arith.mulf %285, %286 : vector<1x128xf32>
    %288 = vector.broadcast %287 : vector<1x128xf32> to vector<9x128xf32>
    %289 = arith.mulf %282, %288 : vector<9x128xf32>
    %290 = arith.addf %233, %289 : vector<9x128xf32>
    %291 = vector.extract_strided_slice %24 {offsets = [0, 512], sizes = [32, 128], strides = [1, 1]} : vector<32x1152xf32> to vector<32x128xf32>
    %292 = vector.extract_strided_slice %25 {offsets = [0, 0], sizes = [32, 128], strides = [1, 1]} : vector<32x1152xf32> to vector<32x128xf32>
    %293 = arith.mulf %291, %292 : vector<32x128xf32>
    %cst_59 = arith.constant dense<0.000000e+00> : vector<128xf32>
    %294 = vector.multi_reduction <add>, %293, %cst_59 [0] : vector<32x128xf32> to vector<128xf32>
    %295 = vector.shape_cast %294 : vector<128xf32> to vector<1x128xf32>
    %296 = vector.extract_strided_slice %25 {offsets = [0, 128], sizes = [32, 128], strides = [1, 1]} : vector<32x1152xf32> to vector<32x128xf32>
    %297 = arith.mulf %291, %296 : vector<32x128xf32>
    %cst_60 = arith.constant dense<0.000000e+00> : vector<128xf32>
    %298 = vector.multi_reduction <add>, %297, %cst_60 [0] : vector<32x128xf32> to vector<128xf32>
    %299 = vector.shape_cast %298 : vector<128xf32> to vector<1x128xf32>
    %300 = vector.extract_strided_slice %25 {offsets = [0, 256], sizes = [32, 128], strides = [1, 1]} : vector<32x1152xf32> to vector<32x128xf32>
    %301 = arith.mulf %291, %300 : vector<32x128xf32>
    %cst_61 = arith.constant dense<0.000000e+00> : vector<128xf32>
    %302 = vector.multi_reduction <add>, %301, %cst_61 [0] : vector<32x128xf32> to vector<128xf32>
    %303 = vector.shape_cast %302 : vector<128xf32> to vector<1x128xf32>
    %304 = vector.extract_strided_slice %25 {offsets = [0, 384], sizes = [32, 128], strides = [1, 1]} : vector<32x1152xf32> to vector<32x128xf32>
    %305 = arith.mulf %291, %304 : vector<32x128xf32>
    %cst_62 = arith.constant dense<0.000000e+00> : vector<128xf32>
    %306 = vector.multi_reduction <add>, %305, %cst_62 [0] : vector<32x128xf32> to vector<128xf32>
    %307 = vector.shape_cast %306 : vector<128xf32> to vector<1x128xf32>
    %308 = vector.extract_strided_slice %25 {offsets = [0, 512], sizes = [32, 128], strides = [1, 1]} : vector<32x1152xf32> to vector<32x128xf32>
    %309 = arith.mulf %291, %308 : vector<32x128xf32>
    %cst_63 = arith.constant dense<0.000000e+00> : vector<128xf32>
    %310 = vector.multi_reduction <add>, %309, %cst_63 [0] : vector<32x128xf32> to vector<128xf32>
    %311 = vector.shape_cast %310 : vector<128xf32> to vector<1x128xf32>
    %312 = vector.extract_strided_slice %25 {offsets = [0, 640], sizes = [32, 128], strides = [1, 1]} : vector<32x1152xf32> to vector<32x128xf32>
    %313 = arith.mulf %291, %312 : vector<32x128xf32>
    %cst_64 = arith.constant dense<0.000000e+00> : vector<128xf32>
    %314 = vector.multi_reduction <add>, %313, %cst_64 [0] : vector<32x128xf32> to vector<128xf32>
    %315 = vector.shape_cast %314 : vector<128xf32> to vector<1x128xf32>
    %316 = vector.extract_strided_slice %25 {offsets = [0, 768], sizes = [32, 128], strides = [1, 1]} : vector<32x1152xf32> to vector<32x128xf32>
    %317 = arith.mulf %291, %316 : vector<32x128xf32>
    %cst_65 = arith.constant dense<0.000000e+00> : vector<128xf32>
    %318 = vector.multi_reduction <add>, %317, %cst_65 [0] : vector<32x128xf32> to vector<128xf32>
    %319 = vector.shape_cast %318 : vector<128xf32> to vector<1x128xf32>
    %320 = vector.extract_strided_slice %25 {offsets = [0, 896], sizes = [32, 128], strides = [1, 1]} : vector<32x1152xf32> to vector<32x128xf32>
    %321 = arith.mulf %291, %320 : vector<32x128xf32>
    %cst_66 = arith.constant dense<0.000000e+00> : vector<128xf32>
    %322 = vector.multi_reduction <add>, %321, %cst_66 [0] : vector<32x128xf32> to vector<128xf32>
    %323 = vector.shape_cast %322 : vector<128xf32> to vector<1x128xf32>
    %324 = vector.extract_strided_slice %25 {offsets = [0, 1024], sizes = [32, 128], strides = [1, 1]} : vector<32x1152xf32> to vector<32x128xf32>
    %325 = arith.mulf %291, %324 : vector<32x128xf32>
    %cst_67 = arith.constant dense<0.000000e+00> : vector<128xf32>
    %326 = vector.multi_reduction <add>, %325, %cst_67 [0] : vector<32x128xf32> to vector<128xf32>
    %327 = vector.shape_cast %326 : vector<128xf32> to vector<1x128xf32>
    %328 = arith.maximumf %295, %299 : vector<1x128xf32>
    %329 = arith.maximumf %328, %303 : vector<1x128xf32>
    %330 = arith.maximumf %329, %307 : vector<1x128xf32>
    %331 = arith.maximumf %330, %311 : vector<1x128xf32>
    %332 = arith.maximumf %331, %315 : vector<1x128xf32>
    %333 = arith.maximumf %332, %319 : vector<1x128xf32>
    %334 = arith.maximumf %333, %323 : vector<1x128xf32>
    %335 = arith.maximumf %334, %327 : vector<1x128xf32>
    %336 = tpu.concatenate %295, %299, %303, %307, %311, %315, %319, %323, %327 in 0 : vector<1x128xf32>, vector<1x128xf32>, vector<1x128xf32>, vector<1x128xf32>, vector<1x128xf32>, vector<1x128xf32>, vector<1x128xf32>, vector<1x128xf32>, vector<1x128xf32> -> vector<9x128xf32>
    %337 = vector.broadcast %335 : vector<1x128xf32> to vector<9x128xf32>
    %338 = arith.subf %336, %337 : vector<9x128xf32>
    %339 = math.exp %338 : vector<9x128xf32>
    %cst_68 = arith.constant dense<0.000000e+00> : vector<128xf32>
    %340 = vector.multi_reduction <add>, %339, %cst_68 [0] : vector<9x128xf32> to vector<128xf32>
    %341 = vector.shape_cast %340 : vector<128xf32> to vector<1x128xf32>
    %342 = vector.extract_strided_slice %61 {offsets = [4, 0], sizes = [1, 128], strides = [1, 1]} : vector<9x128xf32> to vector<1x128xf32>
    %343 = tpu.reciprocal %341 {approx = true} : vector<1x128xf32> -> vector<1x128xf32>
    %344 = arith.mulf %342, %343 : vector<1x128xf32>
    %345 = vector.broadcast %344 : vector<1x128xf32> to vector<9x128xf32>
    %346 = arith.mulf %339, %345 : vector<9x128xf32>
    %347 = arith.addf %290, %346 : vector<9x128xf32>
    %348 = vector.extract_strided_slice %24 {offsets = [0, 640], sizes = [32, 128], strides = [1, 1]} : vector<32x1152xf32> to vector<32x128xf32>
    %349 = vector.extract_strided_slice %25 {offsets = [0, 0], sizes = [32, 128], strides = [1, 1]} : vector<32x1152xf32> to vector<32x128xf32>
    %350 = arith.mulf %348, %349 : vector<32x128xf32>
    %cst_69 = arith.constant dense<0.000000e+00> : vector<128xf32>
    %351 = vector.multi_reduction <add>, %350, %cst_69 [0] : vector<32x128xf32> to vector<128xf32>
    %352 = vector.shape_cast %351 : vector<128xf32> to vector<1x128xf32>
    %353 = vector.extract_strided_slice %25 {offsets = [0, 128], sizes = [32, 128], strides = [1, 1]} : vector<32x1152xf32> to vector<32x128xf32>
    %354 = arith.mulf %348, %353 : vector<32x128xf32>
    %cst_70 = arith.constant dense<0.000000e+00> : vector<128xf32>
    %355 = vector.multi_reduction <add>, %354, %cst_70 [0] : vector<32x128xf32> to vector<128xf32>
    %356 = vector.shape_cast %355 : vector<128xf32> to vector<1x128xf32>
    %357 = vector.extract_strided_slice %25 {offsets = [0, 256], sizes = [32, 128], strides = [1, 1]} : vector<32x1152xf32> to vector<32x128xf32>
    %358 = arith.mulf %348, %357 : vector<32x128xf32>
    %cst_71 = arith.constant dense<0.000000e+00> : vector<128xf32>
    %359 = vector.multi_reduction <add>, %358, %cst_71 [0] : vector<32x128xf32> to vector<128xf32>
    %360 = vector.shape_cast %359 : vector<128xf32> to vector<1x128xf32>
    %361 = vector.extract_strided_slice %25 {offsets = [0, 384], sizes = [32, 128], strides = [1, 1]} : vector<32x1152xf32> to vector<32x128xf32>
    %362 = arith.mulf %348, %361 : vector<32x128xf32>
    %cst_72 = arith.constant dense<0.000000e+00> : vector<128xf32>
    %363 = vector.multi_reduction <add>, %362, %cst_72 [0] : vector<32x128xf32> to vector<128xf32>
    %364 = vector.shape_cast %363 : vector<128xf32> to vector<1x128xf32>
    %365 = vector.extract_strided_slice %25 {offsets = [0, 512], sizes = [32, 128], strides = [1, 1]} : vector<32x1152xf32> to vector<32x128xf32>
    %366 = arith.mulf %348, %365 : vector<32x128xf32>
    %cst_73 = arith.constant dense<0.000000e+00> : vector<128xf32>
    %367 = vector.multi_reduction <add>, %366, %cst_73 [0] : vector<32x128xf32> to vector<128xf32>
    %368 = vector.shape_cast %367 : vector<128xf32> to vector<1x128xf32>
    %369 = vector.extract_strided_slice %25 {offsets = [0, 640], sizes = [32, 128], strides = [1, 1]} : vector<32x1152xf32> to vector<32x128xf32>
    %370 = arith.mulf %348, %369 : vector<32x128xf32>
    %cst_74 = arith.constant dense<0.000000e+00> : vector<128xf32>
    %371 = vector.multi_reduction <add>, %370, %cst_74 [0] : vector<32x128xf32> to vector<128xf32>
    %372 = vector.shape_cast %371 : vector<128xf32> to vector<1x128xf32>
    %373 = vector.extract_strided_slice %25 {offsets = [0, 768], sizes = [32, 128], strides = [1, 1]} : vector<32x1152xf32> to vector<32x128xf32>
    %374 = arith.mulf %348, %373 : vector<32x128xf32>
    %cst_75 = arith.constant dense<0.000000e+00> : vector<128xf32>
    %375 = vector.multi_reduction <add>, %374, %cst_75 [0] : vector<32x128xf32> to vector<128xf32>
    %376 = vector.shape_cast %375 : vector<128xf32> to vector<1x128xf32>
    %377 = vector.extract_strided_slice %25 {offsets = [0, 896], sizes = [32, 128], strides = [1, 1]} : vector<32x1152xf32> to vector<32x128xf32>
    %378 = arith.mulf %348, %377 : vector<32x128xf32>
    %cst_76 = arith.constant dense<0.000000e+00> : vector<128xf32>
    %379 = vector.multi_reduction <add>, %378, %cst_76 [0] : vector<32x128xf32> to vector<128xf32>
    %380 = vector.shape_cast %379 : vector<128xf32> to vector<1x128xf32>
    %381 = vector.extract_strided_slice %25 {offsets = [0, 1024], sizes = [32, 128], strides = [1, 1]} : vector<32x1152xf32> to vector<32x128xf32>
    %382 = arith.mulf %348, %381 : vector<32x128xf32>
    %cst_77 = arith.constant dense<0.000000e+00> : vector<128xf32>
    %383 = vector.multi_reduction <add>, %382, %cst_77 [0] : vector<32x128xf32> to vector<128xf32>
    %384 = vector.shape_cast %383 : vector<128xf32> to vector<1x128xf32>
    %385 = arith.maximumf %352, %356 : vector<1x128xf32>
    %386 = arith.maximumf %385, %360 : vector<1x128xf32>
    %387 = arith.maximumf %386, %364 : vector<1x128xf32>
    %388 = arith.maximumf %387, %368 : vector<1x128xf32>
    %389 = arith.maximumf %388, %372 : vector<1x128xf32>
    %390 = arith.maximumf %389, %376 : vector<1x128xf32>
    %391 = arith.maximumf %390, %380 : vector<1x128xf32>
    %392 = arith.maximumf %391, %384 : vector<1x128xf32>
    %393 = tpu.concatenate %352, %356, %360, %364, %368, %372, %376, %380, %384 in 0 : vector<1x128xf32>, vector<1x128xf32>, vector<1x128xf32>, vector<1x128xf32>, vector<1x128xf32>, vector<1x128xf32>, vector<1x128xf32>, vector<1x128xf32>, vector<1x128xf32> -> vector<9x128xf32>
    %394 = vector.broadcast %392 : vector<1x128xf32> to vector<9x128xf32>
    %395 = arith.subf %393, %394 : vector<9x128xf32>
    %396 = math.exp %395 : vector<9x128xf32>
    %cst_78 = arith.constant dense<0.000000e+00> : vector<128xf32>
    %397 = vector.multi_reduction <add>, %396, %cst_78 [0] : vector<9x128xf32> to vector<128xf32>
    %398 = vector.shape_cast %397 : vector<128xf32> to vector<1x128xf32>
    %399 = vector.extract_strided_slice %61 {offsets = [5, 0], sizes = [1, 128], strides = [1, 1]} : vector<9x128xf32> to vector<1x128xf32>
    %400 = tpu.reciprocal %398 {approx = true} : vector<1x128xf32> -> vector<1x128xf32>
    %401 = arith.mulf %399, %400 : vector<1x128xf32>
    %402 = vector.broadcast %401 : vector<1x128xf32> to vector<9x128xf32>
    %403 = arith.mulf %396, %402 : vector<9x128xf32>
    %404 = arith.addf %347, %403 : vector<9x128xf32>
    %405 = vector.extract_strided_slice %24 {offsets = [0, 768], sizes = [32, 128], strides = [1, 1]} : vector<32x1152xf32> to vector<32x128xf32>
    %406 = vector.extract_strided_slice %25 {offsets = [0, 0], sizes = [32, 128], strides = [1, 1]} : vector<32x1152xf32> to vector<32x128xf32>
    %407 = arith.mulf %405, %406 : vector<32x128xf32>
    %cst_79 = arith.constant dense<0.000000e+00> : vector<128xf32>
    %408 = vector.multi_reduction <add>, %407, %cst_79 [0] : vector<32x128xf32> to vector<128xf32>
    %409 = vector.shape_cast %408 : vector<128xf32> to vector<1x128xf32>
    %410 = vector.extract_strided_slice %25 {offsets = [0, 128], sizes = [32, 128], strides = [1, 1]} : vector<32x1152xf32> to vector<32x128xf32>
    %411 = arith.mulf %405, %410 : vector<32x128xf32>
    %cst_80 = arith.constant dense<0.000000e+00> : vector<128xf32>
    %412 = vector.multi_reduction <add>, %411, %cst_80 [0] : vector<32x128xf32> to vector<128xf32>
    %413 = vector.shape_cast %412 : vector<128xf32> to vector<1x128xf32>
    %414 = vector.extract_strided_slice %25 {offsets = [0, 256], sizes = [32, 128], strides = [1, 1]} : vector<32x1152xf32> to vector<32x128xf32>
    %415 = arith.mulf %405, %414 : vector<32x128xf32>
    %cst_81 = arith.constant dense<0.000000e+00> : vector<128xf32>
    %416 = vector.multi_reduction <add>, %415, %cst_81 [0] : vector<32x128xf32> to vector<128xf32>
    %417 = vector.shape_cast %416 : vector<128xf32> to vector<1x128xf32>
    %418 = vector.extract_strided_slice %25 {offsets = [0, 384], sizes = [32, 128], strides = [1, 1]} : vector<32x1152xf32> to vector<32x128xf32>
    %419 = arith.mulf %405, %418 : vector<32x128xf32>
    %cst_82 = arith.constant dense<0.000000e+00> : vector<128xf32>
    %420 = vector.multi_reduction <add>, %419, %cst_82 [0] : vector<32x128xf32> to vector<128xf32>
    %421 = vector.shape_cast %420 : vector<128xf32> to vector<1x128xf32>
    %422 = vector.extract_strided_slice %25 {offsets = [0, 512], sizes = [32, 128], strides = [1, 1]} : vector<32x1152xf32> to vector<32x128xf32>
    %423 = arith.mulf %405, %422 : vector<32x128xf32>
    %cst_83 = arith.constant dense<0.000000e+00> : vector<128xf32>
    %424 = vector.multi_reduction <add>, %423, %cst_83 [0] : vector<32x128xf32> to vector<128xf32>
    %425 = vector.shape_cast %424 : vector<128xf32> to vector<1x128xf32>
    %426 = vector.extract_strided_slice %25 {offsets = [0, 640], sizes = [32, 128], strides = [1, 1]} : vector<32x1152xf32> to vector<32x128xf32>
    %427 = arith.mulf %405, %426 : vector<32x128xf32>
    %cst_84 = arith.constant dense<0.000000e+00> : vector<128xf32>
    %428 = vector.multi_reduction <add>, %427, %cst_84 [0] : vector<32x128xf32> to vector<128xf32>
    %429 = vector.shape_cast %428 : vector<128xf32> to vector<1x128xf32>
    %430 = vector.extract_strided_slice %25 {offsets = [0, 768], sizes = [32, 128], strides = [1, 1]} : vector<32x1152xf32> to vector<32x128xf32>
    %431 = arith.mulf %405, %430 : vector<32x128xf32>
    %cst_85 = arith.constant dense<0.000000e+00> : vector<128xf32>
    %432 = vector.multi_reduction <add>, %431, %cst_85 [0] : vector<32x128xf32> to vector<128xf32>
    %433 = vector.shape_cast %432 : vector<128xf32> to vector<1x128xf32>
    %434 = vector.extract_strided_slice %25 {offsets = [0, 896], sizes = [32, 128], strides = [1, 1]} : vector<32x1152xf32> to vector<32x128xf32>
    %435 = arith.mulf %405, %434 : vector<32x128xf32>
    %cst_86 = arith.constant dense<0.000000e+00> : vector<128xf32>
    %436 = vector.multi_reduction <add>, %435, %cst_86 [0] : vector<32x128xf32> to vector<128xf32>
    %437 = vector.shape_cast %436 : vector<128xf32> to vector<1x128xf32>
    %438 = vector.extract_strided_slice %25 {offsets = [0, 1024], sizes = [32, 128], strides = [1, 1]} : vector<32x1152xf32> to vector<32x128xf32>
    %439 = arith.mulf %405, %438 : vector<32x128xf32>
    %cst_87 = arith.constant dense<0.000000e+00> : vector<128xf32>
    %440 = vector.multi_reduction <add>, %439, %cst_87 [0] : vector<32x128xf32> to vector<128xf32>
    %441 = vector.shape_cast %440 : vector<128xf32> to vector<1x128xf32>
    %442 = arith.maximumf %409, %413 : vector<1x128xf32>
    %443 = arith.maximumf %442, %417 : vector<1x128xf32>
    %444 = arith.maximumf %443, %421 : vector<1x128xf32>
    %445 = arith.maximumf %444, %425 : vector<1x128xf32>
    %446 = arith.maximumf %445, %429 : vector<1x128xf32>
    %447 = arith.maximumf %446, %433 : vector<1x128xf32>
    %448 = arith.maximumf %447, %437 : vector<1x128xf32>
    %449 = arith.maximumf %448, %441 : vector<1x128xf32>
    %450 = tpu.concatenate %409, %413, %417, %421, %425, %429, %433, %437, %441 in 0 : vector<1x128xf32>, vector<1x128xf32>, vector<1x128xf32>, vector<1x128xf32>, vector<1x128xf32>, vector<1x128xf32>, vector<1x128xf32>, vector<1x128xf32>, vector<1x128xf32> -> vector<9x128xf32>
    %451 = vector.broadcast %449 : vector<1x128xf32> to vector<9x128xf32>
    %452 = arith.subf %450, %451 : vector<9x128xf32>
    %453 = math.exp %452 : vector<9x128xf32>
    %cst_88 = arith.constant dense<0.000000e+00> : vector<128xf32>
    %454 = vector.multi_reduction <add>, %453, %cst_88 [0] : vector<9x128xf32> to vector<128xf32>
    %455 = vector.shape_cast %454 : vector<128xf32> to vector<1x128xf32>
    %456 = vector.extract_strided_slice %61 {offsets = [6, 0], sizes = [1, 128], strides = [1, 1]} : vector<9x128xf32> to vector<1x128xf32>
    %457 = tpu.reciprocal %455 {approx = true} : vector<1x128xf32> -> vector<1x128xf32>
    %458 = arith.mulf %456, %457 : vector<1x128xf32>
    %459 = vector.broadcast %458 : vector<1x128xf32> to vector<9x128xf32>
    %460 = arith.mulf %453, %459 : vector<9x128xf32>
    %461 = arith.addf %404, %460 : vector<9x128xf32>
    %462 = vector.extract_strided_slice %24 {offsets = [0, 896], sizes = [32, 128], strides = [1, 1]} : vector<32x1152xf32> to vector<32x128xf32>
    %463 = vector.extract_strided_slice %25 {offsets = [0, 0], sizes = [32, 128], strides = [1, 1]} : vector<32x1152xf32> to vector<32x128xf32>
    %464 = arith.mulf %462, %463 : vector<32x128xf32>
    %cst_89 = arith.constant dense<0.000000e+00> : vector<128xf32>
    %465 = vector.multi_reduction <add>, %464, %cst_89 [0] : vector<32x128xf32> to vector<128xf32>
    %466 = vector.shape_cast %465 : vector<128xf32> to vector<1x128xf32>
    %467 = vector.extract_strided_slice %25 {offsets = [0, 128], sizes = [32, 128], strides = [1, 1]} : vector<32x1152xf32> to vector<32x128xf32>
    %468 = arith.mulf %462, %467 : vector<32x128xf32>
    %cst_90 = arith.constant dense<0.000000e+00> : vector<128xf32>
    %469 = vector.multi_reduction <add>, %468, %cst_90 [0] : vector<32x128xf32> to vector<128xf32>
    %470 = vector.shape_cast %469 : vector<128xf32> to vector<1x128xf32>
    %471 = vector.extract_strided_slice %25 {offsets = [0, 256], sizes = [32, 128], strides = [1, 1]} : vector<32x1152xf32> to vector<32x128xf32>
    %472 = arith.mulf %462, %471 : vector<32x128xf32>
    %cst_91 = arith.constant dense<0.000000e+00> : vector<128xf32>
    %473 = vector.multi_reduction <add>, %472, %cst_91 [0] : vector<32x128xf32> to vector<128xf32>
    %474 = vector.shape_cast %473 : vector<128xf32> to vector<1x128xf32>
    %475 = vector.extract_strided_slice %25 {offsets = [0, 384], sizes = [32, 128], strides = [1, 1]} : vector<32x1152xf32> to vector<32x128xf32>
    %476 = arith.mulf %462, %475 : vector<32x128xf32>
    %cst_92 = arith.constant dense<0.000000e+00> : vector<128xf32>
    %477 = vector.multi_reduction <add>, %476, %cst_92 [0] : vector<32x128xf32> to vector<128xf32>
    %478 = vector.shape_cast %477 : vector<128xf32> to vector<1x128xf32>
    %479 = vector.extract_strided_slice %25 {offsets = [0, 512], sizes = [32, 128], strides = [1, 1]} : vector<32x1152xf32> to vector<32x128xf32>
    %480 = arith.mulf %462, %479 : vector<32x128xf32>
    %cst_93 = arith.constant dense<0.000000e+00> : vector<128xf32>
    %481 = vector.multi_reduction <add>, %480, %cst_93 [0] : vector<32x128xf32> to vector<128xf32>
    %482 = vector.shape_cast %481 : vector<128xf32> to vector<1x128xf32>
    %483 = vector.extract_strided_slice %25 {offsets = [0, 640], sizes = [32, 128], strides = [1, 1]} : vector<32x1152xf32> to vector<32x128xf32>
    %484 = arith.mulf %462, %483 : vector<32x128xf32>
    %cst_94 = arith.constant dense<0.000000e+00> : vector<128xf32>
    %485 = vector.multi_reduction <add>, %484, %cst_94 [0] : vector<32x128xf32> to vector<128xf32>
    %486 = vector.shape_cast %485 : vector<128xf32> to vector<1x128xf32>
    %487 = vector.extract_strided_slice %25 {offsets = [0, 768], sizes = [32, 128], strides = [1, 1]} : vector<32x1152xf32> to vector<32x128xf32>
    %488 = arith.mulf %462, %487 : vector<32x128xf32>
    %cst_95 = arith.constant dense<0.000000e+00> : vector<128xf32>
    %489 = vector.multi_reduction <add>, %488, %cst_95 [0] : vector<32x128xf32> to vector<128xf32>
    %490 = vector.shape_cast %489 : vector<128xf32> to vector<1x128xf32>
    %491 = vector.extract_strided_slice %25 {offsets = [0, 896], sizes = [32, 128], strides = [1, 1]} : vector<32x1152xf32> to vector<32x128xf32>
    %492 = arith.mulf %462, %491 : vector<32x128xf32>
    %cst_96 = arith.constant dense<0.000000e+00> : vector<128xf32>
    %493 = vector.multi_reduction <add>, %492, %cst_96 [0] : vector<32x128xf32> to vector<128xf32>
    %494 = vector.shape_cast %493 : vector<128xf32> to vector<1x128xf32>
    %495 = vector.extract_strided_slice %25 {offsets = [0, 1024], sizes = [32, 128], strides = [1, 1]} : vector<32x1152xf32> to vector<32x128xf32>
    %496 = arith.mulf %462, %495 : vector<32x128xf32>
    %cst_97 = arith.constant dense<0.000000e+00> : vector<128xf32>
    %497 = vector.multi_reduction <add>, %496, %cst_97 [0] : vector<32x128xf32> to vector<128xf32>
    %498 = vector.shape_cast %497 : vector<128xf32> to vector<1x128xf32>
    %499 = arith.maximumf %466, %470 : vector<1x128xf32>
    %500 = arith.maximumf %499, %474 : vector<1x128xf32>
    %501 = arith.maximumf %500, %478 : vector<1x128xf32>
    %502 = arith.maximumf %501, %482 : vector<1x128xf32>
    %503 = arith.maximumf %502, %486 : vector<1x128xf32>
    %504 = arith.maximumf %503, %490 : vector<1x128xf32>
    %505 = arith.maximumf %504, %494 : vector<1x128xf32>
    %506 = arith.maximumf %505, %498 : vector<1x128xf32>
    %507 = tpu.concatenate %466, %470, %474, %478, %482, %486, %490, %494, %498 in 0 : vector<1x128xf32>, vector<1x128xf32>, vector<1x128xf32>, vector<1x128xf32>, vector<1x128xf32>, vector<1x128xf32>, vector<1x128xf32>, vector<1x128xf32>, vector<1x128xf32> -> vector<9x128xf32>
    %508 = vector.broadcast %506 : vector<1x128xf32> to vector<9x128xf32>
    %509 = arith.subf %507, %508 : vector<9x128xf32>
    %510 = math.exp %509 : vector<9x128xf32>
    %cst_98 = arith.constant dense<0.000000e+00> : vector<128xf32>
    %511 = vector.multi_reduction <add>, %510, %cst_98 [0] : vector<9x128xf32> to vector<128xf32>
    %512 = vector.shape_cast %511 : vector<128xf32> to vector<1x128xf32>
    %513 = vector.extract_strided_slice %61 {offsets = [7, 0], sizes = [1, 128], strides = [1, 1]} : vector<9x128xf32> to vector<1x128xf32>
    %514 = tpu.reciprocal %512 {approx = true} : vector<1x128xf32> -> vector<1x128xf32>
    %515 = arith.mulf %513, %514 : vector<1x128xf32>
    %516 = vector.broadcast %515 : vector<1x128xf32> to vector<9x128xf32>
    %517 = arith.mulf %510, %516 : vector<9x128xf32>
    %518 = arith.addf %461, %517 : vector<9x128xf32>
    %519 = vector.extract_strided_slice %24 {offsets = [0, 1024], sizes = [32, 128], strides = [1, 1]} : vector<32x1152xf32> to vector<32x128xf32>
    %520 = vector.extract_strided_slice %25 {offsets = [0, 0], sizes = [32, 128], strides = [1, 1]} : vector<32x1152xf32> to vector<32x128xf32>
    %521 = arith.mulf %519, %520 : vector<32x128xf32>
    %cst_99 = arith.constant dense<0.000000e+00> : vector<128xf32>
    %522 = vector.multi_reduction <add>, %521, %cst_99 [0] : vector<32x128xf32> to vector<128xf32>
    %523 = vector.shape_cast %522 : vector<128xf32> to vector<1x128xf32>
    %524 = vector.extract_strided_slice %25 {offsets = [0, 128], sizes = [32, 128], strides = [1, 1]} : vector<32x1152xf32> to vector<32x128xf32>
    %525 = arith.mulf %519, %524 : vector<32x128xf32>
    %cst_100 = arith.constant dense<0.000000e+00> : vector<128xf32>
    %526 = vector.multi_reduction <add>, %525, %cst_100 [0] : vector<32x128xf32> to vector<128xf32>
    %527 = vector.shape_cast %526 : vector<128xf32> to vector<1x128xf32>
    %528 = vector.extract_strided_slice %25 {offsets = [0, 256], sizes = [32, 128], strides = [1, 1]} : vector<32x1152xf32> to vector<32x128xf32>
    %529 = arith.mulf %519, %528 : vector<32x128xf32>
    %cst_101 = arith.constant dense<0.000000e+00> : vector<128xf32>
    %530 = vector.multi_reduction <add>, %529, %cst_101 [0] : vector<32x128xf32> to vector<128xf32>
    %531 = vector.shape_cast %530 : vector<128xf32> to vector<1x128xf32>
    %532 = vector.extract_strided_slice %25 {offsets = [0, 384], sizes = [32, 128], strides = [1, 1]} : vector<32x1152xf32> to vector<32x128xf32>
    %533 = arith.mulf %519, %532 : vector<32x128xf32>
    %cst_102 = arith.constant dense<0.000000e+00> : vector<128xf32>
    %534 = vector.multi_reduction <add>, %533, %cst_102 [0] : vector<32x128xf32> to vector<128xf32>
    %535 = vector.shape_cast %534 : vector<128xf32> to vector<1x128xf32>
    %536 = vector.extract_strided_slice %25 {offsets = [0, 512], sizes = [32, 128], strides = [1, 1]} : vector<32x1152xf32> to vector<32x128xf32>
    %537 = arith.mulf %519, %536 : vector<32x128xf32>
    %cst_103 = arith.constant dense<0.000000e+00> : vector<128xf32>
    %538 = vector.multi_reduction <add>, %537, %cst_103 [0] : vector<32x128xf32> to vector<128xf32>
    %539 = vector.shape_cast %538 : vector<128xf32> to vector<1x128xf32>
    %540 = vector.extract_strided_slice %25 {offsets = [0, 640], sizes = [32, 128], strides = [1, 1]} : vector<32x1152xf32> to vector<32x128xf32>
    %541 = arith.mulf %519, %540 : vector<32x128xf32>
    %cst_104 = arith.constant dense<0.000000e+00> : vector<128xf32>
    %542 = vector.multi_reduction <add>, %541, %cst_104 [0] : vector<32x128xf32> to vector<128xf32>
    %543 = vector.shape_cast %542 : vector<128xf32> to vector<1x128xf32>
    %544 = vector.extract_strided_slice %25 {offsets = [0, 768], sizes = [32, 128], strides = [1, 1]} : vector<32x1152xf32> to vector<32x128xf32>
    %545 = arith.mulf %519, %544 : vector<32x128xf32>
    %cst_105 = arith.constant dense<0.000000e+00> : vector<128xf32>
    %546 = vector.multi_reduction <add>, %545, %cst_105 [0] : vector<32x128xf32> to vector<128xf32>
    %547 = vector.shape_cast %546 : vector<128xf32> to vector<1x128xf32>
    %548 = vector.extract_strided_slice %25 {offsets = [0, 896], sizes = [32, 128], strides = [1, 1]} : vector<32x1152xf32> to vector<32x128xf32>
    %549 = arith.mulf %519, %548 : vector<32x128xf32>
    %cst_106 = arith.constant dense<0.000000e+00> : vector<128xf32>
    %550 = vector.multi_reduction <add>, %549, %cst_106 [0] : vector<32x128xf32> to vector<128xf32>
    %551 = vector.shape_cast %550 : vector<128xf32> to vector<1x128xf32>
    %552 = vector.extract_strided_slice %25 {offsets = [0, 1024], sizes = [32, 128], strides = [1, 1]} : vector<32x1152xf32> to vector<32x128xf32>
    %553 = arith.mulf %519, %552 : vector<32x128xf32>
    %cst_107 = arith.constant dense<0.000000e+00> : vector<128xf32>
    %554 = vector.multi_reduction <add>, %553, %cst_107 [0] : vector<32x128xf32> to vector<128xf32>
    %555 = vector.shape_cast %554 : vector<128xf32> to vector<1x128xf32>
    %556 = arith.maximumf %523, %527 : vector<1x128xf32>
    %557 = arith.maximumf %556, %531 : vector<1x128xf32>
    %558 = arith.maximumf %557, %535 : vector<1x128xf32>
    %559 = arith.maximumf %558, %539 : vector<1x128xf32>
    %560 = arith.maximumf %559, %543 : vector<1x128xf32>
    %561 = arith.maximumf %560, %547 : vector<1x128xf32>
    %562 = arith.maximumf %561, %551 : vector<1x128xf32>
    %563 = arith.maximumf %562, %555 : vector<1x128xf32>
    %564 = tpu.concatenate %523, %527, %531, %535, %539, %543, %547, %551, %555 in 0 : vector<1x128xf32>, vector<1x128xf32>, vector<1x128xf32>, vector<1x128xf32>, vector<1x128xf32>, vector<1x128xf32>, vector<1x128xf32>, vector<1x128xf32>, vector<1x128xf32> -> vector<9x128xf32>
    %565 = vector.broadcast %563 : vector<1x128xf32> to vector<9x128xf32>
    %566 = arith.subf %564, %565 : vector<9x128xf32>
    %567 = math.exp %566 : vector<9x128xf32>
    %cst_108 = arith.constant dense<0.000000e+00> : vector<128xf32>
    %568 = vector.multi_reduction <add>, %567, %cst_108 [0] : vector<9x128xf32> to vector<128xf32>
    %569 = vector.shape_cast %568 : vector<128xf32> to vector<1x128xf32>
    %570 = vector.extract_strided_slice %61 {offsets = [8, 0], sizes = [1, 128], strides = [1, 1]} : vector<9x128xf32> to vector<1x128xf32>
    %571 = tpu.reciprocal %569 {approx = true} : vector<1x128xf32> -> vector<1x128xf32>
    %572 = arith.mulf %570, %571 : vector<1x128xf32>
    %573 = vector.broadcast %572 : vector<1x128xf32> to vector<9x128xf32>
    %574 = arith.mulf %567, %573 : vector<9x128xf32>
    %575 = arith.addf %518, %574 : vector<9x128xf32>
    %cst_109 = arith.constant 0.000000e+00 : f32
    %576 = vector.broadcast %cst_109 : f32 to vector<32x128xf32>
    %577 = vector.extract_strided_slice %26 {offsets = [0, 0], sizes = [32, 128], strides = [1, 1]} : vector<32x1152xf32> to vector<32x128xf32>
    %578 = vector.extract_strided_slice %575 {offsets = [0, 0], sizes = [1, 128], strides = [1, 1]} : vector<9x128xf32> to vector<1x128xf32>
    %579 = vector.broadcast %578 : vector<1x128xf32> to vector<32x128xf32>
    %580 = arith.mulf %577, %579 : vector<32x128xf32>
    %581 = arith.addf %576, %580 : vector<32x128xf32>
    %582 = vector.extract_strided_slice %26 {offsets = [0, 128], sizes = [32, 128], strides = [1, 1]} : vector<32x1152xf32> to vector<32x128xf32>
    %583 = vector.extract_strided_slice %575 {offsets = [1, 0], sizes = [1, 128], strides = [1, 1]} : vector<9x128xf32> to vector<1x128xf32>
    %584 = vector.broadcast %583 : vector<1x128xf32> to vector<32x128xf32>
    %585 = arith.mulf %582, %584 : vector<32x128xf32>
    %586 = arith.addf %581, %585 : vector<32x128xf32>
    %587 = vector.extract_strided_slice %26 {offsets = [0, 256], sizes = [32, 128], strides = [1, 1]} : vector<32x1152xf32> to vector<32x128xf32>
    %588 = vector.extract_strided_slice %575 {offsets = [2, 0], sizes = [1, 128], strides = [1, 1]} : vector<9x128xf32> to vector<1x128xf32>
    %589 = vector.broadcast %588 : vector<1x128xf32> to vector<32x128xf32>
    %590 = arith.mulf %587, %589 : vector<32x128xf32>
    %591 = arith.addf %586, %590 : vector<32x128xf32>
    %592 = vector.extract_strided_slice %26 {offsets = [0, 384], sizes = [32, 128], strides = [1, 1]} : vector<32x1152xf32> to vector<32x128xf32>
    %593 = vector.extract_strided_slice %575 {offsets = [3, 0], sizes = [1, 128], strides = [1, 1]} : vector<9x128xf32> to vector<1x128xf32>
    %594 = vector.broadcast %593 : vector<1x128xf32> to vector<32x128xf32>
    %595 = arith.mulf %592, %594 : vector<32x128xf32>
    %596 = arith.addf %591, %595 : vector<32x128xf32>
    %597 = vector.extract_strided_slice %26 {offsets = [0, 512], sizes = [32, 128], strides = [1, 1]} : vector<32x1152xf32> to vector<32x128xf32>
    %598 = vector.extract_strided_slice %575 {offsets = [4, 0], sizes = [1, 128], strides = [1, 1]} : vector<9x128xf32> to vector<1x128xf32>
    %599 = vector.broadcast %598 : vector<1x128xf32> to vector<32x128xf32>
    %600 = arith.mulf %597, %599 : vector<32x128xf32>
    %601 = arith.addf %596, %600 : vector<32x128xf32>
    %602 = vector.extract_strided_slice %26 {offsets = [0, 640], sizes = [32, 128], strides = [1, 1]} : vector<32x1152xf32> to vector<32x128xf32>
    %603 = vector.extract_strided_slice %575 {offsets = [5, 0], sizes = [1, 128], strides = [1, 1]} : vector<9x128xf32> to vector<1x128xf32>
    %604 = vector.broadcast %603 : vector<1x128xf32> to vector<32x128xf32>
    %605 = arith.mulf %602, %604 : vector<32x128xf32>
    %606 = arith.addf %601, %605 : vector<32x128xf32>
    %607 = vector.extract_strided_slice %26 {offsets = [0, 768], sizes = [32, 128], strides = [1, 1]} : vector<32x1152xf32> to vector<32x128xf32>
    %608 = vector.extract_strided_slice %575 {offsets = [6, 0], sizes = [1, 128], strides = [1, 1]} : vector<9x128xf32> to vector<1x128xf32>
    %609 = vector.broadcast %608 : vector<1x128xf32> to vector<32x128xf32>
    %610 = arith.mulf %607, %609 : vector<32x128xf32>
    %611 = arith.addf %606, %610 : vector<32x128xf32>
    %612 = vector.extract_strided_slice %26 {offsets = [0, 896], sizes = [32, 128], strides = [1, 1]} : vector<32x1152xf32> to vector<32x128xf32>
    %613 = vector.extract_strided_slice %575 {offsets = [7, 0], sizes = [1, 128], strides = [1, 1]} : vector<9x128xf32> to vector<1x128xf32>
    %614 = vector.broadcast %613 : vector<1x128xf32> to vector<32x128xf32>
    %615 = arith.mulf %612, %614 : vector<32x128xf32>
    %616 = arith.addf %611, %615 : vector<32x128xf32>
    %617 = vector.extract_strided_slice %26 {offsets = [0, 1024], sizes = [32, 128], strides = [1, 1]} : vector<32x1152xf32> to vector<32x128xf32>
    %618 = vector.extract_strided_slice %575 {offsets = [8, 0], sizes = [1, 128], strides = [1, 1]} : vector<9x128xf32> to vector<1x128xf32>
    %619 = vector.broadcast %618 : vector<1x128xf32> to vector<32x128xf32>
    %620 = arith.mulf %617, %619 : vector<32x128xf32>
    %621 = arith.addf %616, %620 : vector<32x128xf32>
    %c0_110 = arith.constant 0 : index
    %c0_111 = arith.constant 0 : index
    %622 = vector.load %arg5[%c0_110, %c0_111] : memref<32x128xf32, #tpu.memory_space<vmem>>, vector<32x128xf32>
    tpu.vector_store %arg5[%c0_110, %c0_111], %621 {strides = array<i32>} : memref<32x128xf32, #tpu.memory_space<vmem>>, vector<32x128xf32>,
    return
  }
  func.func @transform_0(%arg0: i32) -> (i32, i32) {
    %c0_i32 = arith.constant 0 : i32
    %c0_i32_0 = arith.constant 0 : i32
    return %c0_i32, %arg0 : i32, i32
  }
  func.func @transform_1(%arg0: i32) -> (i32, i32) {
    %c0_i32 = arith.constant 0 : i32
    %c0_i32_0 = arith.constant 0 : i32
    return %c0_i32, %arg0 : i32, i32
  }
  func.func @transform_2(%arg0: i32) -> (i32, i32) {
    %c0_i32 = arith.constant 0 : i32
    %c0_i32_0 = arith.constant 0 : i32
    %c0_i32_1 = arith.constant 0 : i32
    return %c0_i32, %c0_i32_0 : i32, i32
  }
  func.func @transform_3(%arg0: i32) -> (i32, i32) {
    %c0_i32 = arith.constant 0 : i32
    %c0_i32_0 = arith.constant 0 : i32
    %c0_i32_1 = arith.constant 0 : i32
    return %c0_i32, %c0_i32_0 : i32, i32
  }
  func.func @transform_4(%arg0: i32) -> (i32, i32) {
    %c0_i32 = arith.constant 0 : i32
    %c0_i32_0 = arith.constant 0 : i32
    return %c0_i32, %arg0 : i32, i32
  }
}

</mosaic_0001>

<bundles_post_ra>
// kernel: attention_block.1
= control target key start
LH: loop header
LB: loop body
LE: loop exit
PB: predicated region body
PF: predicated region fallthrough
CT: control target
= control target key end

     0   :  { %v5732_v3 = vmov 0   ;;  %vm523_vm0 = vcmask 261120   ;;  %vm2819_vm1 = vmmov 0   ;;  %vm1058_vm2 = vcmask 1040384   ;;  %s5727_s0 = inlined_call_operand.vmem [shape: bf16[32,1152], index: 0, kind: input, shape index: {}]   ;;  %s5728_s2 = inlined_call_operand.vmem [shape: bf16[104,32], index: 2, kind: input, shape index: {}]   ;;  %s5729_s3 = inlined_call_operand.vmem [shape: f32[104,1], index: 3, kind: input, shape index: {}]   ;;  %s5730_s1 = inlined_call_operand.vmem [shape: f32[9,128], index: 1, kind: input, shape index: {}]   ;;  %s5731_s4 = inlined_call_operand.vmem [shape: f32[32,128], index: 4, kind: output, shape index: {}]  }
   0x1   :  { %v2848_v0 = vld [vmem:[%s5727_s0] sm:$0xff]  ;;  %v2858_v2 = vld [vmem:[%s5727_s0 + $0x48] sm:$0xff]  ;;  %577 = vmatprep.mubr.bf16.mxu0 %v5732_v3  ;;  %617 = vmatprep.mubr.bf16.mxu1 %v5732_v3  ;;  %v2884_v14 = vld [vmem:[%s5727_s0 + $0x10] sm:$0xff]  ;;  %vm1060_vm3 = vcmask 1041408   ;;  %vm1062_vm4 = vcmask 1042432   ;;  %vm1064_vm5 = vcmask 1043456  }
   0x2   :  { %v2853_v1 = vld [vmem:[%s5727_s0 + $0x24] sm:$0xff]  ;;  %v2865_v4 = vld [vmem:[%s5727_s0 + $0x6c] sm:$0xff]  ;;  %v39_v5 = vunpack.c.h.bf16 %v2848_v0  ;;  %v57_v7 = vunpack.c.h.bf16 %v2858_v2  ;;  %v38_v8 = vunpack.c.l.bf16 %v2848_v0  ;;  %2728 = vset.pattern.permute.xlu0 %v5732_v3  ;;  %2729 = vset.pattern.permute.xlu1 %v5732_v3  ;;  %v56_v10 = vunpack.c.l.bf16 %v2858_v2  ;;  %v2889_v15 = vld [vmem:[%s5727_s0 + $0x34] sm:$0xff] }
   0x3   :  { %v48_v6 = vunpack.c.h.bf16 %v2853_v1  ;;  %v47_v9 = vunpack.c.l.bf16 %v2853_v1  ;;  %v66_v11 = vunpack.c.h.bf16 %v2865_v4  ;;  %v65_v13 = vunpack.c.l.bf16 %v2865_v4  ;;  %v2898_v17 = vld [vmem:[%s5727_s0 + $0x58] sm:$0xff]  ;;  %v2911_v22 = vld [vmem:[%s5727_s0 + $0x8] sm:$0xff]  ;;  %v2934_v32 = vld [vmem:[%s5727_s0 + $0x50] sm:$0xff] }
   0x4   :  { %v2903_v18 = vld [vmem:[%s5727_s0 + $0x7c] sm:$0xff]  ;;  %v42_v19 = vunpack.c.l.bf16 %v2884_v14  ;;  %v43_v20 = vunpack.c.h.bf16 %v2884_v14  ;;  %v51_v21 = vunpack.c.l.bf16 %v2889_v15  ;;  %v52_v24 = vunpack.c.h.bf16 %v2889_v15  ;;  %v2921_v27 = vld [vmem:[%s5727_s0 + $0x2c] sm:$0xff]  ;;  %v2945_v35 = vld [vmem:[%s5727_s0 + $0x74] sm:$0xff] }
   0x5   :  { %v83_v12 = vadd.f32 %v48_v6, %v39_v5  ;;  %v74_v16 = vadd.f32 %v47_v9, %v38_v8  ;;  %v60_v25 = vunpack.c.l.bf16 %v2898_v17  ;;  %v61_v26 = vunpack.c.h.bf16 %v2898_v17  ;;  %v2966_v50 = vld [vmem:[%s5727_s0 + $0x18] sm:$0xff]  ;;  %v424_v60 = vld [vmem:[%s5729_s3 + $0x60] sm:$0xff] }
   0x6   :  { %v69_v29 = vunpack.c.l.bf16 %v2903_v18  ;;  %v70_v30 = vunpack.c.h.bf16 %v2903_v18  ;;  %v110_v31 = vadd.f32 %v51_v21, %v42_v19  ;;  %v119_v34 = vadd.f32 %v52_v24, %v43_v20  ;;  %v2981_v55 = vld [vmem:[%s5727_s0 + $0x3c] sm:$0xff]  ;;  %487 = vperm.xlu0 %2728, %v424_v60  }
   0x7   :  { %v84_v23 = vadd.f32 %v83_v12, %v57_v7  ;;  %v75_v28 = vadd.f32 %v74_v16, %v56_v10  ;;  %v40_v36 = vunpack.c.l.bf16 %v2911_v22  ;;  %v5738_v37 = vunpack.c.h.bf16 %v2911_v22  ;;  %v2995_v16 = vld [vmem:[%s5727_s0 + $0x60] sm:$0xff] }
   0x8   :  { %v111_v39 = vadd.f32 %v110_v31, %v60_v25  ;;  %v49_v40 = vunpack.c.l.bf16 %v2921_v27  ;;  %v5737_v41 = vunpack.c.h.bf16 %v2921_v27  ;;  %v120_v43 = vadd.f32 %v119_v34, %v61_v26 }
   0x9   :  { %v85_v33 = vadd.f32 %v84_v23, %v66_v11  ;;  %v76_v38 = vadd.f32 %v75_v28, %v65_v13  ;;  %v5739_v44 = vunpack.c.l.bf16 %v2934_v32  ;;  %v5736_v45 = vunpack.c.h.bf16 %v2934_v32  ;;  %v413_v23 = vld [vmem:[%s5729_s3 + $0x8] sm:$0xff] }
   0xa   :  { %v112_v47 = vadd.f32 %v111_v39, %v69_v29  ;;  %v5734_v48 = vunpack.c.l.bf16 %v2945_v35  ;;  %v5735_v49 = vunpack.c.h.bf16 %v2945_v35  ;;  %v121_v52 = vadd.f32 %v120_v43, %v70_v30  ;;  %432 = vperm.xlu1 %2729, %v413_v23  }
   0xb   :  { %v86_v42 = vrot.slane %v85_v33, 4  ;;  %v77_v46 = vrot.slane %v76_v38, 4  ;;  %v92_v53 = vadd.f32 %v49_v40, %v40_v36  ;;  %v101_v54 = vadd.f32 %v5737_v41, %v5738_v37  ;;  %v414_v37 = vld [vmem:[%s5729_s3 + $0x10] sm:$0xff] }
   0xc   :  { %v113_v57 = vrot.slane %v112_v47, 4  ;;  %v44_v58 = vunpack.c.l.bf16 %v2966_v50  ;;  %v5742_v59 = vunpack.c.h.bf16 %v2966_v50  ;;  %v122_v62 = vrot.slane %v121_v52, 4 }
   0xd   :  { %v87_v51 = vadd.f32 %v86_v42, %v85_v33  ;;  %v78_v56 = vadd.f32 %v77_v46, %v76_v38  ;;  %v93_v63 = vadd.f32 %v92_v53, %v5739_v44  ;;  %v102_v12 = vadd.f32 %v101_v54, %v5736_v45  ;;  %v412_v38 = vld [vmem:[%s5729_s3] sm:$0xff] }
   0xe   :  { %v114_v31 = vadd.f32 %v113_v57, %v112_v47  ;;  %v5746_v33 = vunpack.c.l.bf16 %v2981_v55  ;;  %v5741_v34 = vunpack.c.h.bf16 %v2981_v55  ;;  %v123_v42 = vadd.f32 %v122_v62, %v121_v52  ;;  %v3012_v47 = vld [vmem:[%s5727_s0 + $0x84] sm:$0xff]  ;;  %427 = vperm.xlu0 %2728, %v412_v38  }
   0xf   :  { %v88_v61 = vrot.slane %v87_v51, 2  ;;  %v79_v28 = vrot.slane %v78_v56, 2  ;;  %v94_v43 = vadd.f32 %v93_v63, %v5734_v48  ;;  %v103_v46 = vadd.f32 %v102_v12, %v5735_v49  ;;  %v416_v53 = vld [vmem:[%s5729_s3 + $0x20] sm:$0xff] }
  0x10   :  { %v115_v57 = vrot.slane %v114_v31, 2  ;;  %v5740_v52 = vunpack.c.h.bf16 %v2995_v16  ;;  %v5743_v3 = vunpack.c.l.bf16 %v3012_v47  ;;  %v5744_v48 = vunpack.c.h.bf16 %v3012_v47  ;;  %447 = vperm.xlu1 %2729, %v416_v53  }
  0x11   :  { %v89_v39 = vadd.f32 %v88_v61, %v87_v51  ;;  %v80_v54 = vadd.f32 %v79_v28, %v78_v56  ;;  %v5745_v51 = vunpack.c.l.bf16 %v2995_v16  ;;  %v124_v61 = vrot.slane %v123_v42, 2  ;;  %v417_v56 = vld [vmem:[%s5729_s3 + $0x28] sm:$0xff] }
  0x12   :  { %v95_v62 = vrot.slane %v94_v43, 4  ;;  %v104_v63 = vrot.slane %v103_v46, 4  ;;  %v116_v23 = vadd.f32 %v115_v57, %v114_v31  ;;  %v128_v31 = vadd.f32 %v5746_v33, %v44_v58  ;;  %452 = vperm.xlu0 %2728, %v417_v56  }
  0x13   :  { %v90_v60 = vrot.slane %v89_v39, 1  ;;  %v81_v12 = vrot.slane %v80_v54, 1  ;;  %v125_v49 = vadd.f32 %v124_v61, %v123_v42  ;;  %v137_v53 = vadd.f32 %v5741_v34, %v5742_v59 }
  0x14   :  { %v96_v45 = vadd.f32 %v95_v62, %v94_v43  ;;  %v105_v41 = vadd.f32 %v104_v63, %v103_v46  ;;  %v117_v44 = vrot.slane %v116_v23, 1  ;;  %437 = vperm.xlu1 %2729, %v414_v37   ;;  %v418_v62 = vld [vmem:[%s5729_s3 + $0x30] sm:$0xff]  ;;  %v415_v37 = vld [vmem:[%s5729_s3 + $0x18] sm:$0xff]  ;;  %vm1066_vm6 = vcmask 1044480  }
  0x15   :  { %v91_v28 = vadd.f32 %v90_v60, %v89_v39  ;;  %v82_v38 = vadd.f32 %v81_v12, %v80_v54  ;;  %v126_v42 = vrot.slane %v125_v49, 1  ;;  %v129_v54 = vadd.f32 %v128_v31, %v5745_v51 }
  0x16   :  { %v97_v43 = vrot.slane %v96_v45, 2  ;;  %v106_v46 = vrot.slane %v105_v41, 2  ;;  %v118_v60 = vadd.f32 %v117_v44, %v116_v23  ;;  %v138_v61 = vadd.f32 %v137_v53, %v5740_v52  ;;  %457 = vperm.xlu0 %2728, %v418_v62  }
  0x17   :  { %v157_v39 = vmul.f32 0.03125, %v91_v28  ;;  %v156_v57 = vmul.f32 0.03125, %v82_v38  ;;  %v127_v38 = vadd.f32 %v126_v42, %v125_v49  ;;  %v130_v52 = vadd.f32 %v129_v54, %v5743_v3 }
  0x18   :  { %442 = vperm.xlu1 %2729, %v415_v37   ;;  %v160_v31 = vmul.f32 0.03125, %v118_v60  ;;  %v98_v53 = vadd.f32 %v97_v43, %v96_v45  ;;  %v107_v62 = vadd.f32 %v106_v46, %v105_v41  ;;  %v139_v37 = vadd.f32 %v138_v61, %v5744_v48 }
  0x19   :  { %v3044_v63 = vsub.f32 %v39_v5, %v157_v39  ;;  %v3048_v12 = vsub.f32 %v48_v6, %v157_v39  ;;  %v3052_v44 = vsub.f32 %v57_v7, %v157_v39  ;;  %v3056_v23 = vsub.f32 %v66_v11, %v157_v39  ;;  %v420_v39 = vld [vmem:[%s5729_s3 + $0x40] sm:$0xff] }
  0x1a   :  { %v3063_v5 = vsub.f32 %v38_v8, %v156_v57  ;;  %v3067_v6 = vsub.f32 %v47_v9, %v156_v57  ;;  %v3071_v7 = vsub.f32 %v56_v10, %v156_v57  ;;  %v3075_v11 = vsub.f32 %v65_v13, %v156_v57  ;;  %v419_v13 = vld [vmem:[%s5729_s3 + $0x38] sm:$0xff] }
  0x1b   :  { %v202_v56 = vmul.f32 %v3044_v63, %v3044_v63  ;;  %v211_v0 = vmul.f32 %v3048_v12, %v3048_v12  ;;  %v220_v8 = vmul.f32 %v3052_v44, %v3052_v44  ;;  %v229_v1 = vmul.f32 %v3056_v23, %v3056_v23  ;;  %462 = vperm.xlu0 %2728, %v419_v13  }
  0x1c   :  { %v201_v2 = vmul.f32 %v3063_v5, %v3063_v5  ;;  %v210_v4 = vmul.f32 %v3067_v6, %v3067_v6  ;;  %v219_v9 = vmul.f32 %v3071_v7, %v3071_v7  ;;  %v228_v10 = vmul.f32 %v3075_v11, %v3075_v11  ;;  %467 = vperm.xlu1 %2729, %v420_v39  }
  0x1d   :  { %v246_v28 = vadd.f32 %v211_v0, %v202_v56  ;;  %v161_v59 = vmul.f32 0.03125, %v127_v38  ;;  %v3105_v56 = vsub.f32 %v42_v19, %v160_v31  ;;  %v3109_v45 = vsub.f32 %v51_v21, %v160_v31  ;;  %v421_v19 = vld [vmem:[%s5729_s3 + $0x48] sm:$0xff]  ;;  %v423_v0 = vld [vmem:[%s5729_s3 + $0x58] sm:$0xff] }
  0x1e   :  { %v237_v57 = vadd.f32 %v210_v4, %v201_v2  ;;  %v3113_v41 = vsub.f32 %v60_v25, %v160_v31  ;;  %v3117_v42 = vsub.f32 %v69_v29, %v160_v31  ;;  %v99_v43 = vrot.slane %v98_v53, 1  ;;  %v422_v29 = vld [vmem:[%s5729_s3 + $0x50] sm:$0xff] }
  0x1f   :  { %v247_v34 = vadd.f32 %v246_v28, %v220_v8  ;;  %v3124_v21 = vsub.f32 %v43_v20, %v161_v59  ;;  %v3128_v60 = vsub.f32 %v52_v24, %v161_v59  ;;  %v3132_v25 = vsub.f32 %v61_v26, %v161_v59  ;;  %472 = vperm.xlu0 %2728, %v421_v19  }
  0x20   :  { %v238_v49 = vadd.f32 %v237_v57, %v219_v9  ;;  %v205_v14 = vmul.f32 %v3105_v56, %v3105_v56  ;;  %v214_v15 = vmul.f32 %v3109_v45, %v3109_v45  ;;  %v232_v61 = vmul.f32 %v3117_v42, %v3117_v42  ;;  %477 = vperm.xlu1 %2729, %v422_v29  }
  0x21   :  { %v248_v46 = vadd.f32 %v247_v34, %v229_v1  ;;  %v3139_v34 = vsub.f32 %v70_v30, %v161_v59  ;;  %v206_v17 = vmul.f32 %v3124_v21, %v3124_v21  ;;  %v215_v24 = vmul.f32 %v3128_v60, %v3128_v60 }
  0x22   :  { %v239_v54 = vadd.f32 %v238_v49, %v228_v10  ;;  %v224_v26 = vmul.f32 %v3132_v25, %v3132_v25  ;;  %v223_v59 = vmul.f32 %v3113_v41, %v3113_v41  ;;  %v273_v2 = vadd.f32 %v214_v15, %v205_v14 }
  0x23   :  { %v249_v20 = vrot.slane %v248_v46, 4  ;;  %v233_v30 = vmul.f32 %v3139_v34, %v3139_v34  ;;  %v282_v1 = vadd.f32 %v215_v24, %v206_v17  ;;  %v108_v4 = vrot.slane %v107_v62, 1  ;;  %482 = vperm.xlu0 %2728, %v423_v0  }
  0x24   :  { %v240_v18 = vrot.slane %v239_v54, 4  ;;  %v100_v10 = vadd.f32 %v99_v43, %v98_v53  ;;  %v131_v13 = vrot.slane %v130_v52, 4  ;;  %v140_v28 = vrot.slane %v139_v37, 4 }
  0x25   :  { %v250_v8 = vadd.f32 %v249_v20, %v248_v46  ;;  %v283_v31 = vadd.f32 %v282_v1, %v224_v26  ;;  %v274_v39 = vadd.f32 %v273_v2, %v223_v59  ;;  %v109_v57 = vadd.f32 %v108_v4, %v107_v62 }
  0x26   :  { %v241_v9 = vadd.f32 %v240_v18, %v239_v54  ;;  %v158_v19 = vmul.f32 0.03125, %v100_v10  ;;  %v132_v29 = vadd.f32 %v131_v13, %v130_v52  ;;  %v141_v3 = vadd.f32 %v140_v28, %v139_v37 }
  0x27   :  { %v251_v38 = vrot.slane %v250_v8, 2  ;;  %v284_v51 = vadd.f32 %v283_v31, %v233_v30  ;;  %v275_v33 = vadd.f32 %v274_v39, %v232_v61  ;;  %v159_v46 = vmul.f32 0.03125, %v109_v57 }
  0x28   :  { %v242_v49 = vrot.slane %v241_v9, 2  ;;  %v3162_v54 = vsub.f32 %v40_v36, %v158_v19  ;;  %v3166_v53 = vsub.f32 %v49_v40, %v158_v19  ;;  %v5946_v62 = vunpack.c.l.bf16 %v2934_v32 }
  0x29   :  { %v252_v48 = vadd.f32 %v251_v38, %v250_v8  ;;  %v285_v52 = vrot.slane %v284_v51, 4  ;;  %v276_v37 = vrot.slane %v275_v33, 4  ;;  %v5947_v15 = vunpack.c.h.bf16 %v2911_v22 }
  0x2a   :  { %v243_v20 = vadd.f32 %v242_v49, %v241_v9  ;;  %v3170_v43 = vsub.f32 %v5946_v62, %v158_v19  ;;  %v5948_v26 = vunpack.c.h.bf16 %v2921_v27  ;;  %v5949_v18 = vunpack.c.h.bf16 %v2934_v32  ;;  %v3211_v62 = vld [vmem:[%s5727_s0 + $0x20] ss:$36 sps:$4 sm:$0xff]  }
  0x2b   :  { %v253_v14 = vrot.slane %v252_v48, 1  ;;  %v3174_v17 = vsub.f32 %v5947_v15, %v159_v46  ;;  %v5950_v30 = vunpack.c.h.bf16 %v2945_v35  ;;  %v286_v0 = vadd.f32 %v285_v52, %v284_v51 }
  0x2c   :  { %v244_v24 = vrot.slane %v243_v20, 1  ;;  %v3178_v36 = vsub.f32 %v5948_v26, %v159_v46  ;;  %v3182_v40 = vsub.f32 %v5949_v18, %v159_v46  ;;  %v277_v8 = vadd.f32 %v276_v37, %v275_v33 }
  0x2d   :  { %v3186_v59 = vsub.f32 %v5950_v30, %v159_v46  ;;  %v254_v61 = vadd.f32 %v253_v14, %v252_v48  ;;  %v204_v22 = vmul.f32 %v3174_v17, %v3174_v17  ;;  %v287_v9 = vrot.slane %v286_v0, 2 }
  0x2e   :  { %v245_v1 = vadd.f32 %v244_v24, %v243_v20  ;;  %v213_v27 = vmul.f32 %v3178_v36, %v3178_v36  ;;  %v222_v2 = vmul.f32 %v3182_v40, %v3182_v40  ;;  %v278_v10 = vrot.slane %v277_v8, 2 }
  0x2f   :  { %v231_v32 = vmul.f32 %v3186_v59, %v3186_v59  ;;  %v319_v4 = vmul.f32 0.03125, %v254_v61  ;;  %v5951_v48 = vunpack.c.l.bf16 %v2945_v35  ;;  %v203_v28 = vmul.f32 %v3162_v54, %v3162_v54 }
  0x30   :  { %v318_v33 = vmul.f32 0.03125, %v245_v1  ;;  %v264_v13 = vadd.f32 %v213_v27, %v204_v22  ;;  %v212_v38 = vmul.f32 %v3166_v53, %v3166_v53  ;;  %v288_v39 = vadd.f32 %v287_v9, %v286_v0  ;;  %v3216_v0 = vld [vmem:[%s5727_s0 + $0x68] ss:$36 sps:$4 sm:$0xff]  }
  0x31   :  { %v3198_v51 = vsub.f32 %v5951_v48, %v158_v19  ;;  %v328_v31 = vadd.f32 1e-05, %v319_v4  ;;  %v279_v57 = vadd.f32 %v278_v10, %v277_v8  ;;  %v221_v49 = vmul.f32 %v3170_v43, %v3170_v43 }
  0x32   :  { %v327_v46 = vadd.f32 1e-05, %v318_v33  ;;  %v265_v20 = vadd.f32 %v264_v13, %v222_v2  ;;  %v255_v19 = vadd.f32 %v212_v38, %v203_v28  ;;  %v289_v14 = vrot.slane %v288_v39, 1 }
  0x33   :  { %v230_v35 = vmul.f32 %v3198_v51, %v3198_v51  ;;  %2737 = vrsqrt.f32 %v328_v31  ;;  %v280_v52 = vrot.slane %v279_v57, 1  ;;  %v133_v37 = vrot.slane %v132_v29, 2 }
  0x34   :  { %2739 = vrsqrt.f32 %v327_v46  ;;  %v266_v15 = vadd.f32 %v265_v20, %v231_v32  ;;  %v256_v24 = vadd.f32 %v255_v19, %v221_v49  ;;  %v142_v26 = vrot.slane %v141_v3, 2 }
  0x35   :  { %v290_v18 = vadd.f32 %v289_v14, %v288_v39  ;;  %v281_v30 = vadd.f32 %v280_v52, %v279_v57  ;;  %v134_v61 = vadd.f32 %v133_v37, %v132_v29  ;;  %v46_v8 = vunpack.c.l.bf16 %v3211_v62 }
  0x36   :  { %v267_v22 = vrot.slane %v266_v15, 4  ;;  %v257_v1 = vadd.f32 %v256_v24, %v230_v35  ;;  %v143_v27 = vadd.f32 %v142_v26, %v141_v3  ;;  %v55_v2 = vunpack.c.h.bf16 %v3211_v62 }
  0x37   :  { %v323_v4 = vmul.f32 0.03125, %v290_v18  ;;  %v322_v9 = vmul.f32 0.03125, %v281_v30  ;;  %v135_v32 = vrot.slane %v134_v61, 1  ;;  %v64_v29 = vunpack.c.l.bf16 %v3216_v0 }
  0x38   :  { %v268_v10 = vadd.f32 %v267_v22, %v266_v15  ;;  %v258_v48 = vrot.slane %v257_v1, 4  ;;  %v144_v33 = vrot.slane %v143_v27, 1  ;;  %v146_v31 = vadd.f32 %v55_v2, %v46_v8 }
  0x39   :  { %v332_v13 = vadd.f32 1e-05, %v323_v4  ;;  %v331_v28 = vadd.f32 1e-05, %v322_v9  ;;  %v136_v38 = vadd.f32 %v135_v32, %v134_v61  ;;  %v73_v46 = vunpack.c.h.bf16 %v3216_v0 }
  0x3a   :  { %v269_v39 = vrot.slane %v268_v10, 2  ;;  %v259_v3 = vadd.f32 %v258_v48, %v257_v1  ;;  %v145_v57 = vadd.f32 %v144_v33, %v143_v27  ;;  %v5952_v52 = vunpack.c.l.bf16 %v2981_v55 }
  0x3b   :  { %2741 = vrsqrt.f32 %v332_v13  ;;  %v162_v49 = vmul.f32 0.03125, %v136_v38  ;;  %v5953_v15 = vunpack.c.l.bf16 %v2995_v16  ;;  %v147_v26 = vadd.f32 %v146_v31, %v64_v29 }
  0x3c   :  { %2743 = vrsqrt.f32 %v331_v28  ;;  %v270_v20 = vadd.f32 %v269_v39, %v268_v10  ;;  %v260_v35 = vrot.slane %v259_v3, 2  ;;  %v163_v19 = vmul.f32 0.03125, %v145_v57 }
  0x3d   :  { %v3228_v14 = vsub.f32 %v44_v58, %v162_v49  ;;  %v3232_v37 = vsub.f32 %v5952_v52, %v162_v49  ;;  %v3236_v24 = vsub.f32 %v5953_v15, %v162_v49  ;;  %v5954_v61 = vunpack.c.h.bf16 %v2966_v50 }
  0x3e   :  { %v271_v18 = vrot.slane %v270_v20, 1  ;;  %v261_v30 = vadd.f32 %v260_v35, %v259_v3  ;;  %v5955_v58 = vunpack.c.h.bf16 %v2981_v55  ;;  %v5956_v27 = vunpack.c.h.bf16 %v2995_v16 }
  0x3f   :  { %v3242_v22 = vsub.f32 %v5954_v61, %v163_v19  ;;  %v5957_v9 = vunpack.c.h.bf16 %v3012_v47  ;;  %v207_v10 = vmul.f32 %v3228_v14, %v3228_v14  ;;  %v216_v50 = vmul.f32 %v3232_v37, %v3232_v37 }
  0x40   :  { %v3246_v1 = vsub.f32 %v5955_v58, %v163_v19  ;;  %v3250_v4 = vsub.f32 %v5956_v27, %v163_v19  ;;  %v2738_v48 = vpop.eup %2737  ;;  %v272_v33 = vadd.f32 %v271_v18, %v270_v20  ;;  %v262_v13 = vrot.slane %v261_v30, 1 }
  0x41   :  { %v3254_v32 = vsub.f32 %v5957_v9, %v163_v19  ;;  %v208_v55 = vmul.f32 %v3242_v22, %v3242_v22  ;;  %v2740_v28 = vpop.eup %2739  ;;  %v364_v38 = vmul.f32 %v2738_v48, %v3052_v44  ;;  %v373_v31 = vmul.f32 %v2738_v48, %v3056_v23 }
  0x42   :  { %v217_v16 = vmul.f32 %v3246_v1, %v3246_v1  ;;  %v346_v39 = vmul.f32 %v2738_v48, %v3044_v63  ;;  %v355_v3 = vmul.f32 %v2738_v48, %v3048_v12  ;;  %v363_v57 = vmul.f32 %v2740_v28, %v3071_v7 }
  0x43   :  { %v372_v20 = vmul.f32 %v2740_v28, %v3075_v11  ;;  %v345_v35 = vmul.f32 %v2740_v28, %v3063_v5  ;;  %v354_v19 = vmul.f32 %v2740_v28, %v3067_v6  ;;  %v404_v52 = vpack.c.bf16 %v373_v31, %v364_v38 }
  0x44   :  { %v395_v15 = vpack.c.bf16 %v355_v3, %v346_v39  ;;  %v321_v18 = vmul.f32 0.03125, %v272_v33  ;;  %v263_v61 = vadd.f32 %v262_v13, %v261_v30  ;;  %v226_v44 = vmul.f32 %v3250_v4, %v3250_v4 }
  0x45   :  { %v403_v58 = vpack.c.bf16 %v372_v20, %v363_v57  ;;  %v5958_v63 = vunpack.c.l.bf16 %v3012_v47  ;;  %557 = vmatprep.subr.bf16.mxu0 %v404_v52  ;;  %2721 = vmatprep.subr.bf16.mxu1 %v404_v52  ;;  %v300_v11 = vadd.f32 %v217_v16, %v208_v55  ;;  %v225_v5 = vmul.f32 %v3236_v24, %v3236_v24 }
  0x46   :  { %v330_v12 = vadd.f32 1e-05, %v321_v18  ;;  %v320_v7 = vmul.f32 0.03125, %v263_v61  ;;  %v394_v6 = vpack.c.bf16 %v354_v19, %v345_v35  ;;  %v291_v30 = vadd.f32 %v216_v50, %v207_v10  ;;  %v3289_v10 = vld [vmem:[%s5728_s2] sm:$0xff]  }
  0x47   :  { %v3276_v23 = vsub.f32 %v5958_v63, %v162_v49  ;;  %558 = vmatpush1.bf16.msra.mxu0 %v403_v58  ;;  %2723 = vmatpush1.bf16.msra.mxu1 %v403_v58  ;;  %v148_v27 = vadd.f32 %v147_v26, %v73_v46  ;;  %v235_v49 = vmul.f32 %v3254_v32, %v3254_v32  ;;  %v3294_v26 = vld [vmem:[%s5728_s2 + $0x20] sm:$0xff]   ;;  %v3313_v58 = vld [vmem:[%s5728_s2 + $0x8] sm:$0xff]   ;;  %vm1068_vm7 = vcmask 1045504  }
  0x48   :  { %559 = vmatprep.subr.bf16.mxu0 %v395_v15  ;;  %2722 = vmatprep.subr.bf16.mxu1 %v395_v15  ;;  %2745 = vrsqrt.f32 %v330_v12  ;;  %v329_v47 = vadd.f32 1e-05, %v320_v7  ;;  %v301_v9 = vadd.f32 %v300_v11, %v226_v44  ;;  %v2742_v48 = vpop.eup %2741  ;;  %v292_v13 = vadd.f32 %v291_v30, %v225_v5  ;;  %v3318_v44 = vld [vmem:[%s5728_s2 + $0x28] sm:$0xff]  }
  0x49   :  { %v234_v33 = vmul.f32 %v3276_v23, %v3276_v23  ;;  %v149_v55 = vrot.slane %v148_v27, 4  ;;  %v2744_v16 = vpop.eup %2743  ;;  %v368_v50 = vmul.f32 %v2742_v48, %v3132_v25  ;;  %v377_v28 = vmul.f32 %v2742_v48, %v3139_v34 }
  0x4a   :  { %2747 = vrsqrt.f32 %v329_v47  ;;  %v350_v38 = vmul.f32 %v2742_v48, %v3124_v21  ;;  %v367_v31 = vmul.f32 %v2744_v16, %v3113_v41  ;;  %v376_v39 = vmul.f32 %v2744_v16, %v3117_v42 }
  0x4b   :  { %560 = vmatpush1.bf16.msra.mxu0 %v394_v6  ;;  %2724 = vmatpush1.bf16.msra.mxu1 %v394_v6  ;;  %v359_v3 = vmul.f32 %v2742_v48, %v3128_v60  ;;  %v408_v57 = vpack.c.bf16 %v377_v28, %v368_v50  ;;  %v349_v20 = vmul.f32 %v2744_v16, %v3105_v56  ;;  %v5959_v42 = vmov 0  }
  0x4c   :  { %v358_v35 = vmul.f32 %v2744_v16, %v3109_v45  ;;  %v302_v25 = vadd.f32 %v301_v9, %v235_v49  ;;  %v407_v19 = vpack.c.bf16 %v376_v39, %v367_v31  ;;  %v293_v52 = vadd.f32 %v292_v13, %v234_v33 }
  0x4d   :  { %v399_v34 = vpack.c.bf16 %v359_v3, %v350_v38  ;;  %v150_v15 = vadd.f32 %v149_v55, %v148_v27  ;;  %759 = vmatprep.subr.bf16.mxu0 %v408_v57  ;;  %v2818_v30 = vmov 0.0   ;;  %vm1070_vm8 = vcmask 1046528  }
  0x4e   :  { %2645 = vmatmul.mubr.msk.bf16.vlgmr.msra.gmra.mxu0 %vm523_vm0, %v3289_v10  ;;  %2649 = vmatmul.mubr.msk.bf16.vlgmr.msra.gmra.mxu1 %vm523_vm0, %v3294_v26  ;;  %v303_v41 = vrot.slane %v302_v25, 4  ;;  %v294_v21 = vrot.slane %v293_v52, 4  ;;  %v398_v56 = vpack.c.bf16 %v358_v35, %v349_v20 }
  0x4f   :  { %587 = vmatprep.mubr.bf16.mxu0 %v5959_v42  ;;  %v151_v60 = vrot.slane %v150_v15, 2  ;;  %760 = vmatpush1.bf16.msra.mxu0 %v407_v19 }
  0x50   :  { %627 = vmatprep.mubr.bf16.mxu1 %v5959_v42  ;;  %v304_v45 = vadd.f32 %v303_v41, %v302_v25  ;;  %761 = vmatprep.subr.bf16.mxu0 %v399_v34  ;;  %v295_v18 = vadd.f32 %v294_v21, %v293_v52  ;;  %v3378_v52 = vld [vmem:[%s5728_s2 + $0x18] sm:$0xff]  }
  0x51   :  { %v152_v61 = vadd.f32 %v151_v60, %v150_v15 }
  0x52   :  { %v305_v63 = vrot.slane %v304_v45, 2  ;;  %v296_v12 = vrot.slane %v295_v18, 2 }
  0x53   :  { %v153_v7 = vrot.slane %v152_v61, 1  ;;  %762 = vmatpush1.bf16.msra.mxu0 %v398_v56 }
  0x54   :  { %v306_v11 = vadd.f32 %v305_v63, %v304_v45  ;;  %v297_v6 = vadd.f32 %v296_v12, %v295_v18  ;;  %2689 = vmatprep.subr.bf16.mxu0 %v2818_v30 }
  0x55   :  { %v2746_v5 = vpop.eup %2745  ;;  %v154_v27 = vadd.f32 %v153_v7, %v152_v61 }
  0x56   :  { %v366_v47 = vmul.f32 %v2746_v5, %v3182_v40  ;;  %v375_v49 = vmul.f32 %v2746_v5, %v3186_v59  ;;  %2646 = vmatmul.mubr.msk.bf16.gmra.mxu0 %vm523_vm0, %v3313_v58  ;;  %2650 = vmatmul.mubr.msk.bf16.gmra.mxu1 %vm523_vm0, %v3318_v44  ;;  %v348_v9 = vmul.f32 %v2746_v5, %v3174_v17  ;;  %v307_v48 = vrot.slane %v306_v11, 1 }
  0x57   :  { %v2748_v33 = vpop.eup %2747  ;;  %597 = vmatprep.mubr.bf16.mxu0 %v5959_v42  ;;  %637 = vmatprep.mubr.bf16.mxu1 %v5959_v42  ;;  %v357_v13 = vmul.f32 %v2746_v5, %v3178_v36  ;;  %v298_v55 = vrot.slane %v297_v6, 1  ;;  %v164_v40 = vmul.f32 0.03125, %v154_v27  ;;  %v3338_v36 = vld [vmem:[%s5728_s2 + $0x10] sm:$0xff]  }
  0x58   :  { %v406_v16 = vpack.c.bf16 %v375_v49, %v366_v47  ;;  %v365_v59 = vmul.f32 %v2748_v33, %v3170_v43  ;;  %v374_v50 = vmul.f32 %v2748_v33, %v3198_v51  ;;  %v347_v28 = vmul.f32 %v2748_v33, %v3162_v54  ;;  %v3343_v43 = vld [vmem:[%s5728_s2 + $0x30] ss:$0 sps:$4 sm:$0xff]  }
  0x59   :  { %v397_v38 = vpack.c.bf16 %v357_v13, %v348_v9  ;;  %v356_v17 = vmul.f32 %v2748_v33, %v3166_v53  ;;  %v308_v31 = vadd.f32 %v307_v48, %v306_v11  ;;  %v299_v39 = vadd.f32 %v298_v55, %v297_v6 }
  0x5a   :  { %658 = vmatprep.subr.bf16.mxu1 %v406_v16  ;;  %v405_v3 = vpack.c.bf16 %v374_v50, %v365_v59  ;;  %v3347_v54 = vsub.f32 %v46_v8, %v164_v40  ;;  %v3351_v53 = vsub.f32 %v55_v2, %v164_v40  ;;  %v3355_v51 = vsub.f32 %v64_v29, %v164_v40 }
  0x5b   :  { %v325_v57 = vmul.f32 0.03125, %v308_v31  ;;  %v324_v20 = vmul.f32 0.03125, %v299_v39  ;;  %v3359_v35 = vsub.f32 %v73_v46, %v164_v40  ;;  %v396_v25 = vpack.c.bf16 %v356_v17, %v347_v28 }
  0x5c   :  { %659 = vmatpush1.bf16.msra.mxu1 %v405_v3  ;;  %v209_v8 = vmul.f32 %v3347_v54, %v3347_v54  ;;  %v218_v62 = vmul.f32 %v3351_v53, %v3351_v53  ;;  %v227_v2 = vmul.f32 %v3355_v51, %v3355_v51 }
  0x5d   :  { %660 = vmatprep.subr.bf16.mxu1 %v397_v38  ;;  %v334_v29 = vadd.f32 1e-05, %v325_v57  ;;  %v333_v19 = vadd.f32 1e-05, %v324_v20  ;;  %v236_v0 = vmul.f32 %v3359_v35, %v3359_v35 }
  0x5e   :  { %2647 = vmatmul.mubr.msk.bf16.gmra.mxu0 %vm523_vm0, %v3338_v36  ;;  %2651 = vmatmul.mubr.msk.bf16.gmra.mxu1 %vm523_vm0, %v3343_v43  ;;  %v309_v46 = vadd.f32 %v218_v62, %v209_v8 }
  0x5f   :  { %607 = vmatprep.mubr.bf16.mxu0 %v5959_v42  ;;  %678 = vmatprep.mubr.bf16.mxu1 %v5959_v42  ;;  %2749 = vrsqrt.f32 %v334_v29 }
  0x60   :  { %661 = vmatpush1.bf16.msra.mxu1 %v396_v25  ;;  %2751 = vrsqrt.f32 %v333_v19  ;;  %v310_v34 = vadd.f32 %v309_v46, %v227_v2 }
  0x62   :  { %v311_v15 = vadd.f32 %v310_v34, %v236_v0 }
  0x64   :  { %v312_v41 = vrot.slane %v311_v15, 4 }
  0x66   :  { %2648 = vmatmul.mubr.msk.bf16.gmra.mxu0 %vm523_vm0, %v3378_v52  ;;  %2652 = vmatmul.mubr.msk.bf16.vlgmr.msra.gmra.mxu1 %vm523_vm0, %v3289_v10  ;;  %v313_v21 = vadd.f32 %v312_v41, %v311_v15 }
  0x67   :  { %688 = vmatprep.mubr.bf16.mxu1 %v5959_v42  ;;  %779 = vmatprep.mubr.bf16.mxu0 %v5959_v42 }
  0x68   :  { %v314_v60 = vrot.slane %v313_v21, 2 }
  0x6a   :  { %v315_v56 = vadd.f32 %v314_v60, %v313_v21 }
  0x6c   :  { %v2750_v45 = vpop.eup %2749  ;;  %v316_v18 = vrot.slane %v315_v56, 1 }
  0x6d   :  { %v2752_v61 = vpop.eup %2751  ;;  %v370_v63 = vmul.f32 %v2750_v45, %v3250_v4  ;;  %v379_v12 = vmul.f32 %v2750_v45, %v3254_v32  ;;  %v352_v7 = vmul.f32 %v2750_v45, %v3242_v22  ;;  %v361_v11 = vmul.f32 %v2750_v45, %v3246_v1 }
  0x6e   :  { %v369_v5 = vmul.f32 %v2752_v61, %v3236_v24  ;;  %v378_v6 = vmul.f32 %v2752_v61, %v3276_v23  ;;  %2653 = vmatmul.mubr.msk.bf16.gmra.mxu1 %vm523_vm0, %v3313_v58  ;;  %2659 = vmatmul.mubr.msk.bf16.vlgmr.msra.gmra.mxu0 %vm523_vm0, %v3289_v10  ;;  %v317_v27 = vadd.f32 %v316_v18, %v315_v56 }
  0x6f   :  { %v410_v47 = vpack.c.bf16 %v379_v12, %v370_v63  ;;  %698 = vmatprep.mubr.bf16.mxu1 %v5959_v42  ;;  %789 = vmatprep.mubr.bf16.mxu0 %v5959_v42  ;;  %v401_v4 = vpack.c.bf16 %v361_v11, %v352_v7  ;;  %v351_v1 = vmul.f32 %v2752_v61, %v3228_v14 }
  0x70   :  { %v409_v22 = vpack.c.bf16 %v378_v6, %v369_v5  ;;  %v326_v32 = vmul.f32 0.03125, %v317_v27  ;;  %v360_v24 = vmul.f32 %v2752_v61, %v3232_v37 }
  0x71   :  { %860 = vmatprep.subr.bf16.mxu1 %v410_v47 }
  0x72   :  { %861 = vmatpush1.bf16.msra.mxu1 %v409_v22  ;;  %v335_v23 = vadd.f32 1e-05, %v326_v32  ;;  %v400_v49 = vpack.c.bf16 %v360_v24, %v351_v1 }
  0x73   :  { %862 = vmatprep.subr.bf16.mxu1 %v401_v4 }
  0x74   :  { %2753 = vrsqrt.f32 %v335_v23 }
  0x76   :  { %2654 = vmatmul.mubr.msk.bf16.gmra.mxu1 %vm523_vm0, %v3338_v36  ;;  %2660 = vmatmul.mubr.msk.bf16.gmra.mxu0 %vm523_vm0, %v3313_v58 }
  0x77   :  { %708 = vmatprep.mubr.bf16.mxu1 %v5959_v42  ;;  %799 = vmatprep.mubr.bf16.mxu0 %v5959_v42 }
  0x78   :  { %863 = vmatpush1.bf16.msra.mxu1 %v400_v49 }
  0x7e   :  { %2655 = vmatmul.mubr.msk.bf16.gmra.mxu1 %vm523_vm0, %v3378_v52  ;;  %2661 = vmatmul.mubr.msk.bf16.gmra.mxu0 %vm523_vm0, %v3338_v36 }
  0x7f   :  { %718 = vmatprep.mubr.bf16.mxu1 %v5959_v42  ;;  %809 = vmatprep.mubr.bf16.mxu0 %v5959_v42 }
  0x81   :  { %v2754_v14 = vpop.eup %2753  ;;  %v3491_v59 = vpop.permute.xlu0 %487 }
  0x82   :  { %v371_v37 = vmul.f32 %v2754_v14, %v3355_v51  ;;  %v380_v9 = vmul.f32 %v2754_v14, %v3359_v35  ;;  %v353_v48 = vmul.f32 %v2754_v14, %v3347_v54  ;;  %v362_v33 = vmul.f32 %v2754_v14, %v3351_v53  ;;  %5963 = vst [vmem:[#allocation5_spill] sm:$0xff] %v3491_v59 }
  0x84   :  { %v411_v13 = vpack.c.bf16 %v380_v9, %v371_v37  ;;  %v402_v55 = vpack.c.bf16 %v362_v33, %v353_v48 }
  0x86   :  { %2690 = vmatpush3.bf16.msra.mxu0 %v411_v13  ;;  %2656 = vmatmul.mubr.msk.bf16.gmra.mxu1 %vm523_vm0, %v3294_v26 }
  0x87   :  { %2662 = vmatmul.mubr.msk.bf16.gmra.mxu0 %vm523_vm0, %v3378_v52  ;;  %2691 = vmatprep.subr.bf16.mxu0 %v2818_v30 }
  0x88   :  { %728 = vmatprep.mubr.bf16.mxu1 %v5959_v42  ;;  %819 = vmatprep.mubr.bf16.mxu0 %v5959_v42 }
  0x89   :  { %v3501_v39 = vpop.permute.xlu0 %427 }
  0x8a   :  { %2692 = vmatpush3.bf16.msra.mxu0 %v402_v55  ;;  %5968 = vst [vmem:[#allocation10_spill] sm:$0xff] %v3501_v39 }
  0x8d   :  { %v3509_v20 = vpop.permute.xlu0 %452 }
  0x8e   :  { %2657 = vmatmul.mubr.msk.bf16.gmra.mxu1 %vm523_vm0, %v3318_v44  ;;  %5972 = vst [vmem:[#allocation14_spill] sm:$0xff] %v3509_v20 }
  0x8f   :  { %2663 = vmatmul.mubr.msk.bf16.gmra.mxu0 %vm523_vm0, %v3294_v26  ;;  %738 = vmatprep.mubr.bf16.mxu1 %v5959_v42 }
  0x90   :  { %829 = vmatprep.mubr.bf16.mxu0 %v5959_v42 }
  0x91   :  { %v3544_v7 = vpop.permute.xlu0 %457 }
  0x92   :  { %5981 = vst [vmem:[#allocation23_spill] sm:$0xff] %v3544_v7 }
  0x96   :  { %2658 = vmatmul.mubr.msk.bf16.gmra.mxu1 %vm523_vm0, %v3343_v43 }
  0x97   :  { %2664 = vmatmul.mubr.msk.bf16.gmra.mxu0 %vm523_vm0, %v3318_v44  ;;  %880 = vmatprep.mubr.bf16.mxu1 %v5959_v42 }
  0x98   :  { %839 = vmatprep.mubr.bf16.mxu0 %v5959_v42 }
  0x9e   :  { %2666 = vmatmul.mubr.msk.bf16.vlgmr.msra.gmra.mxu1 %vm523_vm0, %v3289_v10 }
  0x9f   :  { %2665 = vmatmul.mubr.msk.bf16.gmra.mxu0 %vm523_vm0, %v3343_v43  ;;  %890 = vmatprep.mubr.bf16.mxu1 %v5959_v42 }
  0xa0   :  { %2693 = vmatprep.mubr.msk.bf16.mxu0 %vm2819_vm1, %v2818_v30 }
  0xa6   :  { %2667 = vmatmul.mubr.msk.bf16.gmra.mxu1 %vm523_vm0, %v3313_v58 }
  0xa7   :  { %2694 = vmatmul.mubr.msk.bf16.vlgmr.msra.gmra.mxu0 %vm523_vm0, %v3289_v10  ;;  %900 = vmatprep.mubr.bf16.mxu1 %v5959_v42 }
  0xa8   :  { %2697 = vmatprep.mubr.msk.bf16.mxu0 %vm2819_vm1, %v2818_v30 }
  0xae   :  { %2668 = vmatmul.mubr.msk.bf16.gmra.mxu1 %vm523_vm0, %v3338_v36 }
  0xaf   :  { %2698 = vmatmul.mubr.msk.bf16.gmra.mxu0 %vm523_vm0, %v3313_v58  ;;  %910 = vmatprep.mubr.bf16.mxu1 %v5959_v42 }
  0xb0   :  { %2701 = vmatprep.mubr.msk.bf16.mxu0 %vm2819_vm1, %v2818_v30 }
  0xb6   :  { %2669 = vmatmul.mubr.msk.bf16.gmra.mxu1 %vm523_vm0, %v3378_v52 }
  0xb7   :  { %2702 = vmatmul.mubr.msk.bf16.gmra.mxu0 %vm523_vm0, %v3338_v36  ;;  %920 = vmatprep.mubr.bf16.mxu1 %v5959_v42 }
  0xb8   :  { %2705 = vmatprep.mubr.msk.bf16.mxu0 %vm2819_vm1, %v2818_v30 }
  0xbe   :  { %2670 = vmatmul.mubr.msk.bf16.gmra.mxu1 %vm523_vm0, %v3294_v26 }
  0xbf   :  { %2706 = vmatmul.mubr.msk.bf16.gmra.mxu0 %vm523_vm0, %v3378_v52  ;;  %930 = vmatprep.mubr.bf16.mxu1 %v5959_v42 }
  0xc0   :  { %2709 = vmatprep.mubr.msk.bf16.mxu0 %vm2819_vm1, %v2818_v30 }
  0xc6   :  { %2671 = vmatmul.mubr.msk.bf16.gmra.mxu1 %vm523_vm0, %v3318_v44 }
  0xc7   :  { %2710 = vmatmul.mubr.msk.bf16.gmra.mxu0 %vm523_vm0, %v3294_v26  ;;  %940 = vmatprep.mubr.bf16.mxu1 %v5959_v42 }
  0xc8   :  { %2713 = vmatprep.mubr.msk.bf16.mxu0 %vm2819_vm1, %v2818_v30 }
  0xce   :  { %2672 = vmatmul.mubr.msk.bf16.gmra.mxu1 %vm523_vm0, %v3343_v43 }
  0xcf   :  { %2714 = vmatmul.mubr.msk.bf16.gmra.mxu0 %vm523_vm0, %v3318_v44  ;;  %v3495_v44 = vpop.permute.xlu1 %432 }
  0xd0   :  { %2717 = vmatprep.mubr.msk.bf16.mxu0 %vm2819_vm1, %v2818_v30  ;;  %5965 = vst [vmem:[#allocation7_spill] sm:$0xff] %v3495_v44 }
  0xd7   :  { %2718 = vmatmul.mubr.msk.bf16.gmra.mxu0 %vm523_vm0, %v3343_v43  ;;  %v3505_v43 = vpop.permute.xlu1 %447 }
  0xd8   :  { %5970 = vst [vmem:[#allocation12_spill] sm:$0xff] %v3505_v43 }
  0xdb   :  { %v3521_v19 = vpop.permute.xlu1 %437 }
  0xdc   :  { %5976 = vst [vmem:[#allocation18_spill] sm:$0xff] %v3521_v19 }
  0xdf   :  { %v3562_v1 = vpop.permute.xlu1 %442 }
  0xe0   :  { %5986 = vst [vmem:[#allocation28_spill] sm:$0xff] %v3562_v1 }
 0x10e   :  { %v579_v10 = vpop.f32.mrf.mxu0  ;;  %v3485_v58 = vpop.f32.mrf.mxu1 }
 0x10f   :  { %5960 = vst [vmem:[#allocation2_spill] sm:$0xff] %v3485_v58  ;;  %v3512_v35 = vadd.f32 %v579_v10, %v3501_v39 }
 0x110   :  { %v581_v26 = vpop.f32.mrf.mxu0  ;;  %v3487_v42 = vpop.f32.mrf.mxu1 }
 0x111   :  { %5961 = vst [vmem:[#allocation3_spill] sm:$0xff] %v3487_v42  ;;  %5973 = vst [vmem:[#allocation15_spill] sm:$0xff] %v3512_v35  ;;  %v3515_v25 = vadd.f32 %v581_v26, %v3501_v39 }
 0x112   :  { %v583_v40 = vpop.f32.mrf.mxu0  ;;  %v3489_v16 = vpop.f32.mrf.mxu1 }
 0x113   :  { %5962 = vst [vmem:[#allocation4_spill] sm:$0xff] %v3489_v16  ;;  %5974 = vst [vmem:[#allocation16_spill] sm:$0xff] %v3515_v25  ;;  %v3532_v15 = vadd.f32 %v583_v40, %v3495_v44 }
 0x114   :  { %v585_v50 = vpop.f32.mrf.mxu0  ;;  %v3493_v28 = vpop.f32.mrf.mxu1 }
 0x115   :  { %5964 = vst [vmem:[#allocation6_spill] sm:$0xff] %v3493_v28  ;;  %5978 = vst [vmem:[#allocation20_spill] sm:$0xff] %v3532_v15  ;;  %v3535_v41 = vadd.f32 %v585_v50, %v3495_v44 }
 0x116   :  { %v589_v30 = vpop.f32.mrf.mxu0  ;;  %v3497_v38 = vpop.f32.mrf.mxu1 }
 0x117   :  { %5966 = vst [vmem:[#allocation8_spill] sm:$0xff] %v3497_v38  ;;  %5979 = vst [vmem:[#allocation21_spill] sm:$0xff] %v3535_v41  ;;  %v3557_v47 = vadd.f32 %v589_v30, %v3521_v19 }
 0x118   :  { %v591_v17 = vpop.f32.mrf.mxu0  ;;  %v3499_v31 = vpop.f32.mrf.mxu1 }
 0x119   :  { %5967 = vst [vmem:[#allocation9_spill] sm:$0xff] %v3499_v31  ;;  %5984 = vst [vmem:[#allocation26_spill] sm:$0xff] %v3557_v47  ;;  %v3560_v4 = vadd.f32 %v591_v17, %v3521_v19 }
 0x11a   :  { %v593_v3 = vpop.f32.mrf.mxu0  ;;  %v3503_v36 = vpop.f32.mrf.mxu1 }
 0x11b   :  { %5969 = vst [vmem:[#allocation11_spill] sm:$0xff] %v3503_v36  ;;  %5985 = vst [vmem:[#allocation27_spill] sm:$0xff] %v3560_v4  ;;  %v3569_v37 = vadd.f32 %v593_v3, %v3562_v1 }
 0x11c   :  { %v595_v54 = vpop.f32.mrf.mxu0  ;;  %v3507_v53 = vpop.f32.mrf.mxu1 }
 0x11d   :  { %5971 = vst [vmem:[#allocation13_spill] sm:$0xff] %v3507_v53  ;;  %5987 = vst [vmem:[#allocation29_spill] sm:$0xff] %v3569_v37  ;;  %v3572_v9 = vadd.f32 %v595_v54, %v3562_v1 }
 0x11e   :  { %v599_v51 = vpop.f32.mrf.mxu0  ;;  %v639_v57 = vpop.f32.mrf.mxu1 }
 0x11f   :  { %v3518_v8 = vadd.f32 %v599_v51, %v3505_v43  ;;  %v640_v62 = vadd.f32 %v639_v57, %v3491_v59  ;;  %5988 = vst [vmem:[#allocation30_spill] sm:$0xff] %v3572_v9 }
 0x120   :  { %v601_v2 = vpop.f32.mrf.mxu0  ;;  %v641_v29 = vpop.f32.mrf.mxu1 }
 0x121   :  { %5975 = vst [vmem:[#allocation17_spill] sm:$0xff] %v3518_v8  ;;  %v1118_v0 = vmul.f32 %v3518_v8, %v3512_v35  ;;  %v1274_v46 = vmul.f32 %v3518_v8, %v3515_v25  ;;  %v3528_v34 = vadd.f32 %v601_v2, %v3505_v43  ;;  %v642_v52 = vadd.f32 %v641_v29, %v3491_v59 }
 0x122   :  { %v603_v21 = vpop.f32.mrf.mxu0  ;;  %v643_v60 = vpop.f32.mrf.mxu1 }
 0x123   :  { %5977 = vst [vmem:[#allocation19_spill] sm:$0xff] %v3528_v34  ;;  %v1131_v56 = vmul.f32 %v3528_v34, %v3512_v35  ;;  %v1287_v45 = vmul.f32 %v3528_v34, %v3515_v25  ;;  %v1038_v18 = vrot.slane %v642_v52, 7  ;;  %v3542_v61 = vadd.f32 %v603_v21, %v3509_v20 }
 0x124   :  { %v605_v63 = vpop.f32.mrf.mxu0  ;;  %v644_v12 = vpop.f32.mrf.mxu1 }
 0x125   :  { %5980 = vst [vmem:[#allocation22_spill] sm:$0xff] %v3542_v61  ;;  %v3547_v11 = vsel %vm1058_vm2, %v640_v62, %v1038_v18  ;;  %v1119_v5 = vmul.f32 %v3542_v61, %v3532_v15  ;;  %v1275_v6 = vmul.f32 %v3542_v61, %v3535_v41  ;;  %v3554_v27 = vadd.f32 %v605_v63, %v3509_v20  ;;  %v3594_v62 = vpop.permute.xlu0 %462 }
 0x126   :  { %5982 = vst [vmem:[#allocation24_spill] sm:$0xff] %v3547_v11  ;;  %v609_v22 = vpop.f32.mrf.mxu0  ;;  %v680_v32 = vpop.f32.mrf.mxu1  ;;  %5993 = vst [vmem:[#allocation35_spill] sm:$0xff] %v3594_v62 }
 0x127   :  { %5983 = vst [vmem:[#allocation25_spill] sm:$0xff] %v3554_v27  ;;  %v1122_v24 = vadd.f32 %v1119_v5, %v1118_v0  ;;  %v1278_v23 = vadd.f32 %v1275_v6, %v1274_v46  ;;  %v1132_v49 = vmul.f32 %v3554_v27, %v3532_v15  ;;  %v1288_v14 = vmul.f32 %v3554_v27, %v3535_v41 }
 0x128   :  { %v3575_v48 = vadd.f32 %v609_v22, %v3544_v7  ;;  %v3578_v33 = vadd.f32 %v680_v32, %v3501_v39  ;;  %v611_v13 = vpop.f32.mrf.mxu0  ;;  %v682_v55 = vpop.f32.mrf.mxu1 }
 0x129   :  { %v1135_v10 = vadd.f32 %v1132_v49, %v1131_v56  ;;  %v1291_v26 = vadd.f32 %v1288_v14, %v1287_v45  ;;  %v3581_v40 = vadd.f32 %v611_v13, %v3544_v7  ;;  %v3584_v50 = vadd.f32 %v682_v55, %v3501_v39 }
 0x12a   :  { %5989 = vst [vmem:[#allocation31_spill] sm:$0xff] %v3575_v48  ;;  %5990 = vst [vmem:[#allocation32_spill] sm:$0xff] %v3578_v33  ;;  %v1120_v30 = vmul.f32 %v3575_v48, %v3557_v47  ;;  %v1276_v17 = vmul.f32 %v3575_v48, %v3560_v4  ;;  %v1430_v3 = vmul.f32 %v3578_v33, %v3518_v8  ;;  %v613_v51 = vpop.f32.mrf.mxu0  ;;  %v684_v57 = vpop.f32.mrf.mxu1 }
 0x12b   :  { %5991 = vst [vmem:[#allocation33_spill] sm:$0xff] %v3581_v40  ;;  %5992 = vst [vmem:[#allocation34_spill] sm:$0xff] %v3584_v50  ;;  %v1443_v54 = vmul.f32 %v3578_v33, %v3528_v34  ;;  %v1133_v2 = vmul.f32 %v3581_v40, %v3557_v47  ;;  %v1289_v29 = vmul.f32 %v3581_v40, %v3560_v4 }
 0x12c   :  { %v1586_v0 = vmul.f32 %v3584_v50, %v3518_v8  ;;  %v1599_v46 = vmul.f32 %v3584_v50, %v3528_v34  ;;  %v1123_v52 = vadd.f32 %v1122_v24, %v1120_v30  ;;  %v1279_v21 = vadd.f32 %v1278_v23, %v1276_v17  ;;  %v615_v45 = vpop.f32.mrf.mxu0  ;;  %v686_v18 = vpop.f32.mrf.mxu1 }
 0x12d   :  { %v3605_v60 = vadd.f32 %v613_v51, %v3594_v62  ;;  %v3608_v56 = vadd.f32 %v684_v57, %v3495_v44  ;;  %v1136_v63 = vadd.f32 %v1135_v10, %v1133_v2  ;;  %v1292_v12 = vadd.f32 %v1291_v26, %v1289_v29 }
 0x12e   :  { %v3611_v5 = vadd.f32 %v615_v45, %v3594_v62  ;;  %v3614_v6 = vadd.f32 %v686_v18, %v3495_v44  ;;  %v690_v49 = vpop.f32.mrf.mxu1  ;;  %v781_v14 = vpop.f32.mrf.mxu0 }
 0x12f   :  { %5994 = vst [vmem:[#allocation36_spill] sm:$0xff] %v3605_v60  ;;  %5995 = vst [vmem:[#allocation37_spill] sm:$0xff] %v3608_v56  ;;  %v1121_v22 = vmul.f32 %v3605_v60, %v3569_v37  ;;  %v1277_v32 = vmul.f32 %v3605_v60, %v3572_v9  ;;  %v1431_v24 = vmul.f32 %v3608_v56, %v3542_v61 }
 0x130   :  { %5996 = vst [vmem:[#allocation38_spill] sm:$0xff] %v3611_v5  ;;  %5997 = vst [vmem:[#allocation39_spill] sm:$0xff] %v3614_v6  ;;  %v1444_v23 = vmul.f32 %v3608_v56, %v3554_v27  ;;  %v1134_v13 = vmul.f32 %v3611_v5, %v3569_v37  ;;  %v1290_v55 = vmul.f32 %v3611_v5, %v3572_v9  ;;  %v692_v2 = vpop.f32.mrf.mxu1  ;;  %v783_v29 = vpop.f32.mrf.mxu0 }
 0x131   :  { %v1587_v10 = vmul.f32 %v3614_v6, %v3542_v61  ;;  %v1600_v26 = vmul.f32 %v3614_v6, %v3554_v27  ;;  %v1124_v30 = vadd.f32 %v1123_v52, %v1121_v22  ;;  %v1280_v17 = vadd.f32 %v1279_v21, %v1277_v32 }
 0x132   :  { %v1434_v51 = vadd.f32 %v1431_v24, %v1430_v3  ;;  %v1447_v57 = vadd.f32 %v1444_v23, %v1443_v54  ;;  %v1137_v45 = vadd.f32 %v1136_v63, %v1134_v13  ;;  %v1293_v18 = vadd.f32 %v1292_v12, %v1290_v55  ;;  %v694_v42 = vpop.f32.mrf.mxu1  ;;  %v785_v58 = vpop.f32.mrf.mxu0 }
 0x133   :  { %v1590_v53 = vadd.f32 %v1587_v10, %v1586_v0  ;;  %v1603_v36 = vadd.f32 %v1600_v26, %v1599_v46  ;;  %v1125_v31 = vrot.slane %v1124_v30, 4  ;;  %v1281_v38 = vrot.slane %v1280_v17, 4 }
 0x134   :  { %v3633_v28 = vadd.f32 %v690_v49, %v3521_v19  ;;  %v3636_v16 = vadd.f32 %v781_v14, %v3501_v39  ;;  %v1138_v52 = vrot.slane %v1137_v45, 4  ;;  %v1294_v21 = vrot.slane %v1293_v18, 4  ;;  %v696_v22 = vpop.f32.mrf.mxu1  ;;  %v787_v32 = vpop.f32.mrf.mxu0 }
 0x135   :  { %v3639_v3 = vadd.f32 %v692_v2, %v3521_v19  ;;  %v3642_v54 = vadd.f32 %v783_v29, %v3501_v39  ;;  %v1126_v0 = vadd.f32 %v1125_v31, %v1124_v30  ;;  %v1282_v46 = vadd.f32 %v1281_v38, %v1280_v17 }
 0x136   :  { %5998 = vst [vmem:[#allocation40_spill] sm:$0xff] %v3633_v28  ;;  %5999 = vst [vmem:[#allocation41_spill] sm:$0xff] %v3636_v16  ;;  %v1432_v63 = vmul.f32 %v3633_v28, %v3575_v48  ;;  %v1445_v12 = vmul.f32 %v3633_v28, %v3581_v40  ;;  %v1139_v24 = vadd.f32 %v1138_v52, %v1137_v45  ;;  %v700_v10 = vpop.f32.mrf.mxu1  ;;  %v791_v26 = vpop.f32.mrf.mxu0 }
 0x137   :  { %6000 = vst [vmem:[#allocation42_spill] sm:$0xff] %v3639_v3  ;;  %6001 = vst [vmem:[#allocation43_spill] sm:$0xff] %v3642_v54  ;;  %v1295_v23 = vadd.f32 %v1294_v21, %v1293_v18  ;;  %v1742_v49 = vmul.f32 %v3636_v16, %v3518_v8  ;;  %v1755_v14 = vmul.f32 %v3636_v16, %v3528_v34  ;;  %v1127_v13 = vrot.slane %v1126_v0, 2 }
 0x138   :  { %v1283_v55 = vrot.slane %v1282_v46, 2  ;;  %v1435_v31 = vadd.f32 %v1434_v51, %v1432_v63  ;;  %v1448_v38 = vadd.f32 %v1447_v57, %v1445_v12  ;;  %v1140_v30 = vrot.slane %v1139_v24, 2  ;;  %v3660_v51 = vpop.f32.mrf.mxu1  ;;  %v3662_v57 = vpop.f32.mrf.mxu0 }
 0x139   :  { %v1296_v17 = vrot.slane %v1295_v23, 2  ;;  %v1588_v2 = vmul.f32 %v3639_v3, %v3575_v48  ;;  %v1601_v29 = vmul.f32 %v3639_v3, %v3581_v40  ;;  %v1128_v45 = vadd.f32 %v1127_v13, %v1126_v0 }
 0x13a   :  { %v1284_v18 = vadd.f32 %v1283_v55, %v1282_v46  ;;  %v1898_v52 = vmul.f32 %v3642_v54, %v3518_v8  ;;  %v1911_v21 = vmul.f32 %v3642_v54, %v3528_v34  ;;  %v1141_v63 = vadd.f32 %v1140_v30, %v1139_v24  ;;  %v3670_v46 = vpop.f32.mrf.mxu1  ;;  %v3672_v13 = vpop.f32.mrf.mxu0 }
 0x13b   :  { %v1297_v12 = vadd.f32 %v1296_v17, %v1295_v23  ;;  %v1591_v11 = vadd.f32 %v1590_v53, %v1588_v2  ;;  %v1604_v59 = vadd.f32 %v1603_v36, %v1601_v29  ;;  %v1129_v39 = vrot.slane %v1128_v45, 1 }
 0x13c   :  { %v1285_v9 = vrot.slane %v1284_v18, 1  ;;  %v3665_v37 = vadd.f32 %v694_v42, %v3562_v1  ;;  %v3668_v0 = vadd.f32 %v785_v58, %v3495_v44  ;;  %v1142_v55 = vrot.slane %v1141_v63, 1  ;;  %v3688_v23 = vpop.f32.mrf.mxu1  ;;  %v3690_v30 = vpop.f32.mrf.mxu0 }
 0x13d   :  { %v1298_v34 = vrot.slane %v1297_v12, 1  ;;  %v3675_v8 = vadd.f32 %v696_v22, %v3562_v1  ;;  %v3678_v53 = vadd.f32 %v787_v32, %v3495_v44  ;;  %v3680_v36 = vadd.f32 %v1129_v39, %v1128_v45 }
 0x13e   :  { %6002 = vst [vmem:[#allocation44_spill] sm:$0xff] %v3665_v37  ;;  %6003 = vst [vmem:[#allocation45_spill] sm:$0xff] %v3668_v0  ;;  %v3682_v24 = vadd.f32 %v1285_v9, %v1284_v18  ;;  %v1433_v58 = vmul.f32 %v3665_v37, %v3605_v60  ;;  %v1446_v42 = vmul.f32 %v3665_v37, %v3611_v5  ;;  %v3704_v18 = vpop.f32.mrf.mxu1 }
 0x13f   :  { %6004 = vst [vmem:[#allocation46_spill] sm:$0xff] %v3675_v8  ;;  %6005 = vst [vmem:[#allocation47_spill] sm:$0xff] %v3678_v53  ;;  %v3692_v17 = vadd.f32 %v1142_v55, %v1141_v63  ;;  %v3694_v22 = vadd.f32 %v1298_v34, %v1297_v12  ;;  %v1743_v39 = vmul.f32 %v3668_v0, %v3542_v61  ;;  %v3706_v63 = vpop.f32.mrf.mxu0 }
 0x140   :  { %6006 = vst [vmem:[#allocation48_spill] sm:$0xff] %v3680_v36  ;;  %6007 = vst [vmem:[#allocation49_spill] sm:$0xff] %v3682_v24  ;;  %v1756_v9 = vmul.f32 %v3668_v0, %v3554_v27  ;;  %v1436_v32 = vadd.f32 %v1435_v31, %v1433_v58  ;;  %v1449_v2 = vadd.f32 %v1448_v38, %v1446_v42 }
 0x141   :  { %6008 = vst [vmem:[#allocation50_spill] sm:$0xff] %v3692_v17  ;;  %6009 = vst [vmem:[#allocation51_spill] sm:$0xff] %v3694_v22  ;;  %v1589_v29 = vmul.f32 %v3675_v8, %v3605_v60  ;;  %v1602_v45 = vmul.f32 %v3675_v8, %v3611_v5  ;;  %v3713_v12 = vsel %vm1058_vm2, %v3680_v36, %v3692_v17  ;;  %v3722_v8 = vpop.f32.mrf.mxu1  ;;  %v3724_v34 = vpop.f32.mrf.mxu0 }
 0x142   :  { %6010 = vst [vmem:[#allocation52_spill] sm:$0xff] %v3713_v12  ;;  %v3720_v38 = vsel %vm1058_vm2, %v3682_v24, %v3694_v22  ;;  %v1437_v55 = vrot.slane %v1436_v32, 4  ;;  %v1450_v58 = vrot.slane %v1449_v2, 4  ;;  %v1746_v42 = vadd.f32 %v1743_v39, %v1742_v49 }
 0x143   :  { %6011 = vst [vmem:[#allocation53_spill] sm:$0xff] %v3720_v38  ;;  %v1759_v44 = vadd.f32 %v1756_v9, %v1755_v14  ;;  %v1592_v37 = vadd.f32 %v1591_v11, %v1589_v29  ;;  %v1605_v62 = vadd.f32 %v1604_v59, %v1602_v45  ;;  %v1899_v12 = vmul.f32 %v3678_v53, %v3542_v61  ;;  %v3736_v14 = vpop.f32.mrf.mxu1  ;;  %v3738_v39 = vpop.f32.mrf.mxu0 }
 0x144   :  { %v1912_v31 = vmul.f32 %v3678_v53, %v3554_v27  ;;  %v1438_v17 = vadd.f32 %v1437_v55, %v1436_v32  ;;  %v1451_v36 = vadd.f32 %v1450_v58, %v1449_v2  ;;  %v3731_v38 = vadd.f32 %v700_v10, %v3505_v43  ;;  %6014 = vst [vmem:[#allocation56_spill] sm:$0xff] %v3736_v14 }
 0x145   :  { %v3734_v49 = vadd.f32 %v791_v26, %v3521_v19  ;;  %6015 = vst [vmem:[#allocation57_spill] sm:$0xff] %v3738_v39  ;;  %v1593_v11 = vrot.slane %v1592_v37, 4  ;;  %v1606_v59 = vrot.slane %v1605_v62, 4  ;;  %v1902_v9 = vadd.f32 %v1899_v12, %v1898_v52  ;;  %v3748_v26 = vpop.f32.mrf.mxu1  ;;  %v3750_v2 = vpop.f32.mrf.mxu0 }
 0x146   :  { %6012 = vst [vmem:[#allocation54_spill] sm:$0xff] %v3731_v38  ;;  %v1915_v29 = vadd.f32 %v1912_v31, %v1911_v21  ;;  %v1439_v45 = vrot.slane %v1438_v17, 2  ;;  %v1452_v61 = vrot.slane %v1451_v36, 2  ;;  %v3742_v32 = vmul.f32 %v3731_v38, %v3512_v35  ;;  %6016 = vst [vmem:[#allocation58_spill] sm:$0xff] %v3748_v26 }
 0x147   :  { %6013 = vst [vmem:[#allocation55_spill] sm:$0xff] %v3734_v49  ;;  %v3746_v10 = vmul.f32 %v3731_v38, %v3515_v25  ;;  %6017 = vst [vmem:[#allocation59_spill] sm:$0xff] %v3750_v2  ;;  %v1594_v55 = vadd.f32 %v1593_v11, %v1592_v37  ;;  %v1607_v58 = vadd.f32 %v1606_v59, %v1605_v62  ;;  %v3768_v37 = vpop.f32.mrf.mxu1 }
 0x148   :  { %v3754_v52 = vmul.f32 %v3731_v38, %v3578_v33  ;;  %v3758_v21 = vmul.f32 %v3731_v38, %v3584_v50  ;;  %v1440_v12 = vadd.f32 %v1439_v45, %v1438_v17  ;;  %v1453_v31 = vadd.f32 %v1452_v61, %v1451_v36  ;;  %6018 = vst [vmem:[#allocation60_spill] sm:$0xff] %v3768_v37  ;;  %v3774_v17 = vpop.f32.mrf.mxu0 }
 0x149   :  { %v3762_v27 = vmul.f32 %v3636_v16, %v3731_v38  ;;  %v3766_v22 = vmul.f32 %v3642_v54, %v3731_v38  ;;  %v1595_v62 = vrot.slane %v1594_v55, 2  ;;  %v1608_v11 = vrot.slane %v1607_v58, 2  ;;  %6019 = vst [vmem:[#allocation61_spill] sm:$0xff] %v3774_v17  ;;  %v3784_v37 = vpop.f32.mrf.mxu1 }
 0x14a   :  { %v1744_v59 = vmul.f32 %v3734_v49, %v3575_v48  ;;  %v1757_v24 = vmul.f32 %v3734_v49, %v3581_v40  ;;  %v1441_v61 = vrot.slane %v1440_v12, 1  ;;  %v1454_v36 = vrot.slane %v1453_v31, 1  ;;  %6022 = vst [vmem:[#allocation64_spill] sm:$0xff] %v3784_v37  ;;  %v3786_v3 = vpop.f32.mrf.mxu0 }
 0x14b   :  { %v3778_v45 = vadd.f32 %v3660_v51, %v3505_v43  ;;  %v3782_v38 = vadd.f32 %v3662_v57, %v3521_v19  ;;  %v1596_v2 = vadd.f32 %v1595_v62, %v1594_v55  ;;  %v1609_v26 = vadd.f32 %v1608_v11, %v1607_v58  ;;  %v3796_v57 = vpop.f32.mrf.mxu1 }
 0x14c   :  { %v1747_v39 = vadd.f32 %v1746_v42, %v1744_v59  ;;  %v1760_v14 = vadd.f32 %v1759_v44, %v1757_v24  ;;  %v3788_v49 = vadd.f32 %v1441_v61, %v1440_v12  ;;  %v3790_v17 = vadd.f32 %v1454_v36, %v1453_v31  ;;  %6024 = vst [vmem:[#allocation66_spill] sm:$0xff] %v3796_v57  ;;  %v3802_v24 = vpop.f32.mrf.mxu0 }
 0x14d   :  { %6020 = vst [vmem:[#allocation62_spill] sm:$0xff] %v3778_v45  ;;  %6021 = vst [vmem:[#allocation63_spill] sm:$0xff] %v3782_v38  ;;  %v1157_v51 = vmul.f32 %v3778_v45, %v3512_v35  ;;  %v1313_v28 = vmul.f32 %v3778_v45, %v3515_v25  ;;  %v1597_v19 = vrot.slane %v1596_v2, 1  ;;  %v1610_v37 = vrot.slane %v1609_v26, 1  ;;  %v3815_v62 = vpop.f32.mrf.mxu1 }
 0x14e   :  { %6023 = vst [vmem:[#allocation65_spill] sm:$0xff] %v3790_v17  ;;  %v1469_v42 = vmul.f32 %v3778_v45, %v3578_v33  ;;  %v1625_v44 = vmul.f32 %v3778_v45, %v3584_v50  ;;  %6025 = vst [vmem:[#allocation67_spill] sm:$0xff] %v3802_v24  ;;  %v3809_v58 = vsel %vm1058_vm2, %v3788_v49, %v3790_v17  ;;  %v3825_v55 = vpop.f32.mrf.mxu0 }
 0x14f   :  { %6026 = vst [vmem:[#allocation68_spill] sm:$0xff] %v3809_v58  ;;  %v1781_v12 = vmul.f32 %v3636_v16, %v3778_v45  ;;  %v1937_v31 = vmul.f32 %v3642_v54, %v3778_v45  ;;  %6027 = vst [vmem:[#allocation69_spill] sm:$0xff] %v3815_v62  ;;  %v3817_v11 = vadd.f32 %v1597_v19, %v1596_v2  ;;  %v3843_v2 = vpop.f32.mrf.mxu1 }
 0x150   :  { %v3819_v59 = vadd.f32 %v1610_v37, %v1609_v26  ;;  %v1900_v61 = vmul.f32 %v3782_v38, %v3575_v48  ;;  %v1913_v36 = vmul.f32 %v3782_v38, %v3581_v40  ;;  %6030 = vst [vmem:[#allocation72_spill] sm:$0xff] %v3825_v55  ;;  %v3829_v57 = vadd.f32 %v3670_v46, %v3509_v20  ;;  %v3852_v40 = vpop.f32.mrf.mxu0 }
 0x151   :  { %6028 = vst [vmem:[#allocation70_spill] sm:$0xff] %v3817_v11  ;;  %v3833_v45 = vadd.f32 %v3672_v13, %v3562_v1  ;;  %v3837_v19 = vadd.f32 %v3688_v23, %v3509_v20  ;;  %v3841_v26 = vadd.f32 %v3690_v30, %v3562_v1  ;;  %6035 = vst [vmem:[#allocation77_spill] sm:$0xff] %v3843_v2  ;;  %v3862_v1 = vpop.f32.mrf.mxu1 }
 0x152   :  { %6029 = vst [vmem:[#allocation71_spill] sm:$0xff] %v3819_v59  ;;  %6031 = vst [vmem:[#allocation73_spill] sm:$0xff] %v3829_v57  ;;  %v3850_v46 = vsel %vm1058_vm2, %v3817_v11, %v3819_v59  ;;  %v1903_v13 = vadd.f32 %v1902_v9, %v1900_v61  ;;  %v1916_v62 = vadd.f32 %v1915_v29, %v1913_v36 }
 0x153   :  { %6032 = vst [vmem:[#allocation74_spill] sm:$0xff] %v3833_v45  ;;  %6033 = vst [vmem:[#allocation75_spill] sm:$0xff] %v3837_v19  ;;  %v1145_v23 = vmul.f32 %v3829_v57, %v3532_v15  ;;  %v1301_v30 = vmul.f32 %v3829_v57, %v3535_v41  ;;  %v1457_v2 = vmul.f32 %v3829_v57, %v3608_v56  ;;  %v3878_v55 = vpop.f32.mrf.mxu1 }
 0x154   :  { %6034 = vst [vmem:[#allocation76_spill] sm:$0xff] %v3841_v26  ;;  %6036 = vst [vmem:[#allocation78_spill] sm:$0xff] %v3850_v46  ;;  %v1613_v37 = vmul.f32 %v3829_v57, %v3614_v6  ;;  %v1769_v9 = vmul.f32 %v3668_v0, %v3829_v57  ;;  %v1925_v29 = vmul.f32 %v3678_v53, %v3829_v57 }
 0x155   :  { %6037 = vst [vmem:[#allocation79_spill] sm:$0xff] %v3852_v40  ;;  %6038 = vst [vmem:[#allocation80_spill] sm:$0xff] %v3862_v1  ;;  %v1745_v61 = vmul.f32 %v3833_v45, %v3605_v60  ;;  %v1758_v36 = vmul.f32 %v3833_v45, %v3611_v5  ;;  %v3872_v40 = vpop.f32.mrf.mxu0  ;;  %v1148_v48 = vadd.f32 %v1145_v23, %v3742_v32 }
 0x156   :  { %6039 = vst [vmem:[#allocation81_spill] sm:$0xff] %v3872_v40  ;;  %v1304_v46 = vadd.f32 %v1301_v30, %v3746_v10  ;;  %v1460_v1 = vadd.f32 %v1457_v2, %v3754_v52  ;;  %v1616_v58 = vadd.f32 %v1613_v37, %v3758_v21  ;;  %6040 = vst [vmem:[#allocation82_spill] sm:$0xff] %v3878_v55  ;;  %v3896_v21 = vpop.f32.mrf.mxu1 }
 0x157   :  { %v3881_v57 = vadd.f32 %v1769_v9, %v3762_v27  ;;  %v3884_v24 = vadd.f32 %v1925_v29, %v3766_v22  ;;  %v1748_v59 = vadd.f32 %v1747_v39, %v1745_v61  ;;  %v1761_v11 = vadd.f32 %v1760_v14, %v1758_v36  ;;  %v3886_v17 = vpop.f32.mrf.mxu0  ;;  %6042 = vst [vmem:[#allocation84_spill] sm:$0xff] %v3896_v21 }
 0x158   :  { %6041 = vst [vmem:[#allocation83_spill] sm:$0xff] %v3886_v17  ;;  %v1158_v32 = vmul.f32 %v3837_v19, %v3532_v15  ;;  %v1314_v10 = vmul.f32 %v3837_v19, %v3535_v41  ;;  %v1470_v52 = vmul.f32 %v3837_v19, %v3608_v56  ;;  %v1626_v27 = vmul.f32 %v3837_v19, %v3614_v6  ;;  %v3912_v61 = vpop.f32.mrf.mxu1 }
 0x159   :  { %v1749_v22 = vrot.slane %v1748_v59, 4  ;;  %v1762_v2 = vrot.slane %v1761_v11, 4  ;;  %v1782_v14 = vmul.f32 %v3668_v0, %v3837_v19  ;;  %v1938_v39 = vmul.f32 %v3678_v53, %v3837_v19  ;;  %v3902_v37 = vpop.f32.mrf.mxu0  ;;  %6044 = vst [vmem:[#allocation86_spill] sm:$0xff] %v3912_v61 }
 0x15a   :  { %6043 = vst [vmem:[#allocation85_spill] sm:$0xff] %v3902_v37  ;;  %v3904_v23 = vadd.f32 %v1158_v32, %v1157_v51  ;;  %v3906_v30 = vadd.f32 %v1314_v10, %v1313_v28  ;;  %v3908_v9 = vadd.f32 %v1470_v52, %v1469_v42  ;;  %v3910_v29 = vadd.f32 %v1626_v27, %v1625_v44 }
 0x15b   :  { %v1750_v36 = vadd.f32 %v1749_v22, %v1748_v59  ;;  %v1763_v21 = vadd.f32 %v1762_v2, %v1761_v11  ;;  %v3914_v17 = vadd.f32 %v1782_v14, %v1781_v12  ;;  %v3916_v55 = vadd.f32 %v1938_v39, %v1937_v31  ;;  %v3918_v40 = vpop.f32.mrf.mxu0  ;;  %v3932_v12 = vpop.f32.mrf.mxu1  ;;  %v6052_v39 = vld [vmem:[#allocation40_spill] sm:$0xff] }
 0x15c   :  { %6045 = vst [vmem:[#allocation87_spill] sm:$0xff] %v3918_v40  ;;  %v1901_v51 = vmul.f32 %v3841_v26, %v3605_v60  ;;  %v1914_v28 = vmul.f32 %v3841_v26, %v3611_v5  ;;  %v3926_v42 = vadd.f32 %v3704_v18, %v3544_v7  ;;  %v3930_v44 = vadd.f32 %v3706_v63, %v3505_v43  ;;  %v6053_v40 = vld [vmem:[#allocation42_spill] sm:$0xff]  ;;  %v6056_v5 = vld [vmem:[#allocation55_spill] sm:$0xff] }
 0x15d   :  { %6048 = vst [vmem:[#allocation90_spill] sm:$0xff] %v3932_v12  ;;  %v1751_v31 = vrot.slane %v1750_v36, 2  ;;  %v1764_v11 = vrot.slane %v1763_v21, 2  ;;  %v3936_v59 = vadd.f32 %v3722_v8, %v3544_v7  ;;  %v3940_v32 = vadd.f32 %v3724_v34, %v3505_v43  ;;  %v3942_v10 = vpop.f32.mrf.mxu0  ;;  %v744_v22 = vpop.f32.mrf.mxu1 }
 0x15e   :  { %6046 = vst [vmem:[#allocation88_spill] sm:$0xff] %v3926_v42  ;;  %6047 = vst [vmem:[#allocation89_spill] sm:$0xff] %v3930_v44  ;;  %v1904_v18 = vadd.f32 %v1903_v13, %v1901_v51  ;;  %v1917_v52 = vadd.f32 %v1916_v62, %v1914_v28  ;;  %v1146_v63 = vmul.f32 %v3926_v42, %v3557_v47 }
 0x15f   :  { %6049 = vst [vmem:[#allocation91_spill] sm:$0xff] %v3936_v59  ;;  %6050 = vst [vmem:[#allocation92_spill] sm:$0xff] %v3940_v32  ;;  %v1302_v27 = vmul.f32 %v3926_v42, %v3560_v4  ;;  %v1752_v2 = vadd.f32 %v1751_v31, %v1750_v36  ;;  %v1765_v14 = vadd.f32 %v1764_v11, %v1763_v21  ;;  %v3952_v37 = vpop.f32.mrf.mxu0  ;;  %v745_v28 = vpop.f32.mrf.mxu1 }
 0x160   :  { %6051 = vst [vmem:[#allocation93_spill] sm:$0xff] %v3942_v10  ;;  %v1458_v8 = vmul.f32 %v3926_v42, %v6052_v39  ;;  %v1614_v34 = vmul.f32 %v3926_v42, %v6053_v40  ;;  %6054 = vst [vmem:[#allocation94_spill] sm:$0xff] %v3952_v37  ;;  %v1905_v10 = vrot.slane %v1904_v18, 4  ;;  %v1918_v13 = vrot.slane %v1917_v52, 4 }
 0x161   :  { %v3954_v62 = vadd.f32 %v1148_v48, %v1146_v63  ;;  %v3956_v51 = vadd.f32 %v1304_v46, %v1302_v27  ;;  %v1753_v43 = vrot.slane %v1752_v2, 1  ;;  %v1766_v12 = vrot.slane %v1765_v14, 1  ;;  %v3962_v36 = vpop.f32.mrf.mxu0 }
 0x162   :  { %v3958_v22 = vadd.f32 %v1460_v1, %v1458_v8  ;;  %v3960_v21 = vadd.f32 %v1616_v58, %v1614_v34  ;;  %6055 = vst [vmem:[#allocation95_spill] sm:$0xff] %v3962_v36  ;;  %v1906_v31 = vadd.f32 %v1905_v10, %v1904_v18  ;;  %v1919_v11 = vadd.f32 %v1918_v13, %v1917_v52 }
 0x163   :  { %v1770_v37 = vmul.f32 %v6056_v5, %v3926_v42  ;;  %v1926_v48 = vmul.f32 %v3782_v38, %v3926_v42  ;;  %v3968_v63 = vadd.f32 %v1753_v43, %v1752_v2  ;;  %v3970_v46 = vadd.f32 %v1766_v12, %v1765_v14  ;;  %v3980_v10 = vpop.f32.mrf.mxu0 }
 0x164   :  { %v3974_v1 = vmul.f32 %v3930_v44, %v3512_v35  ;;  %v3978_v58 = vmul.f32 %v3930_v44, %v3515_v25  ;;  %6057 = vst [vmem:[#allocation96_spill] sm:$0xff] %v3980_v10  ;;  %v1907_v18 = vrot.slane %v1906_v31, 2  ;;  %v1920_v52 = vrot.slane %v1919_v11, 2 }
 0x165   :  { %v1773_v27 = vadd.f32 %v3881_v57, %v1770_v37  ;;  %v1929_v8 = vadd.f32 %v3884_v24, %v1926_v48  ;;  %v3989_v12 = vsel %vm1058_vm2, %v3968_v63, %v3970_v46  ;;  %v3993_v2 = vmul.f32 %v3930_v44, %v3578_v33  ;;  %v3999_v34 = vpop.f32.mrf.mxu0 }
 0x166   :  { %6058 = vst [vmem:[#allocation97_spill] sm:$0xff] %v3989_v12  ;;  %v3997_v14 = vmul.f32 %v3930_v44, %v3584_v50  ;;  %6059 = vst [vmem:[#allocation98_spill] sm:$0xff] %v3999_v34  ;;  %v1908_v57 = vadd.f32 %v1907_v18, %v1906_v31  ;;  %v1921_v24 = vadd.f32 %v1920_v52, %v1919_v11 }
 0x167   :  { %v4003_v37 = vmul.f32 %v3930_v44, %v3636_v16  ;;  %v4007_v13 = vmul.f32 %v3930_v44, %v3642_v54  ;;  %v1159_v28 = vmul.f32 %v3936_v59, %v3557_v47  ;;  %v1315_v48 = vmul.f32 %v3936_v59, %v3560_v4  ;;  %v845_v11 = vpop.f32.mrf.mxu0 }
 0x168   :  { %v1471_v43 = vmul.f32 %v3936_v59, %v6052_v39  ;;  %v1627_v31 = vmul.f32 %v3936_v59, %v6053_v40  ;;  %v1909_v18 = vrot.slane %v1908_v57, 1  ;;  %v1922_v52 = vrot.slane %v1921_v24, 1 }
 0x169   :  { %v1783_v36 = vmul.f32 %v6056_v5, %v3936_v59  ;;  %v1939_v34 = vmul.f32 %v3782_v38, %v3936_v59  ;;  %v4022_v10 = vadd.f32 %v3904_v23, %v1159_v28  ;;  %v4025_v60 = vadd.f32 %v3906_v30, %v1315_v48  ;;  %v846_v11 = vpop.f32.mrf.mxu0  ;;  %v6064_v28 = vld [vmem:[#allocation56_spill] sm:$0xff] }
 0x16a   :  { %v4028_v61 = vadd.f32 %v3908_v9, %v1471_v43  ;;  %v4031_v42 = vadd.f32 %v3910_v29, %v1627_v31  ;;  %v4033_v19 = vadd.f32 %v1909_v18, %v1908_v57  ;;  %v4035_v44 = vadd.f32 %v1922_v52, %v1921_v24  ;;  %v6063_v24 = vld [vmem:[#allocation35_spill] sm:$0xff]  ;;  %v6066_v31 = vld [vmem:[#allocation57_spill] sm:$0xff]  ;;  %v6068_v11 = vld [vmem:[#allocation58_spill] sm:$0xff] }
 0x16b   :  { %v4038_v12 = vadd.f32 %v3914_v17, %v1783_v36  ;;  %v4041_v23 = vadd.f32 %v3916_v55, %v1939_v34  ;;  %v4045_v30 = vmul.f32 %v3940_v32, %v3512_v35  ;;  %v4049_v9 = vmul.f32 %v3940_v32, %v3515_v25  ;;  %v4059_v17 = vpop.f32.mrf.mxu0  ;;  %v6075_v25 = vld [vmem:[#allocation29_spill] sm:$0xff] }
 0x16c   :  { %v4053_v29 = vmul.f32 %v3940_v32, %v3578_v33  ;;  %v4057_v43 = vmul.f32 %v3940_v32, %v3584_v50  ;;  %6060 = vst [vmem:[#allocation99_spill] sm:$0xff] %v4059_v17  ;;  %v4066_v36 = vsel %vm1058_vm2, %v4033_v19, %v4035_v44  ;;  %v4070_v34 = vmul.f32 %v3940_v32, %v3636_v16  ;;  %v6070_v16 = vld [vmem:[#allocation59_spill] sm:$0xff]  ;;  %v6078_v17 = vld [vmem:[#allocation46_spill] sm:$0xff] }
 0x16d   :  { %6061 = vst [vmem:[#allocation100_spill] sm:$0xff] %v4066_v36  ;;  %v4074_v57 = vmul.f32 %v3940_v32, %v3642_v54  ;;  %v4078_v48 = vadd.f32 %v6064_v28, %v6063_v24  ;;  %v4082_v18 = vadd.f32 %v6066_v31, %v3509_v20  ;;  %v2695_v52 = vpop.f32.mrf.mxu0  ;;  %v4086_v55 = vadd.f32 %v6068_v11, %v6063_v24  ;;  %v6072_v54 = vld [vmem:[#allocation61_spill] sm:$0xff]  ;;  %v6077_v11 = vld [vmem:[#allocation44_spill] sm:$0xff] }
 0x16e   :  { %v4090_v50 = vadd.f32 %v6070_v16, %v3509_v20  ;;  %v4094_v33 = vadd.f32 %v6072_v54, %v3544_v7  ;;  %v4098_v28 = vadd.f32 %v3786_v3, %v3544_v7  ;;  %v6076_v52 = vld [vmem:[#allocation30_spill] sm:$0xff] }
 0x16f   :  { %6062 = vst [vmem:[#allocation101_spill] sm:$0xff] %v4074_v57  ;;  %6065 = vst [vmem:[#allocation56_spill] sm:$0xff] %v4078_v48  ;;  %v1147_v31 = vmul.f32 %v4078_v48, %v6075_v25  ;;  %v1303_v35 = vmul.f32 %v4078_v48, %v6076_v52  ;;  %v1459_v59 = vmul.f32 %v4078_v48, %v6077_v11  ;;  %v4108_v20 = vpop.f32.mrf.mxu0 }
 0x170   :  { %6067 = vst [vmem:[#allocation57_spill] sm:$0xff] %v4082_v18  ;;  %6069 = vst [vmem:[#allocation58_spill] sm:$0xff] %v4086_v55  ;;  %v1615_v16 = vmul.f32 %v4078_v48, %v6078_v17  ;;  %v1771_v54 = vmul.f32 %v3833_v45, %v4078_v48  ;;  %v1927_v3 = vmul.f32 %v3841_v26, %v4078_v48 }
 0x171   :  { %6071 = vst [vmem:[#allocation59_spill] sm:$0xff] %v4090_v50  ;;  %6073 = vst [vmem:[#allocation61_spill] sm:$0xff] %v4094_v33  ;;  %v1171_v7 = vmul.f32 %v4082_v18, %v3532_v15  ;;  %v1327_v32 = vmul.f32 %v4082_v18, %v3535_v41  ;;  %v1150_v36 = vadd.f32 %v3954_v62, %v1147_v31  ;;  %v2696_v38 = vpop.f32.mrf.mxu0 }
 0x172   :  { %6074 = vst [vmem:[#allocation102_spill] sm:$0xff] %v4098_v28  ;;  %6079 = vst [vmem:[#allocation103_spill] sm:$0xff] %v4108_v20  ;;  %v1306_v24 = vadd.f32 %v3956_v51, %v1303_v35  ;;  %v1462_v28 = vadd.f32 %v3958_v22, %v1459_v59  ;;  %v1618_v20 = vadd.f32 %v3960_v21, %v1615_v16 }
 0x173   :  { %v1774_v5 = vadd.f32 %v1773_v27, %v1771_v54  ;;  %v1930_v40 = vadd.f32 %v1929_v8, %v1927_v3  ;;  %v4123_v39 = vadd.f32 %v1171_v7, %v3974_v1  ;;  %v4126_v48 = vadd.f32 %v1327_v32, %v3978_v58  ;;  %v4128_v62 = vpop.f32.mrf.mxu0 }
 0x174   :  { %v1151_v4 = vrot.slane %v1150_v36, 4  ;;  %v1307_v33 = vrot.slane %v1306_v24, 4  ;;  %v1463_v47 = vrot.slane %v1462_v28, 4  ;;  %v1619_v57 = vrot.slane %v1618_v20, 4  ;;  %6082 = vst [vmem:[#allocation106_spill] sm:$0xff] %v4128_v62 }
 0x175   :  { %6080 = vst [vmem:[#allocation104_spill] sm:$0xff] %v4123_v39  ;;  %6081 = vst [vmem:[#allocation105_spill] sm:$0xff] %v4126_v48  ;;  %v1775_v35 = vrot.slane %v1774_v5, 4  ;;  %v1931_v51 = vrot.slane %v1930_v40, 4  ;;  %v1483_v59 = vmul.f32 %v4082_v18, %v3608_v56  ;;  %v1639_v38 = vmul.f32 %v4082_v18, %v3614_v6  ;;  %v2699_v32 = vpop.f32.mrf.mxu0 }
 0x176   :  { %v1152_v22 = vadd.f32 %v1151_v4, %v1150_v36  ;;  %v1308_v7 = vadd.f32 %v1307_v33, %v1306_v24  ;;  %v1464_v21 = vadd.f32 %v1463_v47, %v1462_v28  ;;  %v1620_v1 = vadd.f32 %v1619_v57, %v1618_v20 }
 0x177   :  { %v1776_v58 = vadd.f32 %v1775_v35, %v1774_v5  ;;  %v1932_v27 = vadd.f32 %v1931_v51, %v1930_v40  ;;  %v4135_v8 = vadd.f32 %v1483_v59, %v3993_v2  ;;  %v4138_v31 = vadd.f32 %v1639_v38, %v3997_v14  ;;  %v4150_v59 = vpop.f32.mrf.mxu0 }
 0x178   :  { %v1153_v16 = vrot.slane %v1152_v22, 2  ;;  %v1309_v54 = vrot.slane %v1308_v7, 2  ;;  %v1465_v3 = vrot.slane %v1464_v21, 2  ;;  %v1621_v62 = vrot.slane %v1620_v1, 2  ;;  %6083 = vst [vmem:[#allocation107_spill] sm:$0xff] %v4150_v59 }
 0x179   :  { %v1777_v48 = vrot.slane %v1776_v58, 2  ;;  %v1933_v39 = vrot.slane %v1932_v27, 2  ;;  %v1795_v4 = vmul.f32 %v4082_v18, %v3668_v0  ;;  %v1951_v20 = vmul.f32 %v4082_v18, %v3678_v53 }
 0x17a   :  { %v1154_v47 = vadd.f32 %v1153_v16, %v1152_v22  ;;  %v1310_v33 = vadd.f32 %v1309_v54, %v1308_v7  ;;  %v1466_v40 = vadd.f32 %v1465_v3, %v1464_v21  ;;  %v1622_v5 = vadd.f32 %v1621_v62, %v1620_v1  ;;  %v2700_v7 = vpop.f32.mrf.mxu0  ;;  %v6084_v16 = vld [vmem:[#allocation48_spill] sm:$0xff]  ;;  %v6085_v54 = vld [vmem:[#allocation50_spill] sm:$0xff] }
 0x17b   :  { %v1778_v2 = vadd.f32 %v1777_v48, %v1776_v58  ;;  %v1934_v36 = vadd.f32 %v1933_v39, %v1932_v27  ;;  %v4145_v14 = vadd.f32 %v1795_v4, %v4003_v37  ;;  %v4148_v57 = vadd.f32 %v1951_v20, %v4007_v13  ;;  %v6087_v20 = vld [vmem:[#allocation49_spill] sm:$0xff] }
 0x17c   :  { %v1155_v24 = vrot.slane %v1154_v47, 1  ;;  %v1311_v28 = vrot.slane %v1310_v33, 1  ;;  %v1467_v35 = vrot.slane %v1466_v40, 1  ;;  %v1623_v51 = vrot.slane %v1622_v5, 1 }
 0x17d   :  { %v1779_v38 = vrot.slane %v1778_v2, 1  ;;  %v1935_v32 = vrot.slane %v1934_v36, 1  ;;  %v1160_v22 = vmul.f32 %v4086_v55, %v6075_v25  ;;  %v1316_v39 = vmul.f32 %v4086_v55, %v6076_v52 }
 0x17e   :  { %v4156_v48 = vadd.f32 %v1155_v24, %v1154_v47  ;;  %v4158_v37 = vadd.f32 %v1311_v28, %v1310_v33  ;;  %v4160_v13 = vadd.f32 %v1467_v35, %v1466_v40  ;;  %v4162_v62 = vadd.f32 %v1623_v51, %v1622_v5  ;;  %v6088_v47 = vld [vmem:[#allocation51_spill] sm:$0xff]  ;;  %v6090_v5 = vld [vmem:[#allocation65_spill] sm:$0xff] }
 0x17f   :  { %v4164_v21 = vadd.f32 %v1779_v38, %v1778_v2  ;;  %v4166_v1 = vadd.f32 %v1935_v32, %v1934_v36  ;;  %v1163_v58 = vadd.f32 %v4022_v10, %v1160_v22  ;;  %v1319_v27 = vadd.f32 %v4025_v60, %v1316_v39  ;;  %v6092_v60 = vld [vmem:[#allocation70_spill] sm:$0xff]  ;;  %v6093_v10 = vld [vmem:[#allocation71_spill] sm:$0xff] }
 0x180   :  { %v6086_v3 = vmax.f32 %v6084_v16, %v6085_v54  ;;  %v6089_v33 = vmax.f32 %v6087_v20, %v6088_v47  ;;  %v6091_v2 = vmax.f32 %v3788_v49, %v6090_v5  ;;  %v6094_v24 = vmax.f32 %v6092_v60, %v6093_v10 }
 0x181   :  { %v6095_v35 = vmax.f32 %v3968_v63, %v3970_v46  ;;  %v6096_v38 = vmax.f32 %v4033_v19, %v4035_v44  ;;  %v1164_v49 = vrot.slane %v1163_v58, 4  ;;  %v1320_v22 = vrot.slane %v1319_v27, 4 }
 0x182   :  { %v4174_v4 = vmax.f32 %v6086_v3, %v4156_v48  ;;  %v4180_v40 = vmax.f32 %v6089_v33, %v4158_v37  ;;  %v4186_v36 = vmax.f32 %v6091_v2, %v4160_v13  ;;  %v4192_v28 = vmax.f32 %v6094_v24, %v4162_v62 }
 0x183   :  { %v4198_v51 = vmax.f32 %v6095_v35, %v4164_v21  ;;  %v4204_v32 = vmax.f32 %v6096_v38, %v4166_v1  ;;  %v1472_v39 = vmul.f32 %v4086_v55, %v6077_v11  ;;  %v1628_v7 = vmul.f32 %v4086_v55, %v6078_v17 }
 0x184   :  { %v1784_v16 = vmul.f32 %v3833_v45, %v4086_v55  ;;  %v1940_v63 = vmul.f32 %v3841_v26, %v4086_v55  ;;  %v1165_v46 = vadd.f32 %v1164_v49, %v1163_v58  ;;  %v1321_v54 = vadd.f32 %v1320_v22, %v1319_v27 }
 0x185   :  { %v1184_v19 = vmul.f32 %v4090_v50, %v3532_v15  ;;  %v1340_v44 = vmul.f32 %v4090_v50, %v3535_v41  ;;  %v1475_v3 = vadd.f32 %v4028_v61, %v1472_v39  ;;  %v1631_v20 = vadd.f32 %v4031_v42, %v1628_v7 }
 0x186   :  { %v1787_v47 = vadd.f32 %v4038_v12, %v1784_v16  ;;  %v1943_v33 = vadd.f32 %v4041_v23, %v1940_v63  ;;  %v1166_v5 = vrot.slane %v1165_v46, 2  ;;  %v1322_v2 = vrot.slane %v1321_v54, 2 }
 0x187   :  { %v4223_v60 = vadd.f32 %v1184_v19, %v4045_v30  ;;  %v4226_v58 = vadd.f32 %v1340_v44, %v4049_v9  ;;  %v1476_v27 = vrot.slane %v1475_v3, 4  ;;  %v1632_v10 = vrot.slane %v1631_v20, 4 }
 0x188   :  { %v1788_v24 = vrot.slane %v1787_v47, 4  ;;  %v1944_v35 = vrot.slane %v1943_v33, 4  ;;  %v1167_v38 = vadd.f32 %v1166_v5, %v1165_v46  ;;  %v1323_v61 = vadd.f32 %v1322_v2, %v1321_v54 }
 0x189   :  { %v1496_v42 = vmul.f32 %v4090_v50, %v3608_v56  ;;  %v1652_v12 = vmul.f32 %v4090_v50, %v3614_v6  ;;  %v1477_v23 = vadd.f32 %v1476_v27, %v1475_v3  ;;  %v1633_v49 = vadd.f32 %v1632_v10, %v1631_v20 }
 0x18a   :  { %v1789_v22 = vadd.f32 %v1788_v24, %v1787_v47  ;;  %v1945_v30 = vadd.f32 %v1944_v35, %v1943_v33  ;;  %v1168_v39 = vrot.slane %v1167_v38, 1  ;;  %v1324_v7 = vrot.slane %v1323_v61, 1  ;;  %v6097_v24 = vld [vmem:[#allocation101_spill] sm:$0xff] }
 0x18b   :  { %v1499_v9 = vadd.f32 %v1496_v42, %v4053_v29  ;;  %v1655_v16 = vadd.f32 %v1652_v12, %v4057_v43  ;;  %v1478_v63 = vrot.slane %v1477_v23, 2  ;;  %v1634_v19 = vrot.slane %v1633_v49, 2  ;;  %v6104_v43 = vld [vmem:[#allocation105_spill] sm:$0xff] }
 0x18c   :  { %v1790_v46 = vrot.slane %v1789_v22, 2  ;;  %v1946_v54 = vrot.slane %v1945_v30, 2  ;;  %v4234_v44 = vadd.f32 %v1168_v39, %v1167_v38  ;;  %v4236_v5 = vadd.f32 %v1324_v7, %v1323_v61  ;;  %v6098_v39 = vld [vmem:[#allocation26_spill] sm:$0xff]  ;;  %v6099_v7 = vld [vmem:[#allocation61_spill] sm:$0xff] }
 0x18d   :  { %v1808_v3 = vmul.f32 %v4090_v50, %v3668_v0  ;;  %v1964_v20 = vmul.f32 %v4090_v50, %v3678_v53  ;;  %v1479_v47 = vadd.f32 %v1478_v63, %v1477_v23  ;;  %v1635_v33 = vadd.f32 %v1634_v19, %v1633_v49  ;;  %v6100_v49 = vld [vmem:[#allocation27_spill] sm:$0xff]  ;;  %v6102_v19 = vld [vmem:[#allocation42_spill] sm:$0xff] }
 0x18e   :  { %v1791_v2 = vadd.f32 %v1790_v46, %v1789_v22  ;;  %v1947_v29 = vadd.f32 %v1946_v54, %v1945_v30  ;;  %v1172_v23 = vmul.f32 %v6099_v7, %v6098_v39  ;;  %v1328_v22 = vmul.f32 %v6099_v7, %v6100_v49  ;;  %v6101_v30 = vld [vmem:[#allocation40_spill] sm:$0xff] }
 0x18f   :  { %v1811_v10 = vadd.f32 %v1808_v3, %v4070_v34  ;;  %v1967_v35 = vadd.f32 %v1964_v20, %v6097_v24  ;;  %v1480_v38 = vrot.slane %v1479_v47, 1  ;;  %v1636_v61 = vrot.slane %v1635_v33, 1  ;;  %v6103_v24 = vld [vmem:[#allocation104_spill] sm:$0xff] }
 0x190   :  { %v1792_v42 = vrot.slane %v1791_v2, 1  ;;  %v1948_v12 = vrot.slane %v1947_v29, 1  ;;  %v1484_v63 = vmul.f32 %v6099_v7, %v6101_v30  ;;  %v1640_v46 = vmul.f32 %v6099_v7, %v6102_v19 }
 0x191   :  { %v4256_v54 = vadd.f32 %v1480_v38, %v1479_v47  ;;  %v4258_v34 = vadd.f32 %v1636_v61, %v1635_v33  ;;  %v1175_v27 = vadd.f32 %v6103_v24, %v1172_v23  ;;  %v1331_v59 = vadd.f32 %v6104_v43, %v1328_v22  ;;  %v6106_v43 = vld [vmem:[#allocation63_spill] sm:$0xff] }
 0x192   :  { %v4260_v3 = vadd.f32 %v1792_v42, %v1791_v2  ;;  %v4262_v20 = vadd.f32 %v1948_v12, %v1947_v29  ;;  %v1487_v53 = vadd.f32 %v4135_v8, %v1484_v63  ;;  %v1643_v0 = vadd.f32 %v4138_v31, %v1640_v46  ;;  %v6105_v29 = vld [vmem:[#allocation55_spill] sm:$0xff]  ;;  %v6107_v31 = vld [vmem:[#allocation102_spill] sm:$0xff]  ;;  %v4284_v12 = vpop.f32.mrf.mxu0 }
 0x193   :  { %v1796_v38 = vmul.f32 %v6099_v7, %v6105_v29  ;;  %v1952_v8 = vmul.f32 %v6099_v7, %v6106_v43  ;;  %v1185_v61 = vmul.f32 %v6107_v31, %v6098_v39  ;;  %v1341_v42 = vmul.f32 %v6107_v31, %v6100_v49  ;;  %6108 = vst [vmem:[#allocation48_spill] sm:$0xff] %v4284_v12  ;;  %v6110_v39 = vld [vmem:[#allocation67_spill] sm:$0xff] }
 0x194   :  { %v1497_v23 = vmul.f32 %v6107_v31, %v6101_v30  ;;  %v1653_v22 = vmul.f32 %v6107_v31, %v6102_v19  ;;  %v1809_v63 = vmul.f32 %v6107_v31, %v6105_v29  ;;  %v1965_v46 = vmul.f32 %v6107_v31, %v6106_v43  ;;  %v2703_v6 = vpop.f32.mrf.mxu0  ;;  %v6109_v29 = vld [vmem:[#allocation35_spill] sm:$0xff] }
 0x195   :  { %v1799_v24 = vadd.f32 %v4145_v14, %v1796_v38  ;;  %v1955_v2 = vadd.f32 %v4148_v57, %v1952_v8  ;;  %v1188_v33 = vadd.f32 %v4223_v60, %v1185_v61  ;;  %v1344_v47 = vadd.f32 %v4226_v58, %v1341_v42  ;;  %v6112_v14 = vld [vmem:[#allocation72_spill] sm:$0xff] }
 0x196   :  { %v4298_v12 = vadd.f32 %v1499_v9, %v1497_v23  ;;  %v4300_v30 = vadd.f32 %v1655_v16, %v1653_v22  ;;  %v4302_v19 = vadd.f32 %v1811_v10, %v1809_v63  ;;  %v4304_v49 = vadd.f32 %v1967_v35, %v1965_v46  ;;  %v4322_v16 = vpop.f32.mrf.mxu1 }
 0x197   :  { %v4308_v43 = vadd.f32 %v6110_v39, %v6109_v29  ;;  %v4312_v57 = vadd.f32 %v6112_v14, %v6109_v29 }
 0x198   :  { %v4332_v55 = vpop.f32.mrf.mxu1 }
 0x199   :  { %6111 = vst [vmem:[#allocation50_spill] sm:$0xff] %v4308_v43  ;;  %v1173_v60 = vmul.f32 %v4308_v43, %v6075_v25  ;;  %v1329_v6 = vmul.f32 %v4308_v43, %v6076_v52  ;;  %v1485_v58 = vmul.f32 %v4308_v43, %v6077_v11  ;;  %v1641_v9 = vmul.f32 %v4308_v43, %v6078_v17 }
 0x19a   :  { %v1797_v10 = vmul.f32 %v4308_v43, %v3833_v45  ;;  %v1953_v35 = vmul.f32 %v4308_v43, %v3841_v26  ;;  %v1186_v39 = vmul.f32 %v4312_v57, %v6075_v25  ;;  %v1342_v38 = vmul.f32 %v4312_v57, %v6076_v52 }
 0x19b   :  { %v1176_v8 = vadd.f32 %v1175_v27, %v1173_v60  ;;  %v1332_v61 = vadd.f32 %v1331_v59, %v1329_v6  ;;  %v1488_v42 = vadd.f32 %v1487_v53, %v1485_v58  ;;  %v1644_v23 = vadd.f32 %v1643_v0, %v1641_v9  ;;  %v4334_v58 = vpop.f32.mrf.mxu1 }
 0x19c   :  { %v1800_v22 = vadd.f32 %v1799_v24, %v1797_v10  ;;  %v1956_v63 = vadd.f32 %v1955_v2, %v1953_v35  ;;  %v1189_v46 = vadd.f32 %v1188_v33, %v1186_v39  ;;  %v1345_v14 = vadd.f32 %v1344_v47, %v1342_v38 }
 0x19d   :  { %v1177_v29 = vrot.slane %v1176_v8, 4  ;;  %v1333_v56 = vrot.slane %v1332_v61, 4  ;;  %v1489_v41 = vrot.slane %v1488_v42, 4  ;;  %v1645_v15 = vrot.slane %v1644_v23, 4 }
 0x19e   :  { %v1801_v43 = vrot.slane %v1800_v22, 4  ;;  %v1957_v31 = vrot.slane %v1956_v63, 4  ;;  %v1190_v25 = vrot.slane %v1189_v46, 4  ;;  %v1346_v7 = vrot.slane %v1345_v14, 4 }
 0x19f   :  { %v1178_v50 = vadd.f32 %v1177_v29, %v1176_v8  ;;  %v1334_v52 = vadd.f32 %v1333_v56, %v1332_v61  ;;  %v1490_v27 = vadd.f32 %v1489_v41, %v1488_v42  ;;  %v1646_v59 = vadd.f32 %v1645_v15, %v1644_v23  ;;  %v4336_v42 = vpop.f32.mrf.mxu1 }
 0x1a0   :  { %v1802_v53 = vadd.f32 %v1801_v43, %v1800_v22  ;;  %v1958_v0 = vadd.f32 %v1957_v31, %v1956_v63  ;;  %v1191_v24 = vadd.f32 %v1190_v25, %v1189_v46  ;;  %v1347_v2 = vadd.f32 %v1346_v7, %v1345_v14 }
 0x1a1   :  { %v1179_v33 = vrot.slane %v1178_v50, 2  ;;  %v1335_v47 = vrot.slane %v1334_v52, 2  ;;  %v1491_v60 = vrot.slane %v1490_v27, 2  ;;  %v1647_v6 = vrot.slane %v1646_v59, 2 }
 0x1a2   :  { %v1803_v9 = vrot.slane %v1802_v53, 2  ;;  %v1959_v10 = vrot.slane %v1958_v0, 2  ;;  %v1192_v35 = vrot.slane %v1191_v24, 2  ;;  %v1348_v39 = vrot.slane %v1347_v2, 2 }
 0x1a3   :  { %v1180_v38 = vadd.f32 %v1179_v33, %v1178_v50  ;;  %v1336_v18 = vadd.f32 %v1335_v47, %v1334_v52  ;;  %v1492_v29 = vadd.f32 %v1491_v60, %v1490_v27  ;;  %v1648_v56 = vadd.f32 %v1647_v6, %v1646_v59 }
 0x1a4   :  { %v1804_v41 = vadd.f32 %v1803_v9, %v1802_v53  ;;  %v1960_v15 = vadd.f32 %v1959_v10, %v1958_v0  ;;  %v1193_v43 = vadd.f32 %v1192_v35, %v1191_v24  ;;  %v1349_v31 = vadd.f32 %v1348_v39, %v1347_v2 }
 0x1a5   :  { %v1181_v25 = vrot.slane %v1180_v38, 1  ;;  %v1337_v7 = vrot.slane %v1336_v18, 1  ;;  %v1493_v8 = vrot.slane %v1492_v29, 1  ;;  %v1649_v61 = vrot.slane %v1648_v56, 1 }
 0x1a6   :  { %v1805_v23 = vrot.slane %v1804_v41, 1  ;;  %v1961_v22 = vrot.slane %v1960_v15, 1  ;;  %v1194_v63 = vrot.slane %v1193_v43, 1  ;;  %v1350_v46 = vrot.slane %v1349_v31, 1 }
 0x1a7   :  { %v4338_v14 = vadd.f32 %v1181_v25, %v1180_v38  ;;  %v4340_v50 = vadd.f32 %v1337_v7, %v1336_v18  ;;  %v4342_v52 = vadd.f32 %v1493_v8, %v1492_v29  ;;  %v4344_v27 = vadd.f32 %v1649_v61, %v1648_v56 }
 0x1a8   :  { %v4346_v59 = vadd.f32 %v1805_v23, %v1804_v41  ;;  %v4348_v53 = vadd.f32 %v1961_v22, %v1960_v15  ;;  %v4350_v0 = vadd.f32 %v1194_v63, %v1193_v43  ;;  %v4352_v24 = vadd.f32 %v1350_v46, %v1349_v31  ;;  %v6127_v22 = vld [vmem:[#allocation52_spill] sm:$0xff]  ;;  %v6128_v46 = vld [vmem:[#allocation53_spill] sm:$0xff] }
 0x1a9   :  { %v6115_v2 = vmax.f32 %v4174_v4, %v4234_v44  ;;  %v6117_v18 = vmax.f32 %v4180_v40, %v4236_v5  ;;  %v6119_v60 = vmax.f32 %v4186_v36, %v4256_v54  ;;  %v6121_v9 = vmax.f32 %v4192_v28, %v4258_v34  ;;  %v4378_v4 = vpop.f32.mrf.mxu1 }
 0x1aa   :  { %6113 = vst [vmem:[#allocation49_spill] sm:$0xff] %v4350_v0  ;;  %6114 = vst [vmem:[#allocation51_spill] sm:$0xff] %v4352_v24  ;;  %v6123_v40 = vmax.f32 %v4198_v51, %v4260_v3  ;;  %v6125_v36 = vmax.f32 %v4204_v32, %v4262_v20  ;;  %v1498_v38 = vmul.f32 %v4312_v57, %v6077_v11  ;;  %v6164_v51 = vld [vmem:[#allocation75_spill] sm:$0xff] }
 0x1ab   :  { %v4358_v33 = vmax.f32 %v6115_v2, %v4338_v14  ;;  %v4364_v47 = vmax.f32 %v6117_v18, %v4340_v50  ;;  %v4370_v6 = vmax.f32 %v6119_v60, %v4342_v52  ;;  %v4376_v10 = vmax.f32 %v6121_v9, %v4344_v27  ;;  %v4408_v25 = vpop.f32.mrf.mxu1 }
 0x1ac   :  { %v4384_v35 = vmax.f32 %v6123_v40, %v4346_v59  ;;  %v4390_v39 = vmax.f32 %v6125_v36, %v4348_v53  ;;  %v1654_v28 = vmul.f32 %v4312_v57, %v6078_v17  ;;  %v1810_v56 = vmul.f32 %v4312_v57, %v3833_v45  ;;  %v6131_v40 = vld [vmem:[#allocation78_spill] sm:$0xff]  ;;  %v6174_v17 = vld [vmem:[#allocation61_spill] sm:$0xff] }
 0x1ad   :  { %6116 = vst [vmem:[#allocation65_spill] sm:$0xff] %v4358_v33  ;;  %6118 = vst [vmem:[#allocation70_spill] sm:$0xff] %v4364_v47  ;;  %v1966_v32 = vmul.f32 %v4312_v57, %v3841_v26  ;;  %v1501_v41 = vadd.f32 %v4298_v12, %v1498_v38  ;;  %v1244_v63 = vsel %vm1060_vm3, %v6127_v22, %v4156_v48  ;;  %v6132_v48 = vld [vmem:[#allocation97_spill] sm:$0xff] }
 0x1ae   :  { %6120 = vst [vmem:[#allocation71_spill] sm:$0xff] %v4370_v6  ;;  %6122 = vst [vmem:[#allocation101_spill] sm:$0xff] %v4376_v10  ;;  %v1657_v15 = vadd.f32 %v4300_v30, %v1654_v28  ;;  %v1813_v43 = vadd.f32 %v4302_v19, %v1810_v56  ;;  %v1400_v12 = vsel %vm1060_vm3, %v6128_v46, %v4158_v37  ;;  %v4416_v30 = vpop.f32.mrf.mxu0  ;;  %v4427_v28 = vpop.f32.mrf.mxu1 }
 0x1af   :  { %6124 = vst [vmem:[#allocation104_spill] sm:$0xff] %v4384_v35  ;;  %6126 = vst [vmem:[#allocation105_spill] sm:$0xff] %v4390_v39  ;;  %v1969_v31 = vadd.f32 %v4304_v49, %v1966_v32  ;;  %v1502_v7 = vrot.slane %v1501_v41, 4  ;;  %v6130_v49 = vld [vmem:[#allocation68_spill] sm:$0xff]  ;;  %v1712_v36 = vsel %vm1060_vm3, %v6131_v40, %v4162_v62  ;;  %v1868_v38 = vsel %vm1060_vm3, %v6132_v48, %v4164_v21 }
 0x1b0   :  { %v1658_v8 = vrot.slane %v1657_v15, 4  ;;  %v1814_v61 = vrot.slane %v1813_v43, 4  ;;  %6129 = vst [vmem:[#allocation67_spill] sm:$0xff] %v4416_v30  ;;  %v1556_v18 = vsel %vm1060_vm3, %v6130_v49, %v4160_v13  ;;  %v2704_v37 = vpop.f32.mrf.mxu0  ;;  %v4434_v21 = vpop.f32.mrf.mxu1  ;;  %v1401_v46 = vsel %vm1062_vm4, %v1400_v12, %v4236_v5 }
 0x1b1   :  { %v1970_v23 = vrot.slane %v1969_v31, 4  ;;  %v1503_v19 = vadd.f32 %v1502_v7, %v1501_v41  ;;  %v6133_v41 = vld [vmem:[#allocation100_spill] sm:$0xff] }
 0x1b2   :  { %v1659_v2 = vadd.f32 %v1658_v8, %v1657_v15  ;;  %v1815_v60 = vadd.f32 %v1814_v61, %v1813_v43  ;;  %v2024_v15 = vsel %vm1060_vm3, %v6133_v41, %v4166_v1  ;;  %v1245_v61 = vsel %vm1062_vm4, %v1244_v63, %v4234_v44 }
 0x1b3   :  { %v1971_v9 = vadd.f32 %v1970_v23, %v1969_v31  ;;  %v1504_v56 = vrot.slane %v1503_v19, 2  ;;  %v1557_v1 = vsel %vm1062_vm4, %v1556_v18, %v4256_v54  ;;  %v1869_v44 = vsel %vm1062_vm4, %v1868_v38, %v4260_v3  ;;  %v4454_v54 = vpop.f32.mrf.mxu1  ;;  %v6162_v3 = vld [vmem:[#allocation25_spill] sm:$0xff] }
 0x1b4   :  { %v1660_v32 = vrot.slane %v1659_v2, 2  ;;  %v1816_v13 = vrot.slane %v1815_v60, 2  ;;  %v2025_v63 = vsel %vm1062_vm4, %v2024_v15, %v4262_v20  ;;  %v1246_v20 = vsel %vm1064_vm5, %v1245_v61, %v4338_v14 }
 0x1b5   :  { %v1972_v43 = vrot.slane %v1971_v9, 2  ;;  %v1505_v31 = vadd.f32 %v1504_v56, %v1503_v19  ;;  %v1713_v19 = vsel %vm1062_vm4, %v1712_v36, %v4258_v34  ;;  %v1402_v36 = vsel %vm1064_vm5, %v1401_v46, %v4340_v50  ;;  %v4480_v14 = vpop.f32.mrf.mxu1  ;;  %v6163_v34 = vld [vmem:[#allocation73_spill] sm:$0xff] }
 0x1b6   :  { %v1661_v7 = vadd.f32 %v1660_v32, %v1659_v2  ;;  %v1817_v8 = vadd.f32 %v1816_v13, %v1815_v60  ;;  %v1558_v48 = vsel %vm1064_vm5, %v1557_v1, %v4342_v52  ;;  %v1714_v38 = vsel %vm1064_vm5, %v1713_v19, %v4344_v27  ;;  %v6138_v32 = vld [vmem:[#allocation10_spill] sm:$0xff]  ;;  %6140 = vst [vmem:[#allocation97_spill] sm:$0xff] %v4480_v14  ;;  %v6153_v1 = vld [vmem:[#allocation7_spill] sm:$0xff]  ;;  %v6155_v19 = vld [vmem:[#allocation92_spill] sm:$0xff] }
 0x1b7   :  { %v1973_v62 = vadd.f32 %v1972_v43, %v1971_v9  ;;  %v1506_v23 = vrot.slane %v1505_v31, 1  ;;  %v1870_v37 = vsel %vm1064_vm5, %v1869_v44, %v4346_v59  ;;  %v2026_v56 = vsel %vm1064_vm5, %v2025_v63, %v4348_v53  ;;  %v6144_v59 = vld [vmem:[#allocation17_spill] sm:$0xff]  ;;  %v6146_v13 = vld [vmem:[#allocation54_spill] sm:$0xff] }
 0x1b8   :  { %v1662_v22 = vrot.slane %v1661_v7, 1  ;;  %v1818_v49 = vrot.slane %v1817_v8, 1  ;;  %v4478_v41 = vadd.f32 %v4322_v16, %v6138_v32  ;;  %v4484_v50 = vsel %vm1066_vm6, %v1246_v20, %v4350_v0  ;;  %v6145_v16 = vld [vmem:[#allocation19_spill] sm:$0xff]  ;;  %v6157_v20 = vld [vmem:[#allocation18_spill] sm:$0xff] }
 0x1b9   :  { %v1974_v40 = vrot.slane %v1973_v62, 1  ;;  %v4442_v2 = vadd.f32 %v1506_v23, %v1505_v31  ;;  %6141 = vst [vmem:[#allocation100_spill] sm:$0xff] %v4484_v50  ;;  %v4488_v52 = vsel %vm1066_vm6, %v1402_v36, %v4352_v24  ;;  %v6147_v31 = vld [vmem:[#allocation62_spill] sm:$0xff]  ;;  %v4518_v46 = vadd.f32 %v4332_v55, %v6138_v32  ;;  %v6159_v55 = vld [vmem:[#allocation99_spill] sm:$0xff] }
 0x1ba   :  { %v4444_v60 = vadd.f32 %v1662_v22, %v1661_v7  ;;  %v4450_v9 = vadd.f32 %v1818_v49, %v1817_v8  ;;  %6139 = vst [vmem:[#allocation78_spill] sm:$0xff] %v4478_v41  ;;  %6142 = vst [vmem:[#allocation10_spill] sm:$0xff] %v4488_v52  ;;  %v2054_v53 = vmul.f32 %v4478_v41, %v6144_v59  ;;  %v6148_v8 = vld [vmem:[#allocation89_spill] sm:$0xff] }
 0x1bb   :  { %6134 = vst [vmem:[#allocation72_spill] sm:$0xff] %v4442_v2  ;;  %v4452_v5 = vadd.f32 %v1974_v40, %v1973_v62  ;;  %v4492_v27 = vsel %vm1066_vm6, %v1558_v48, %v4442_v2  ;;  %v2067_v15 = vmul.f32 %v4478_v41, %v6145_v16  ;;  %v2080_v43 = vmul.f32 %v4478_v41, %v6146_v13  ;;  %v4524_v40 = vpop.f32.mrf.mxu1 }
 0x1bc   :  { %6135 = vst [vmem:[#allocation52_spill] sm:$0xff] %v4444_v60  ;;  %6136 = vst [vmem:[#allocation53_spill] sm:$0xff] %v4450_v9  ;;  %v2093_v7 = vmul.f32 %v4478_v41, %v6147_v31  ;;  %v2106_v62 = vmul.f32 %v4478_v41, %v6148_v8  ;;  %v4506_v61 = vsel %vm1066_vm6, %v1714_v38, %v4444_v60 }
 0x1bd   :  { %6137 = vst [vmem:[#allocation68_spill] sm:$0xff] %v4452_v5  ;;  %6143 = vst [vmem:[#allocation108_spill] sm:$0xff] %v4492_v27  ;;  %v4510_v23 = vsel %vm1066_vm6, %v1870_v37, %v4450_v9  ;;  %v4514_v22 = vsel %vm1066_vm6, %v2026_v56, %v4452_v5  ;;  %v4522_v49 = vadd.f32 %v4334_v58, %v6153_v1  ;;  %v4564_v52 = vpop.f32.mrf.mxu1 }
 0x1be   :  { %6149 = vst [vmem:[#allocation17_spill] sm:$0xff] %v4506_v61  ;;  %6150 = vst [vmem:[#allocation19_spill] sm:$0xff] %v4510_v23  ;;  %v2119_v44 = vmul.f32 %v4478_v41, %v6155_v19  ;;  %v4530_v63 = vadd.f32 %v4336_v42, %v6153_v1  ;;  %v4534_v36 = vadd.f32 %v4378_v4, %v6157_v20  ;;  %v6166_v61 = vld [vmem:[#allocation59_spill] sm:$0xff]  ;;  %v6190_v41 = vld [vmem:[#allocation58_spill] sm:$0xff] }
 0x1bf   :  { %6151 = vst [vmem:[#allocation54_spill] sm:$0xff] %v4514_v22  ;;  %6152 = vst [vmem:[#allocation62_spill] sm:$0xff] %v4518_v46  ;;  %v4538_v48 = vadd.f32 %v6159_v55, %v6138_v32  ;;  %v2210_v58 = vmul.f32 %v4518_v46, %v6144_v59  ;;  %v2223_v38 = vmul.f32 %v4518_v46, %v6145_v16  ;;  %v6161_v32 = vld [vmem:[#allocation22_spill] sm:$0xff]  ;;  %v6165_v22 = vld [vmem:[#allocation57_spill] sm:$0xff] }
 0x1c0   :  { %6154 = vst [vmem:[#allocation89_spill] sm:$0xff] %v4522_v49  ;;  %6156 = vst [vmem:[#allocation7_spill] sm:$0xff] %v4530_v63  ;;  %v2236_v37 = vmul.f32 %v4518_v46, %v6146_v13  ;;  %v2249_v42 = vmul.f32 %v4518_v46, %v6147_v31  ;;  %v2262_v4 = vmul.f32 %v4518_v46, %v6148_v8 }
 0x1c1   :  { %6158 = vst [vmem:[#allocation92_spill] sm:$0xff] %v4534_v36  ;;  %6160 = vst [vmem:[#allocation18_spill] sm:$0xff] %v4538_v48  ;;  %v2275_v56 = vmul.f32 %v4518_v46, %v6155_v19  ;;  %v2055_v55 = vmul.f32 %v4522_v49, %v6161_v32  ;;  %v2068_v18 = vmul.f32 %v4522_v49, %v6162_v3  ;;  %v6175_v46 = vld [vmem:[#allocation102_spill] sm:$0xff] }
 0x1c2   :  { %v2081_v12 = vmul.f32 %v4522_v49, %v6163_v34  ;;  %v2094_v29 = vmul.f32 %v4522_v49, %v6164_v51  ;;  %v2107_v23 = vmul.f32 %v4522_v49, %v6165_v22  ;;  %v2120_v27 = vmul.f32 %v4522_v49, %v6166_v61  ;;  %6167 = vst [vmem:[#allocation99_spill] sm:$0xff] %v4564_v52 }
 0x1c3   :  { %v2058_v50 = vadd.f32 %v2055_v55, %v2054_v53  ;;  %v2071_v5 = vadd.f32 %v2068_v18, %v2067_v15  ;;  %v2211_v39 = vmul.f32 %v4530_v63, %v6161_v32  ;;  %v2224_v9 = vmul.f32 %v4530_v63, %v6162_v3  ;;  %v4574_v53 = vpop.f32.mrf.mxu0 }
 0x1c4   :  { %v2084_v35 = vadd.f32 %v2081_v12, %v2080_v43  ;;  %v2097_v60 = vadd.f32 %v2094_v29, %v2093_v7  ;;  %v2110_v10 = vadd.f32 %v2107_v23, %v2106_v62  ;;  %v2123_v2 = vadd.f32 %v2120_v27, %v2119_v44  ;;  %6168 = vst [vmem:[#allocation22_spill] sm:$0xff] %v4574_v53  ;;  %v6169_v12 = vld [vmem:[#allocation31_spill] sm:$0xff]  ;;  %v6170_v27 = vld [vmem:[#allocation33_spill] sm:$0xff]  ;;  %v6172_v62 = vld [vmem:[#allocation88_spill] sm:$0xff] }
 0x1c5   :  { %v2214_v6 = vadd.f32 %v2211_v39, %v2210_v58  ;;  %v2227_v24 = vadd.f32 %v2224_v9, %v2223_v38  ;;  %v2237_v47 = vmul.f32 %v4530_v63, %v6163_v34  ;;  %v2250_v0 = vmul.f32 %v4530_v63, %v6164_v51  ;;  %v4584_v9 = vpop.f32.mrf.mxu1  ;;  %v6173_v44 = vld [vmem:[#allocation91_spill] sm:$0xff]  ;;  %v2707_v38 = vpop.f32.mrf.mxu0 }
 0x1c6   :  { %v2263_v18 = vmul.f32 %v4530_v63, %v6165_v22  ;;  %v2276_v15 = vmul.f32 %v4530_v63, %v6166_v61  ;;  %v2056_v29 = vmul.f32 %v4534_v36, %v6169_v12  ;;  %v2069_v39 = vmul.f32 %v4534_v36, %v6170_v27  ;;  %6171 = vst [vmem:[#allocation25_spill] sm:$0xff] %v4584_v9 }
 0x1c7   :  { %v2240_v43 = vadd.f32 %v2237_v47, %v2236_v37  ;;  %v2253_v7 = vadd.f32 %v2250_v0, %v2249_v42  ;;  %v2082_v23 = vmul.f32 %v4534_v36, %v6172_v62  ;;  %v2095_v58 = vmul.f32 %v4534_v36, %v6173_v44  ;;  %v6176_v0 = vld [vmem:[#allocation5_spill] sm:$0xff]  ;;  %v6177_v37 = vld [vmem:[#allocation86_spill] sm:$0xff]  ;;  %v4598_v63 = vpop.f32.mrf.mxu1 }
 0x1c8   :  { %v2266_v55 = vadd.f32 %v2263_v18, %v2262_v4  ;;  %v2279_v53 = vadd.f32 %v2276_v15, %v2275_v56  ;;  %v2059_v33 = vadd.f32 %v2058_v50, %v2056_v29  ;;  %v2072_v30 = vadd.f32 %v2071_v5, %v2069_v39  ;;  %6178 = vst [vmem:[#allocation73_spill] sm:$0xff] %v4598_v63  ;;  %v6187_v29 = vld [vmem:[#allocation36_spill] sm:$0xff] }
 0x1c9   :  { %v2085_v26 = vadd.f32 %v2084_v35, %v2082_v23  ;;  %v2098_v45 = vadd.f32 %v2097_v60, %v2095_v58  ;;  %v2108_v11 = vmul.f32 %v4534_v36, %v6174_v17  ;;  %v2121_v47 = vmul.f32 %v4534_v36, %v6175_v46  ;;  %v4604_v60 = vpop.f32.mrf.mxu0  ;;  %v4642_v15 = vpop.f32.mrf.mxu1  ;;  %v6188_v23 = vld [vmem:[#allocation38_spill] sm:$0xff]  ;;  %v6189_v63 = vld [vmem:[#allocation56_spill] sm:$0xff] }
 0x1ca   :  { %v4596_v42 = vadd.f32 %v6177_v37, %v6176_v0  ;;  %v2366_v50 = vmul.f32 %v4538_v48, %v6144_v59  ;;  %v2379_v35 = vmul.f32 %v4538_v48, %v6145_v16  ;;  %6179 = vst [vmem:[#allocation75_spill] sm:$0xff] %v4604_v60  ;;  %v2392_v5 = vmul.f32 %v4538_v48, %v6146_v13  ;;  %v6183_v16 = vld [vmem:[#allocation103_spill] sm:$0xff] }
 0x1cb   :  { %v2111_v49 = vadd.f32 %v2110_v10, %v2108_v11  ;;  %v2124_v38 = vadd.f32 %v2123_v2, %v2121_v47  ;;  %v2405_v4 = vmul.f32 %v4538_v48, %v6147_v31  ;;  %v4612_v56 = vadd.f32 %v4408_v25, %v6157_v20  ;;  %v6181_v11 = vld [vmem:[#allocation28_spill] sm:$0xff]  ;;  %v2708_v31 = vpop.f32.mrf.mxu0  ;;  %6186 = vst [vmem:[#allocation88_spill] sm:$0xff] %v4642_v15 }
 0x1cc   :  { %v4616_v10 = vadd.f32 %v4427_v28, %v6181_v11  ;;  %v4620_v2 = vmul.f32 %v4538_v48, %v6148_v8  ;;  %v4624_v59 = vmul.f32 %v4538_v48, %v6155_v19  ;;  %v4628_v13 = vadd.f32 %v6183_v16, %v6153_v1 }
 0x1cd   :  { %6180 = vst [vmem:[#allocation57_spill] sm:$0xff] %v4612_v56  ;;  %v4632_v25 = vadd.f32 %v4434_v21, %v6181_v11  ;;  %v2212_v28 = vmul.f32 %v4612_v56, %v6169_v12  ;;  %v2225_v8 = vmul.f32 %v4612_v56, %v6170_v27  ;;  %v2238_v18 = vmul.f32 %v4612_v56, %v6172_v62 }
 0x1ce   :  { %6182 = vst [vmem:[#allocation59_spill] sm:$0xff] %v4616_v10  ;;  %6184 = vst [vmem:[#allocation31_spill] sm:$0xff] %v4628_v13  ;;  %v2251_v19 = vmul.f32 %v4612_v56, %v6173_v44  ;;  %v2264_v1 = vmul.f32 %v4612_v56, %v6174_v17  ;;  %v2277_v21 = vmul.f32 %v4612_v56, %v6175_v46 }
 0x1cf   :  { %6185 = vst [vmem:[#allocation33_spill] sm:$0xff] %v4632_v25  ;;  %v2057_v39 = vmul.f32 %v4616_v10, %v6187_v29  ;;  %v2070_v58 = vmul.f32 %v4616_v10, %v6188_v23  ;;  %v4652_v47 = vadd.f32 %v2214_v6, %v2212_v28  ;;  %v4654_v37 = vadd.f32 %v2227_v24, %v2225_v8  ;;  %v6191_v6 = vld [vmem:[#allocation50_spill] sm:$0xff] }
 0x1d0   :  { %v4656_v16 = vadd.f32 %v2240_v43, %v2238_v18  ;;  %v4658_v31 = vadd.f32 %v2253_v7, %v2251_v19  ;;  %v4660_v60 = vadd.f32 %v2266_v55, %v2264_v1  ;;  %v4662_v15 = vadd.f32 %v2279_v53, %v2277_v21  ;;  %v4672_v7 = vpop.f32.mrf.mxu1 }
 0x1d1   :  { %v2060_v36 = vadd.f32 %v2059_v33, %v2057_v39  ;;  %v2073_v56 = vadd.f32 %v2072_v30, %v2070_v58  ;;  %v2083_v48 = vmul.f32 %v4616_v10, %v6189_v63  ;;  %v2096_v9 = vmul.f32 %v4616_v10, %v6190_v41  ;;  %6192 = vst [vmem:[#allocation91_spill] sm:$0xff] %v4672_v7 }
 0x1d2   :  { %v2109_v24 = vmul.f32 %v4616_v10, %v6191_v6  ;;  %v2122_v43 = vmul.f32 %v4616_v10, %v4312_v57  ;;  %v2367_v33 = vmul.f32 %v4628_v13, %v6161_v32  ;;  %v2380_v30 = vmul.f32 %v4628_v13, %v6162_v3  ;;  %v4682_v14 = vpop.f32.mrf.mxu1 }
 0x1d3   :  { %v2061_v55 = vrot.slane %v2060_v36, 4  ;;  %v2074_v28 = vrot.slane %v2073_v56, 4  ;;  %v2086_v53 = vadd.f32 %v2085_v26, %v2083_v48  ;;  %v2099_v8 = vadd.f32 %v2098_v45, %v2096_v9  ;;  %6193 = vst [vmem:[#allocation61_spill] sm:$0xff] %v4682_v14 }
 0x1d4   :  { %v2112_v18 = vadd.f32 %v2111_v49, %v2109_v24  ;;  %v2125_v19 = vadd.f32 %v2124_v38, %v2122_v43  ;;  %v4678_v39 = vadd.f32 %v2367_v33, %v2366_v50  ;;  %v4680_v58 = vadd.f32 %v2380_v30, %v2379_v35 }
 0x1d5   :  { %v2062_v1 = vadd.f32 %v2061_v55, %v2060_v36  ;;  %v2075_v21 = vadd.f32 %v2074_v28, %v2073_v56  ;;  %v2087_v10 = vrot.slane %v2086_v53, 4  ;;  %v2100_v7 = vrot.slane %v2099_v8, 4  ;;  %v4692_v28 = vpop.f32.mrf.mxu1 }
 0x1d6   :  { %v2113_v52 = vrot.slane %v2112_v18, 4  ;;  %v2126_v11 = vrot.slane %v2125_v19, 4  ;;  %v2393_v26 = vmul.f32 %v4628_v13, %v6163_v34  ;;  %v2406_v45 = vmul.f32 %v4628_v13, %v6164_v51  ;;  %6194 = vst [vmem:[#allocation86_spill] sm:$0xff] %v4692_v28 }
 0x1d7   :  { %v2063_v32 = vrot.slane %v2062_v1, 2  ;;  %v2076_v46 = vrot.slane %v2075_v21, 2  ;;  %v2088_v3 = vadd.f32 %v2087_v10, %v2086_v53  ;;  %v2101_v49 = vadd.f32 %v2100_v7, %v2099_v8 }
 0x1d8   :  { %v2114_v36 = vadd.f32 %v2113_v52, %v2112_v18  ;;  %v2127_v48 = vadd.f32 %v2126_v11, %v2125_v19  ;;  %v4688_v50 = vadd.f32 %v2393_v26, %v2392_v5  ;;  %v4690_v35 = vadd.f32 %v2406_v45, %v2405_v4 }
 0x1d9   :  { %v2064_v9 = vadd.f32 %v2063_v32, %v2062_v1  ;;  %v2077_v38 = vadd.f32 %v2076_v46, %v2075_v21  ;;  %v2089_v56 = vrot.slane %v2088_v3, 2  ;;  %v2102_v24 = vrot.slane %v2101_v49, 2 }
 0x1da   :  { %v2115_v43 = vrot.slane %v2114_v36, 2  ;;  %v2128_v55 = vrot.slane %v2127_v48, 2  ;;  %v2419_v51 = vmul.f32 %v4628_v13, %v6165_v22  ;;  %v2432_v52 = vmul.f32 %v4628_v13, %v6166_v61  ;;  %v4704_v22 = vpop.f32.mrf.mxu1 }
 0x1db   :  { %v2065_v34 = vrot.slane %v2064_v9, 1  ;;  %v2078_v33 = vrot.slane %v2077_v38, 1  ;;  %v2090_v11 = vadd.f32 %v2089_v56, %v2088_v3  ;;  %v2103_v46 = vadd.f32 %v2102_v24, %v2101_v49  ;;  %6195 = vst [vmem:[#allocation103_spill] sm:$0xff] %v4704_v22 }
 0x1dc   :  { %v2116_v5 = vadd.f32 %v2115_v43, %v2114_v36  ;;  %v2129_v10 = vadd.f32 %v2128_v55, %v2127_v48  ;;  %v4699_v30 = vadd.f32 %v2419_v51, %v4620_v2  ;;  %v4702_v53 = vadd.f32 %v2432_v52, %v4624_v59  ;;  %v4724_v55 = vpop.f32.mrf.mxu1 }
 0x1dd   :  { %v2066_v4 = vadd.f32 %v2065_v34, %v2064_v9  ;;  %v2079_v7 = vadd.f32 %v2078_v33, %v2077_v38  ;;  %v2091_v8 = vrot.slane %v2090_v11, 1  ;;  %v2104_v18 = vrot.slane %v2103_v46, 1  ;;  %6197 = vst [vmem:[#allocation38_spill] sm:$0xff] %v4724_v55 }
 0x1de   :  { %v2117_v19 = vrot.slane %v2116_v5, 1  ;;  %v2130_v1 = vrot.slane %v2129_v10, 1  ;;  %v2213_v32 = vmul.f32 %v4632_v25, %v6187_v29  ;;  %v2226_v26 = vmul.f32 %v4632_v25, %v6188_v23 }
 0x1df   :  { %v2171_v21 = vmax.f32 %v2066_v4, %v2079_v7  ;;  %v2179_v61 = vsel %vm1058_vm2, %v2066_v4, %v2079_v7  ;;  %v2092_v2 = vadd.f32 %v2091_v8, %v2090_v11  ;;  %v2105_v45 = vadd.f32 %v2104_v18, %v2103_v46 }
 0x1e0   :  { %v2118_v3 = vadd.f32 %v2117_v19, %v2116_v5  ;;  %v4711_v59 = vadd.f32 %v2130_v1, %v2129_v10  ;;  %v2216_v49 = vadd.f32 %v4652_v47, %v2213_v32  ;;  %v2229_v36 = vadd.f32 %v4654_v37, %v2226_v26  ;;  %v4731_v5 = vpop.f32.mrf.mxu1  ;;  %v4733_v10 = vpop.f32.mrf.mxu0 }
 0x1e1   :  { %v2239_v48 = vmul.f32 %v4632_v25, %v6189_v63  ;;  %v2252_v9 = vmul.f32 %v4632_v25, %v6190_v41  ;;  %v2172_v38 = vmax.f32 %v2171_v21, %v2092_v2  ;;  %v2180_v56 = vsel %vm1060_vm3, %v2179_v61, %v2092_v2  ;;  %6198 = vst [vmem:[#allocation56_spill] sm:$0xff] %v4731_v5 }
 0x1e2   :  { %6196 = vst [vmem:[#allocation36_spill] sm:$0xff] %v4711_v59  ;;  %v2265_v24 = vmul.f32 %v4632_v25, %v6191_v6  ;;  %v2278_v43 = vmul.f32 %v4632_v25, %v4312_v57  ;;  %v2181_v47 = vsel %vm1062_vm4, %v2180_v56, %v2105_v45  ;;  %v2217_v37 = vrot.slane %v2216_v49, 4  ;;  %6199 = vst [vmem:[#allocation58_spill] sm:$0xff] %v4733_v10 }
 0x1e3   :  { %v2230_v34 = vrot.slane %v2229_v36, 4  ;;  %v2242_v33 = vadd.f32 %v4656_v16, %v2239_v48  ;;  %v2173_v51 = vmax.f32 %v2172_v38, %v2105_v45  ;;  %v2182_v52 = vsel %vm1064_vm5, %v2181_v47, %v2118_v3 }
 0x1e4   :  { %v2255_v11 = vadd.f32 %v4658_v31, %v2252_v9  ;;  %v2268_v46 = vadd.f32 %v4660_v60, %v2265_v24  ;;  %v4737_v4 = vsel %vm1066_vm6, %v2182_v52, %v4711_v59  ;;  %v2218_v7 = vadd.f32 %v2217_v37, %v2216_v49  ;;  %v4742_v31 = vpop.f32.mrf.mxu1  ;;  %v2711_v60 = vpop.f32.mrf.mxu0  ;;  %v6206_v52 = vld [vmem:[#allocation24_spill] sm:$0xff] }
 0x1e5   :  { %6200 = vst [vmem:[#allocation50_spill] sm:$0xff] %v4737_v4  ;;  %v2231_v8 = vadd.f32 %v2230_v34, %v2229_v36  ;;  %v2243_v18 = vrot.slane %v2242_v33, 4  ;;  %v4739_v19 = vmax.f32 %v2173_v51, %v2118_v3  ;;  %v2281_v21 = vadd.f32 %v4662_v15, %v2278_v43  ;;  %6202 = vst [vmem:[#allocation110_spill] sm:$0xff] %v4742_v31 }
 0x1e6   :  { %v2256_v16 = vrot.slane %v2255_v11, 4  ;;  %v2269_v1 = vrot.slane %v2268_v46, 4  ;;  %v1041_v61 = vrot.slane %v4596_v42, 6  ;;  %v2219_v32 = vrot.slane %v2218_v7, 2  ;;  %v4747_v3 = vpop.f32.mrf.mxu1  ;;  %v4749_v9 = vpop.f32.mrf.mxu0 }
 0x1e7   :  { %6201 = vst [vmem:[#allocation109_spill] sm:$0xff] %v4739_v19  ;;  %v2232_v26 = vrot.slane %v2231_v8, 2  ;;  %v2244_v2 = vadd.f32 %v2243_v18, %v2242_v33  ;;  %v2282_v48 = vrot.slane %v2281_v21, 4  ;;  %6203 = vst [vmem:[#allocation111_spill] sm:$0xff] %v4747_v3  ;;  %v6234_v3 = vld [vmem:[#allocation47_spill] sm:$0xff] }
 0x1e8   :  { %v2257_v49 = vadd.f32 %v2256_v16, %v2255_v11  ;;  %v2270_v36 = vadd.f32 %v2269_v1, %v2268_v46  ;;  %6204 = vst [vmem:[#allocation112_spill] sm:$0xff] %v4749_v9  ;;  %v2220_v38 = vadd.f32 %v2219_v32, %v2218_v7  ;;  %v4751_v42 = vpop.f32.mrf.mxu1  ;;  %v2712_v37 = vpop.f32.mrf.mxu0  ;;  %v4755_v11 = vsel %vm1060_vm3, %v6206_v52, %v1041_v61  ;;  %v6209_v32 = vld [vmem:[#allocation106_spill] sm:$0xff]  ;;  %v6232_v9 = vld [vmem:[#allocation39_spill] sm:$0xff] }
 0x1e9   :  { %v2233_v15 = vadd.f32 %v2232_v26, %v2231_v8  ;;  %v2245_v56 = vrot.slane %v2244_v2, 2  ;;  %v2283_v47 = vadd.f32 %v2282_v48, %v2281_v21  ;;  %6205 = vst [vmem:[#allocation113_spill] sm:$0xff] %v4751_v42  ;;  %v4763_v26 = vadd.f32 %v6209_v32, %v6157_v20  ;;  %v6214_v32 = vld [vmem:[#allocation14_spill] sm:$0xff] }
 0x1ea   :  { %v2258_v24 = vrot.slane %v2257_v49, 2  ;;  %v2271_v43 = vrot.slane %v2270_v36, 2  ;;  %v2221_v34 = vrot.slane %v2220_v38, 1  ;;  %v4757_v1 = vpop.f32.mrf.mxu1  ;;  %v4759_v7 = vpop.f32.mrf.mxu0 }
 0x1eb   :  { %v2234_v33 = vrot.slane %v2233_v15, 1  ;;  %v2246_v51 = vadd.f32 %v2245_v56, %v2244_v2  ;;  %v2284_v16 = vrot.slane %v2283_v47, 2  ;;  %6207 = vst [vmem:[#allocation24_spill] sm:$0xff] %v4757_v1  ;;  %6208 = vst [vmem:[#allocation114_spill] sm:$0xff] %v4759_v7  ;;  %v6211_v2 = vld [vmem:[#allocation90_spill] sm:$0xff] }
 0x1ec   :  { %v2259_v46 = vadd.f32 %v2258_v24, %v2257_v49  ;;  %v2272_v18 = vadd.f32 %v2271_v43, %v2270_v36  ;;  %v2222_v8 = vadd.f32 %v2221_v34, %v2220_v38  ;;  %6210 = vst [vmem:[#allocation106_spill] sm:$0xff] %v4763_v26  ;;  %v4767_v48 = vadd.f32 %v6211_v2, %v6176_v0  ;;  %v4769_v36 = vpop.f32.mrf.mxu1  ;;  %v2715_v24 = vpop.f32.mrf.mxu0 }
 0x1ed   :  { %v2235_v60 = vadd.f32 %v2234_v33, %v2233_v15  ;;  %v2247_v21 = vrot.slane %v2246_v51, 1  ;;  %v2285_v49 = vadd.f32 %v2284_v16, %v2283_v47  ;;  %6212 = vst [vmem:[#allocation90_spill] sm:$0xff] %v4769_v36  ;;  %v6213_v15 = vld [vmem:[#allocation12_spill] sm:$0xff]  ;;  %v4778_v2 = vadd.f32 %v4524_v40, %v6214_v32  ;;  %v6236_v36 = vld [vmem:[#allocation107_spill] sm:$0xff] }
 0x1ee   :  { %v2260_v61 = vrot.slane %v2259_v46, 1  ;;  %v2273_v56 = vrot.slane %v2272_v18, 1  ;;  %v4774_v34 = vadd.f32 %v4454_v54, %v6213_v15  ;;  %v946_v45 = vpop.f32.mrf.mxu1  ;;  %v4780_v47 = vpop.f32.mrf.mxu0  ;;  %v2381_v54 = vmul.f32 %v4763_v26, %v6170_v27 }
 0x1ef   :  { %v2248_v43 = vadd.f32 %v2247_v21, %v2246_v51  ;;  %v2327_v37 = vmax.f32 %v2222_v8, %v2235_v60  ;;  %v2335_v38 = vsel %vm1058_vm2, %v2222_v8, %v2235_v60  ;;  %v2286_v52 = vrot.slane %v2285_v49, 1  ;;  %6215 = vst [vmem:[#allocation12_spill] sm:$0xff] %v4780_v47  ;;  %v6231_v47 = vld [vmem:[#allocation37_spill] sm:$0xff] }
 0x1f0   :  { %v2261_v20 = vadd.f32 %v2260_v61, %v2259_v46  ;;  %v2274_v33 = vadd.f32 %v2273_v56, %v2272_v18  ;;  %v2368_v8 = vmul.f32 %v4763_v26, %v6169_v12  ;;  %v2394_v40 = vmul.f32 %v4763_v26, %v6172_v62  ;;  %v947_v18 = vpop.f32.mrf.mxu1  ;;  %v2716_v21 = vpop.f32.mrf.mxu0 }
 0x1f1   :  { %v2328_v16 = vmax.f32 %v2327_v37, %v2248_v43  ;;  %v2336_v51 = vsel %vm1060_vm3, %v2335_v38, %v2248_v43  ;;  %v4787_v60 = vadd.f32 %v2286_v52, %v2285_v49  ;;  %v2407_v45 = vmul.f32 %v4763_v26, %v6173_v44  ;;  %v6219_v38 = vld [vmem:[#allocation96_spill] sm:$0xff] }
 0x1f2   :  { %v2337_v46 = vsel %vm1062_vm4, %v2336_v51, %v2261_v20  ;;  %v2371_v12 = vadd.f32 %v4678_v39, %v2368_v8  ;;  %v2384_v24 = vadd.f32 %v4680_v58, %v2381_v54  ;;  %v2397_v49 = vadd.f32 %v4688_v50, %v2394_v40  ;;  %v4805_v43 = vpop.f32.mrf.mxu0  ;;  %v6224_v8 = vld [vmem:[#allocation97_spill] sm:$0xff] }
 0x1f3   :  { %6216 = vst [vmem:[#allocation14_spill] sm:$0xff] %v4787_v60  ;;  %v2329_v61 = vmax.f32 %v2328_v16, %v2261_v20  ;;  %v2338_v56 = vsel %vm1064_vm5, %v2337_v46, %v2274_v33  ;;  %v2410_v62 = vadd.f32 %v4690_v35, %v2407_v45  ;;  %v2420_v44 = vmul.f32 %v4763_v26, %v6174_v17  ;;  %v6221_v20 = vld [vmem:[#allocation102_spill] sm:$0xff]  ;;  %v6222_v16 = vld [vmem:[#allocation15_spill] sm:$0xff]  ;;  %v6223_v35 = vld [vmem:[#allocation16_spill] sm:$0xff] }
 0x1f4   :  { %v4799_v27 = vsel %vm1066_vm6, %v2338_v56, %v4787_v60  ;;  %6218 = vst [vmem:[#allocation116_spill] sm:$0xff] %v4805_v43  ;;  %v1044_v37 = vrot.slane %v4767_v48, 5  ;;  %v4810_v39 = vadd.f32 %v6219_v38, %v6176_v0  ;;  %v2433_v52 = vmul.f32 %v4763_v26, %v6221_v20  ;;  %v2719_v54 = vpop.f32.mrf.mxu0  ;;  %v6225_v46 = vld [vmem:[#allocation32_spill] sm:$0xff]  ;;  %v6226_v45 = vld [vmem:[#allocation34_spill] sm:$0xff] }
 0x1f5   :  { %6217 = vst [vmem:[#allocation115_spill] sm:$0xff] %v4799_v27  ;;  %v4812_v58 = vmax.f32 %v2329_v61, %v2274_v33  ;;  %v1196_v50 = vmul.f32 %v4774_v34, %v6222_v16  ;;  %v1352_v51 = vmul.f32 %v4774_v34, %v6223_v35  ;;  %v2423_v17 = vadd.f32 %v4699_v30, %v2420_v44  ;;  %v6227_v61 = vld [vmem:[#allocation41_spill] sm:$0xff]  ;;  %v6228_v30 = vld [vmem:[#allocation43_spill] sm:$0xff]  ;;  %v6229_v38 = vld [vmem:[#allocation20_spill] sm:$0xff] }
 0x1f6   :  { %v4823_v48 = vadd.f32 %v6224_v8, %v6213_v15  ;;  %v1508_v40 = vmul.f32 %v4774_v34, %v6225_v46  ;;  %v1664_v18 = vmul.f32 %v4774_v34, %v6226_v45  ;;  %v2436_v21 = vadd.f32 %v4702_v53, %v2433_v52  ;;  %v6230_v8 = vld [vmem:[#allocation21_spill] sm:$0xff]  ;;  %v1034_v33 = vpop.f32.mrf.mxu0  ;;  %v6235_v43 = vld [vmem:[#allocation28_spill] sm:$0xff] }
 0x1f7   :  { %6220 = vst [vmem:[#allocation96_spill] sm:$0xff] %v4812_v58  ;;  %v1820_v56 = vmul.f32 %v4774_v34, %v6227_v61  ;;  %v1976_v44 = vmul.f32 %v4774_v34, %v6228_v30  ;;  %v1197_v20 = vmul.f32 %v4778_v2, %v6229_v38  ;;  %v1353_v54 = vmul.f32 %v4778_v2, %v6230_v8  ;;  %v6233_v53 = vld [vmem:[#allocation45_spill] sm:$0xff] }
 0x1f8   :  { %v1509_v7 = vmul.f32 %v4778_v2, %v6231_v47  ;;  %v1665_v42 = vmul.f32 %v4778_v2, %v6232_v9  ;;  %v1821_v52 = vmul.f32 %v4778_v2, %v6233_v53  ;;  %v1977_v31 = vmul.f32 %v4778_v2, %v6234_v3  ;;  %v2720_v55 = vpop.f32.mrf.mxu0 }
 0x1f9   :  { %v4848_v10 = vadd.f32 %v1197_v20, %v1196_v50  ;;  %v4850_v5 = vadd.f32 %v1353_v54, %v1352_v51  ;;  %v1063_v27 = vsel %vm1062_vm4, %v4755_v11, %v1044_v37  ;;  %v1047_v4 = vrot.slane %v4810_v39, 4  ;;  %v6238_v51 = vld [vmem:[#allocation98_spill] sm:$0xff] }
 0x1fa   :  { %v4852_v22 = vadd.f32 %v1509_v7, %v1508_v40  ;;  %v4854_v33 = vadd.f32 %v1665_v42, %v1664_v18  ;;  %v4856_v28 = vadd.f32 %v1821_v52, %v1820_v56  ;;  %v4858_v14 = vadd.f32 %v1977_v31, %v1976_v44  ;;  %v6240_v7 = vld [vmem:[#allocation99_spill] sm:$0xff] }
 0x1fb   :  { %v4865_v50 = vadd.f32 %v6236_v36, %v6235_v43  ;;  %v4869_v55 = vadd.f32 %v6238_v51, %v6176_v0  ;;  %v1209_v42 = vmul.f32 %v4823_v48, %v6222_v16  ;;  %v1365_v31 = vmul.f32 %v4823_v48, %v6223_v35 }
 0x1fc   :  { %v4877_v40 = vadd.f32 %v6240_v7, %v6214_v32  ;;  %v1521_v11 = vmul.f32 %v4823_v48, %v6225_v46  ;;  %v1677_v39 = vmul.f32 %v4823_v48, %v6226_v45  ;;  %v1989_v58 = vmul.f32 %v4823_v48, %v6228_v30 }
 0x1fd   :  { %6237 = vst [vmem:[#allocation102_spill] sm:$0xff] %v4865_v50  ;;  %6239 = vst [vmem:[#allocation15_spill] sm:$0xff] %v4869_v55  ;;  %v2369_v36 = vmul.f32 %v4865_v50, %v6187_v29  ;;  %v2382_v43 = vmul.f32 %v4865_v50, %v6188_v23  ;;  %v2395_v37 = vmul.f32 %v4865_v50, %v6189_v63 }
 0x1fe   :  { %v2408_v18 = vmul.f32 %v4865_v50, %v6190_v41  ;;  %v2421_v56 = vmul.f32 %v4865_v50, %v6191_v6  ;;  %v1210_v44 = vmul.f32 %v4877_v40, %v6229_v38  ;;  %v1366_v23 = vmul.f32 %v4877_v40, %v6230_v8 }
 0x1ff   :  { %v2372_v20 = vadd.f32 %v2371_v12, %v2369_v36  ;;  %v2385_v29 = vadd.f32 %v2384_v24, %v2382_v43  ;;  %v2398_v54 = vadd.f32 %v2397_v49, %v2395_v37  ;;  %v2434_v51 = vmul.f32 %v4865_v50, %v4312_v57  ;;  %v6252_v50 = vld [vmem:[#allocation42_spill] sm:$0xff] }
 0x200   :  { %v2411_v52 = vadd.f32 %v2410_v62, %v2408_v18  ;;  %v2424_v63 = vadd.f32 %v2423_v17, %v2421_v56  ;;  %v4899_v7 = vadd.f32 %v1210_v44, %v1209_v42  ;;  %v4901_v6 = vadd.f32 %v1366_v23, %v1365_v31 }
 0x201   :  { %v2373_v41 = vrot.slane %v2372_v20, 4  ;;  %v2386_v1 = vrot.slane %v2385_v29, 4  ;;  %v2399_v0 = vrot.slane %v2398_v54, 4  ;;  %v1833_v12 = vmul.f32 %v4823_v48, %v6227_v61 }
 0x202   :  { %v2412_v24 = vrot.slane %v2411_v52, 4  ;;  %v2425_v49 = vrot.slane %v2424_v63, 4  ;;  %v1522_v36 = vmul.f32 %v4877_v40, %v6231_v47  ;;  %v1678_v57 = vmul.f32 %v4877_v40, %v6232_v9  ;;  %v6257_v47 = vld [vmem:[#allocation18_spill] sm:$0xff] }
 0x203   :  { %v2374_v62 = vadd.f32 %v2373_v41, %v2372_v20  ;;  %v2387_v17 = vadd.f32 %v2386_v1, %v2385_v29  ;;  %v2400_v43 = vadd.f32 %v2399_v0, %v2398_v54  ;;  %v2437_v18 = vadd.f32 %v2436_v21, %v2434_v51 }
 0x204   :  { %v2413_v42 = vadd.f32 %v2412_v24, %v2411_v52  ;;  %v2426_v37 = vadd.f32 %v2425_v49, %v2424_v63  ;;  %v4909_v56 = vadd.f32 %v1522_v36, %v1521_v11  ;;  %v4911_v60 = vadd.f32 %v1678_v57, %v1677_v39 }
 0x205   :  { %v2375_v31 = vrot.slane %v2374_v62, 2  ;;  %v2388_v44 = vrot.slane %v2387_v17, 2  ;;  %v2401_v23 = vrot.slane %v2400_v43, 2  ;;  %v1834_v0 = vmul.f32 %v4877_v40, %v6233_v53 }
 0x206   :  { %v2414_v59 = vrot.slane %v2413_v42, 2  ;;  %v2427_v20 = vrot.slane %v2426_v37, 2  ;;  %v1990_v21 = vmul.f32 %v4877_v40, %v6234_v3  ;;  %v2438_v63 = vrot.slane %v2437_v18, 4 }
 0x207   :  { %v2376_v1 = vadd.f32 %v2375_v31, %v2374_v62  ;;  %v2389_v29 = vadd.f32 %v2388_v44, %v2387_v17  ;;  %v2402_v54 = vadd.f32 %v2401_v23, %v2400_v43  ;;  %v4919_v51 = vadd.f32 %v1834_v0, %v1833_v12  ;;  %v6242_v17 = vld [vmem:[#allocation23_spill] sm:$0xff]  ;;  %v6243_v43 = vld [vmem:[#allocation25_spill] sm:$0xff] }
 0x208   :  { %v2415_v11 = vadd.f32 %v2414_v59, %v2413_v42  ;;  %v2428_v52 = vadd.f32 %v2427_v20, %v2426_v37  ;;  %v4921_v49 = vadd.f32 %v1990_v21, %v1989_v58  ;;  %v4924_v36 = vsel %vm1064_vm5, %v1063_v27, %v1047_v4  ;;  %v6244_v37 = vld [vmem:[#allocation78_spill] sm:$0xff]  ;;  %v6245_v23 = vld [vmem:[#allocation89_spill] sm:$0xff]  ;;  %v6246_v58 = vld [vmem:[#allocation7_spill] sm:$0xff] }
 0x209   :  { %v2377_v39 = vrot.slane %v2376_v1, 1  ;;  %v2390_v41 = vrot.slane %v2389_v29, 1  ;;  %v2403_v24 = vrot.slane %v2402_v54, 1  ;;  %6241 = vst [vmem:[#allocation16_spill] sm:$0xff] %v4924_v36  ;;  %v913_v57 = vadd.f32 %v6243_v43, %v6242_v17  ;;  %v6250_v43 = vld [vmem:[#allocation40_spill] sm:$0xff] }
 0x20a   :  { %v2416_v42 = vrot.slane %v2415_v11, 1  ;;  %v2132_v12 = vmul.f32 %v4774_v34, %v6244_v37  ;;  %v2133_v20 = vmul.f32 %v4778_v2, %v6245_v23  ;;  %v2289_v0 = vmul.f32 %v4778_v2, %v6246_v58 }
 0x20b   :  { %v2378_v31 = vadd.f32 %v2377_v39, %v2376_v1  ;;  %v2391_v44 = vadd.f32 %v2390_v41, %v2389_v29  ;;  %v2404_v59 = vadd.f32 %v2403_v24, %v2402_v54  ;;  %v2445_v4 = vmul.f32 %v4628_v13, %v4778_v2  ;;  %v6248_v54 = vld [vmem:[#allocation26_spill] sm:$0xff]  ;;  %v6249_v41 = vld [vmem:[#allocation27_spill] sm:$0xff] }
 0x20c   :  { %v2429_v27 = vrot.slane %v2428_v52, 1  ;;  %v2439_v21 = vadd.f32 %v2438_v63, %v2437_v18  ;;  %v1198_v39 = vmul.f32 %v913_v57, %v6248_v54  ;;  %v1354_v24 = vmul.f32 %v913_v57, %v6249_v41  ;;  %v6253_v2 = vld [vmem:[#allocation55_spill] sm:$0xff] }
 0x20d   :  { %v2483_v62 = vmax.f32 %v2378_v31, %v2391_v44  ;;  %v2491_v1 = vsel %vm1058_vm2, %v2378_v31, %v2391_v44  ;;  %v1510_v36 = vmul.f32 %v913_v57, %v6250_v43  ;;  %v4944_v55 = vadd.f32 %v2416_v42, %v2415_v11  ;;  %v6254_v44 = vld [vmem:[#allocation63_spill] sm:$0xff] }
 0x20e   :  { %v4939_v29 = vsel %vm1060_vm3, %v2491_v1, %v2404_v59  ;;  %v1666_v3 = vmul.f32 %v913_v57, %v6252_v50  ;;  %v1822_v53 = vmul.f32 %v913_v57, %v6253_v2  ;;  %v1201_v18 = vadd.f32 %v4848_v10, %v1198_v39 }
 0x20f   :  { %6247 = vst [vmem:[#allocation97_spill] sm:$0xff] %v4939_v29  ;;  %6251 = vst [vmem:[#allocation32_spill] sm:$0xff] %v4944_v55  ;;  %v2484_v19 = vmax.f32 %v2483_v62, %v2404_v59  ;;  %v1357_v63 = vadd.f32 %v4850_v5, %v1354_v24  ;;  %v1513_v31 = vadd.f32 %v4852_v22, %v1510_v36  ;;  %v6256_v59 = vld [vmem:[#allocation62_spill] sm:$0xff]  ;;  %v6258_v22 = vld [vmem:[#allocation73_spill] sm:$0xff]  ;;  %v2440_v39 = vrot.slane %v2439_v21, 2 }
 0x210   :  { %v1978_v1 = vmul.f32 %v913_v57, %v6254_v44  ;;  %v4952_v29 = vadd.f32 %v2429_v27, %v2428_v52  ;;  %v1669_v11 = vadd.f32 %v4854_v33, %v1666_v3  ;;  %v1825_v62 = vadd.f32 %v4856_v28, %v1822_v53 }
 0x211   :  { %v2485_v9 = vmax.f32 %v2484_v19, %v4944_v55  ;;  %v2288_v42 = vmul.f32 %v4774_v34, %v6256_v59  ;;  %v2444_v10 = vmul.f32 %v6257_v47, %v4774_v34  ;;  %v4964_v36 = vadd.f32 %v6258_v22, %v6242_v17 }
 0x212   :  { %6255 = vst [vmem:[#allocation34_spill] sm:$0xff] %v4952_v29  ;;  %v1981_v5 = vadd.f32 %v4858_v14, %v1978_v1  ;;  %v2145_v52 = vmul.f32 %v4823_v48, %v6244_v37  ;;  %v2301_v19 = vmul.f32 %v4823_v48, %v6256_v59  ;;  %v2457_v28 = vmul.f32 %v6257_v47, %v4823_v48  ;;  %v6260_v14 = vld [vmem:[#allocation48_spill] sm:$0xff] }
 0x213   :  { %v4973_v3 = vmax.f32 %v2485_v9, %v4952_v29  ;;  %v2136_v53 = vadd.f32 %v2133_v20, %v2132_v12  ;;  %v2292_v34 = vadd.f32 %v2289_v0, %v2288_v42  ;;  %v2448_v33 = vadd.f32 %v2445_v4, %v2444_v10  ;;  %v6261_v0 = vld [vmem:[#allocation92_spill] sm:$0xff]  ;;  %v6262_v42 = vld [vmem:[#allocation57_spill] sm:$0xff] }
 0x214   :  { %v4977_v27 = vadd.f32 %v6260_v14, %v6213_v15  ;;  %v2146_v24 = vmul.f32 %v4877_v40, %v6245_v23  ;;  %v2302_v1 = vmul.f32 %v4877_v40, %v6246_v58  ;;  %v2458_v48 = vmul.f32 %v4628_v13, %v4877_v40 }
 0x215   :  { %6259 = vst [vmem:[#allocation41_spill] sm:$0xff] %v4973_v3  ;;  %v1211_v9 = vmul.f32 %v4964_v36, %v6248_v54  ;;  %v1367_v12 = vmul.f32 %v4964_v36, %v6249_v41  ;;  %v1523_v15 = vmul.f32 %v4964_v36, %v6250_v43  ;;  %v1679_v20 = vmul.f32 %v4964_v36, %v6252_v50  ;;  %v6274_v54 = vld [vmem:[#allocation59_spill] sm:$0xff] }
 0x216   :  { %v2134_v4 = vmul.f32 %v913_v57, %v6261_v0  ;;  %v2290_v10 = vmul.f32 %v913_v57, %v6262_v42  ;;  %v1835_v22 = vmul.f32 %v4964_v36, %v6253_v2  ;;  %v1991_v40 = vmul.f32 %v4964_v36, %v6254_v44 }
 0x217   :  { %v5000_v14 = vadd.f32 %v4899_v7, %v1211_v9  ;;  %v5003_v29 = vadd.f32 %v4901_v6, %v1367_v12  ;;  %v5006_v55 = vadd.f32 %v4909_v56, %v1523_v15  ;;  %v5009_v3 = vadd.f32 %v4911_v60, %v1679_v20  ;;  %v6265_v56 = vld [vmem:[#allocation35_spill] sm:$0xff]  ;;  %v6266_v12 = vld [vmem:[#allocation88_spill] sm:$0xff]  ;;  %v6272_v15 = vld [vmem:[#allocation74_spill] sm:$0xff] }
 0x218   :  { %v5011_v13 = vadd.f32 %v2440_v39, %v2439_v21  ;;  %v2446_v50 = vmul.f32 %v4763_v26, %v913_v57  ;;  %v5015_v2 = vadd.f32 %v4919_v51, %v1835_v22  ;;  %v5018_v44 = vadd.f32 %v4921_v49, %v1991_v40  ;;  %v6268_v39 = vld [vmem:[#allocation30_spill] sm:$0xff] }
 0x219   :  { %v5020_v7 = vadd.f32 %v2146_v24, %v2145_v52  ;;  %v5022_v6 = vadd.f32 %v2302_v1, %v2301_v19  ;;  %v5024_v9 = vadd.f32 %v2458_v48, %v2457_v28  ;;  %v5028_v60 = vadd.f32 %v6266_v12, %v6265_v56  ;;  %v6267_v19 = vld [vmem:[#allocation29_spill] sm:$0xff]  ;;  %v6271_v48 = vld [vmem:[#allocation46_spill] sm:$0xff] }
 0x21a   :  { %6263 = vst [vmem:[#allocation43_spill] sm:$0xff] %v5011_v13  ;;  %6264 = vst [vmem:[#allocation20_spill] sm:$0xff] %v5018_v44  ;;  %v2137_v21 = vadd.f32 %v2136_v53, %v2134_v4  ;;  %v5032_v57 = vmul.f32 %v4977_v27, %v6222_v16  ;;  %v5036_v51 = vmul.f32 %v4977_v27, %v6223_v35  ;;  %v6269_v53 = vld [vmem:[#allocation44_spill] sm:$0xff] }
 0x21b   :  { %v5040_v49 = vmul.f32 %v4977_v27, %v6225_v46  ;;  %v2293_v52 = vadd.f32 %v2292_v34, %v2290_v10  ;;  %v1199_v28 = vmul.f32 %v5028_v60, %v6267_v19  ;;  %v1355_v24 = vmul.f32 %v5028_v60, %v6268_v39  ;;  %v6273_v46 = vld [vmem:[#allocation76_spill] sm:$0xff] }
 0x21c   :  { %v1511_v1 = vmul.f32 %v5028_v60, %v6269_v53  ;;  %v5048_v16 = vadd.f32 %v2448_v33, %v2446_v50  ;;  %v1667_v35 = vmul.f32 %v5028_v60, %v6271_v48  ;;  %v1823_v20 = vmul.f32 %v5028_v60, %v6272_v15 }
 0x21d   :  { %v1979_v34 = vmul.f32 %v5028_v60, %v6273_v46  ;;  %v5058_v4 = vmul.f32 %v4977_v27, %v6226_v45  ;;  %v1202_v10 = vadd.f32 %v1201_v18, %v1199_v28  ;;  %v1358_v22 = vadd.f32 %v1357_v63, %v1355_v24 }
 0x21e   :  { %6270 = vst [vmem:[#allocation21_spill] sm:$0xff] %v5048_v16  ;;  %v1514_v40 = vadd.f32 %v1513_v31, %v1511_v1  ;;  %v5062_v50 = vmul.f32 %v4977_v27, %v6227_v61  ;;  %v1670_v33 = vadd.f32 %v1669_v11, %v1667_v35  ;;  %v1826_v12 = vadd.f32 %v1825_v62, %v1823_v20 }
 0x21f   :  { %v1982_v13 = vadd.f32 %v1981_v5, %v1979_v34  ;;  %v1203_v58 = vrot.slane %v1202_v10, 4  ;;  %v1359_v43 = vrot.slane %v1358_v22, 4  ;;  %v2135_v23 = vmul.f32 %v5028_v60, %v6274_v54 }
 0x220   :  { %v1515_v41 = vrot.slane %v1514_v40, 4  ;;  %v5068_v45 = vmul.f32 %v4977_v27, %v6228_v30  ;;  %v1671_v18 = vrot.slane %v1670_v33, 4  ;;  %v1827_v63 = vrot.slane %v1826_v12, 4 }
 0x221   :  { %v1983_v31 = vrot.slane %v1982_v13, 4  ;;  %v1204_v28 = vadd.f32 %v1203_v58, %v1202_v10  ;;  %v1360_v24 = vadd.f32 %v1359_v43, %v1358_v22  ;;  %v2291_v11 = vmul.f32 %v5028_v60, %v4632_v25 }
 0x222   :  { %v1516_v61 = vadd.f32 %v1515_v41, %v1514_v40  ;;  %v5074_v62 = vmul.f32 %v4977_v27, %v6244_v37  ;;  %v1672_v5 = vadd.f32 %v1671_v18, %v1670_v33  ;;  %v1828_v1 = vadd.f32 %v1827_v63, %v1826_v12 }
 0x223   :  { %v1984_v35 = vadd.f32 %v1983_v31, %v1982_v13  ;;  %v1205_v20 = vrot.slane %v1204_v28, 2  ;;  %v1361_v34 = vrot.slane %v1360_v24, 2  ;;  %v2138_v44 = vadd.f32 %v2137_v21, %v2135_v23 }
 0x224   :  { %6275 = vst [vmem:[#allocation28_spill] sm:$0xff] %v5074_v62  ;;  %v1517_v30 = vrot.slane %v1516_v61, 2  ;;  %v5078_v16 = vmul.f32 %v4977_v27, %v6256_v59  ;;  %v1673_v58 = vrot.slane %v1672_v5, 2  ;;  %v1829_v41 = vrot.slane %v1828_v1, 2  ;;  %v6278_v62 = vld [vmem:[#allocation67_spill] sm:$0xff] }
 0x225   :  { %v1985_v43 = vrot.slane %v1984_v35, 2  ;;  %v1206_v10 = vadd.f32 %v1205_v20, %v1204_v28  ;;  %v1362_v22 = vadd.f32 %v1361_v34, %v1360_v24  ;;  %v2294_v25 = vadd.f32 %v2293_v52, %v2291_v11  ;;  %v6288_v34 = vld [vmem:[#allocation70_spill] sm:$0xff] }
 0x226   :  { %6276 = vst [vmem:[#allocation107_spill] sm:$0xff] %v5078_v16  ;;  %v1518_v40 = vadd.f32 %v1517_v30, %v1516_v61  ;;  %v5082_v37 = vmul.f32 %v4977_v27, %v6257_v47  ;;  %v1674_v13 = vadd.f32 %v1673_v58, %v1672_v5  ;;  %v1830_v33 = vadd.f32 %v1829_v41, %v1828_v1  ;;  %v6289_v30 = vld [vmem:[#allocation51_spill] sm:$0xff] }
 0x227   :  { %v1986_v12 = vadd.f32 %v1985_v43, %v1984_v35  ;;  %v1207_v18 = vrot.slane %v1206_v10, 1  ;;  %v1363_v23 = vrot.slane %v1362_v22, 1  ;;  %v2139_v63 = vrot.slane %v2138_v44, 4  ;;  %v6285_v35 = vld [vmem:[#allocation65_spill] sm:$0xff]  ;;  %v6291_v43 = vld [vmem:[#allocation71_spill] sm:$0xff] }
 0x228   :  { %6277 = vst [vmem:[#allocation98_spill] sm:$0xff] %v5082_v37  ;;  %v1519_v21 = vrot.slane %v1518_v40, 1  ;;  %v1675_v59 = vrot.slane %v1674_v13, 1  ;;  %v1831_v31 = vrot.slane %v1830_v33, 1  ;;  %v5086_v28 = vadd.f32 %v6278_v62, %v6214_v32  ;;  %v6286_v32 = vld [vmem:[#allocation49_spill] sm:$0xff] }
 0x229   :  { %v1987_v16 = vrot.slane %v1986_v12, 1  ;;  %v5088_v24 = vadd.f32 %v1207_v18, %v1206_v10  ;;  %v5090_v52 = vadd.f32 %v1363_v23, %v1362_v22  ;;  %v2295_v27 = vrot.slane %v2294_v25, 4  ;;  %v6292_v10 = vld [vmem:[#allocation72_spill] sm:$0xff] }
 0x22a   :  { %v5092_v47 = vadd.f32 %v1519_v21, %v1518_v40  ;;  %v2147_v61 = vmul.f32 %v4964_v36, %v6261_v0  ;;  %v5096_v11 = vadd.f32 %v1675_v59, %v1674_v13  ;;  %v5098_v5 = vadd.f32 %v1831_v31, %v1830_v33  ;;  %v6294_v33 = vld [vmem:[#allocation101_spill] sm:$0xff]  ;;  %v6297_v21 = vld [vmem:[#allocation104_spill] sm:$0xff] }
 0x22b   :  { %6279 = vst [vmem:[#allocation99_spill] sm:$0xff] %v5088_v24  ;;  %6280 = vst [vmem:[#allocation23_spill] sm:$0xff] %v5090_v52  ;;  %v5100_v1 = vadd.f32 %v1987_v16, %v1986_v12  ;;  %v6287_v62 = vmax.f32 %v6285_v35, %v6286_v32  ;;  %v6290_v58 = vmax.f32 %v6288_v34, %v6289_v30  ;;  %v6295_v12 = vld [vmem:[#allocation52_spill] sm:$0xff]  ;;  %v6298_v59 = vld [vmem:[#allocation53_spill] sm:$0xff] }
 0x22c   :  { %6281 = vst [vmem:[#allocation25_spill] sm:$0xff] %v5092_v47  ;;  %6282 = vst [vmem:[#allocation78_spill] sm:$0xff] %v5096_v11  ;;  %v6293_v22 = vmax.f32 %v6291_v43, %v6292_v10  ;;  %v2140_v16 = vadd.f32 %v2139_v63, %v2138_v44  ;;  %v2303_v13 = vmul.f32 %v4964_v36, %v6262_v42  ;;  %v6300_v32 = vld [vmem:[#allocation105_spill] sm:$0xff]  ;;  %v6303_v43 = vld [vmem:[#allocation91_spill] sm:$0xff] }
 0x22d   :  { %6283 = vst [vmem:[#allocation62_spill] sm:$0xff] %v5098_v5  ;;  %6284 = vst [vmem:[#allocation18_spill] sm:$0xff] %v5100_v1  ;;  %v5106_v20 = vmax.f32 %v6287_v62, %v5088_v24  ;;  %v5112_v41 = vmax.f32 %v6290_v58, %v5090_v52  ;;  %v6296_v18 = vmax.f32 %v6294_v33, %v6295_v12  ;;  %v6301_v62 = vld [vmem:[#allocation68_spill] sm:$0xff]  ;;  %v6305_v12 = vld [vmem:[#allocation39_spill] sm:$0xff] }
 0x22e   :  { %v5118_v40 = vmax.f32 %v6293_v22, %v5092_v47  ;;  %v6299_v31 = vmax.f32 %v6297_v21, %v6298_v59  ;;  %v6302_v34 = vmax.f32 %v6300_v32, %v6301_v62  ;;  %v2296_v63 = vadd.f32 %v2295_v27, %v2294_v25  ;;  %v6304_v22 = vld [vmem:[#allocation37_spill] sm:$0xff]  ;;  %v6307_v25 = vld [vmem:[#allocation47_spill] sm:$0xff] }
 0x22f   :  { %v5126_v23 = vmax.f32 %v6296_v18, %v5096_v11  ;;  %v1223_v30 = vmul.f32 %v5086_v28, %v6229_v38  ;;  %v1379_v58 = vmul.f32 %v5086_v28, %v6230_v8  ;;  %v5146_v10 = vadd.f32 %v6303_v43, %v6265_v56  ;;  %v6306_v21 = vld [vmem:[#allocation45_spill] sm:$0xff] }
 0x230   :  { %v5132_v35 = vmax.f32 %v6299_v31, %v5098_v5  ;;  %v5138_v44 = vmax.f32 %v6302_v34, %v5100_v1  ;;  %v1535_v33 = vmul.f32 %v5086_v28, %v6304_v22  ;;  %v1691_v18 = vmul.f32 %v5086_v28, %v6305_v12 }
 0x231   :  { %v1847_v59 = vmul.f32 %v5086_v28, %v6306_v21  ;;  %v2003_v27 = vmul.f32 %v5086_v28, %v6307_v25  ;;  %v2459_v38 = vmul.f32 %v4763_v26, %v4964_v36  ;;  %v2141_v8 = vrot.slane %v2140_v16, 2 }
 0x232   :  { %v5159_v31 = vadd.f32 %v1223_v30, %v5032_v57  ;;  %v5162_v32 = vadd.f32 %v1379_v58, %v5036_v51  ;;  %v5165_v62 = vadd.f32 %v1535_v33, %v5040_v49  ;;  %v5168_v34 = vadd.f32 %v1691_v18, %v5058_v4  ;;  %v6308_v51 = vld [vmem:[#allocation22_spill] sm:$0xff] }
 0x233   :  { %v5171_v43 = vadd.f32 %v1847_v59, %v5062_v50  ;;  %v5174_v22 = vadd.f32 %v2003_v27, %v5068_v45  ;;  %v2150_v36 = vadd.f32 %v5020_v7, %v2147_v61  ;;  %v2306_v57 = vadd.f32 %v5022_v6, %v2303_v13 }
 0x234   :  { %v2297_v30 = vrot.slane %v2296_v63, 2  ;;  %v5180_v58 = vadd.f32 %v6308_v51, %v6242_v17  ;;  %v1212_v49 = vmul.f32 %v5146_v10, %v6267_v19  ;;  %v1368_v4 = vmul.f32 %v5146_v10, %v6268_v39  ;;  %v6309_v17 = vld [vmem:[#allocation102_spill] sm:$0xff] }
 0x235   :  { %v1524_v50 = vmul.f32 %v5146_v10, %v6269_v53  ;;  %v1680_v45 = vmul.f32 %v5146_v10, %v6271_v48  ;;  %v5191_v7 = vadd.f32 %v5024_v9, %v2459_v38  ;;  %v5193_v6 = vadd.f32 %v2141_v8, %v2140_v16  ;;  %v6310_v8 = vld [vmem:[#allocation21_spill] sm:$0xff] }
 0x236   :  { %v2447_v61 = vmul.f32 %v6309_v17, %v5028_v60  ;;  %v1836_v13 = vmul.f32 %v5146_v10, %v6272_v15  ;;  %v1215_v33 = vadd.f32 %v5000_v14, %v1212_v49  ;;  %v1371_v12 = vadd.f32 %v5003_v29, %v1368_v4 }
 0x237   :  { %v1527_v18 = vadd.f32 %v5006_v55, %v1524_v50  ;;  %v1683_v21 = vadd.f32 %v5009_v3, %v1680_v45  ;;  %v5203_v59 = vadd.f32 %v2297_v30, %v2296_v63  ;;  %v1992_v16 = vmul.f32 %v5146_v10, %v6273_v46  ;;  %v6311_v55 = vld [vmem:[#allocation20_spill] sm:$0xff] }
 0x238   :  { %v1839_v9 = vadd.f32 %v5015_v2, %v1836_v13  ;;  %v2148_v60 = vmul.f32 %v5146_v10, %v6274_v54  ;;  %v1216_v25 = vrot.slane %v1215_v33, 4  ;;  %v1372_v27 = vrot.slane %v1371_v12, 4 }
 0x239   :  { %v1528_v38 = vrot.slane %v1527_v18, 4  ;;  %v1684_v14 = vrot.slane %v1683_v21, 4  ;;  %v2450_v29 = vadd.f32 %v6310_v8, %v2447_v61  ;;  %v1995_v49 = vadd.f32 %v6311_v55, %v1992_v16 }
 0x23a   :  { %v1840_v51 = vrot.slane %v1839_v9, 4  ;;  %v2151_v3 = vadd.f32 %v2150_v36, %v2148_v60  ;;  %v1217_v63 = vadd.f32 %v1216_v25, %v1215_v33  ;;  %v1373_v30 = vadd.f32 %v1372_v27, %v1371_v12  ;;  %v6312_v60 = vld [vmem:[#allocation33_spill] sm:$0xff] }
 0x23b   :  { %v1529_v4 = vadd.f32 %v1528_v38, %v1527_v18  ;;  %v1685_v2 = vadd.f32 %v1684_v14, %v1683_v21  ;;  %v2143_v50 = vrot.slane %v5193_v6, 1  ;;  %v1996_v13 = vrot.slane %v1995_v49, 4 }
 0x23c   :  { %v1841_v45 = vadd.f32 %v1840_v51, %v1839_v9  ;;  %v2152_v1 = vrot.slane %v2151_v3, 4  ;;  %v1218_v5 = vrot.slane %v1217_v63, 2  ;;  %v1374_v11 = vrot.slane %v1373_v30, 2 }
 0x23d   :  { %v1530_v47 = vrot.slane %v1529_v4, 2  ;;  %v1686_v52 = vrot.slane %v1685_v2, 2  ;;  %v2451_v24 = vrot.slane %v2450_v29, 4  ;;  %v1997_v61 = vadd.f32 %v1996_v13, %v1995_v49  ;;  %v6313_v13 = vld [vmem:[#allocation89_spill] sm:$0xff] }
 0x23e   :  { %v1842_v37 = vrot.slane %v1841_v45, 2  ;;  %v2153_v8 = vadd.f32 %v2152_v1, %v2151_v3  ;;  %v1219_v26 = vadd.f32 %v1218_v5, %v1217_v63  ;;  %v1375_v16 = vadd.f32 %v1374_v11, %v1373_v30 }
 0x23f   :  { %v1531_v36 = vadd.f32 %v1530_v47, %v1529_v4  ;;  %v1687_v33 = vadd.f32 %v1686_v52, %v1685_v2  ;;  %v1998_v18 = vrot.slane %v1997_v61, 2  ;;  %v2304_v9 = vmul.f32 %v5146_v10, %v6312_v60 }
 0x240   :  { %v1843_v12 = vadd.f32 %v1842_v37, %v1841_v45  ;;  %v2154_v21 = vrot.slane %v2153_v8, 2  ;;  %v1220_v25 = vrot.slane %v1219_v26, 1  ;;  %v1376_v27 = vrot.slane %v1375_v16, 1 }
 0x241   :  { %v1532_v38 = vrot.slane %v1531_v36, 1  ;;  %v1688_v14 = vrot.slane %v1687_v33, 1  ;;  %v2299_v51 = vrot.slane %v5203_v59, 1  ;;  %v1999_v54 = vadd.f32 %v1998_v18, %v1997_v61 }
 0x242   :  { %v1844_v55 = vrot.slane %v1843_v12, 1  ;;  %v2307_v49 = vadd.f32 %v2306_v57, %v2304_v9  ;;  %v5216_v1 = vadd.f32 %v1220_v25, %v1219_v26  ;;  %v5218_v11 = vadd.f32 %v1376_v27, %v1375_v16  ;;  %v6318_v9 = vld [vmem:[#allocation42_spill] sm:$0xff] }
 0x243   :  { %v5220_v52 = vadd.f32 %v1532_v38, %v1531_v36  ;;  %v5222_v37 = vadd.f32 %v1688_v14, %v1687_v33  ;;  %v2452_v47 = vadd.f32 %v2451_v24, %v2450_v29  ;;  %v2000_v3 = vrot.slane %v1999_v54, 1  ;;  %v6315_v36 = vld [vmem:[#allocation27_spill] sm:$0xff] }
 0x244   :  { %v5224_v5 = vadd.f32 %v1844_v55, %v1843_v12  ;;  %v2155_v63 = vadd.f32 %v2154_v21, %v2153_v8  ;;  %v1241_v30 = vmax.f32 %v5106_v20, %v5216_v1  ;;  %v1397_v4 = vmax.f32 %v5112_v41, %v5218_v11  ;;  %v6314_v8 = vld [vmem:[#allocation26_spill] sm:$0xff]  ;;  %v6316_v12 = vld [vmem:[#allocation40_spill] sm:$0xff] }
 0x245   :  { %v1553_v26 = vmax.f32 %v5118_v40, %v5220_v52  ;;  %v5235_v2 = vadd.f32 %v2143_v50, %v5193_v6  ;;  %v5239_v29 = vadd.f32 %v2000_v3, %v1999_v54  ;;  %v2308_v45 = vrot.slane %v2307_v49, 4  ;;  %v6317_v50 = vld [vmem:[#allocation7_spill] sm:$0xff]  ;;  %v6321_v54 = vld [vmem:[#allocation109_spill] sm:$0xff] }
 0x246   :  { %v2159_v61 = vmul.f32 %v5086_v28, %v6313_v13  ;;  %v1224_v16 = vmul.f32 %v5180_v58, %v6314_v8  ;;  %v1380_v33 = vmul.f32 %v5180_v58, %v6315_v36  ;;  %v1536_v18 = vmul.f32 %v5180_v58, %v6316_v12  ;;  %v6319_v8 = vld [vmem:[#allocation55_spill] sm:$0xff] }
 0x247   :  { %v2453_v6 = vrot.slane %v2452_v47, 2  ;;  %v2315_v21 = vmul.f32 %v5086_v28, %v6317_v50  ;;  %v1692_v25 = vmul.f32 %v5180_v58, %v6318_v9  ;;  %v2156_v27 = vrot.slane %v2155_v63, 1  ;;  %v6320_v12 = vld [vmem:[#allocation63_spill] sm:$0xff]  ;;  %v6322_v9 = vld [vmem:[#allocation36_spill] sm:$0xff] }
 0x248   :  { %v1227_v38 = vadd.f32 %v5159_v31, %v1224_v16  ;;  %v1383_v14 = vadd.f32 %v5162_v32, %v1380_v33  ;;  %v1539_v55 = vadd.f32 %v5165_v62, %v1536_v18  ;;  %v5258_v3 = vadd.f32 %v2308_v45, %v2307_v49  ;;  %v6324_v32 = vld [vmem:[#allocation28_spill] sm:$0xff]  ;;  %v6325_v49 = vld [vmem:[#allocation31_spill] sm:$0xff] }
 0x249   :  { %v1695_v13 = vadd.f32 %v5168_v34, %v1692_v25  ;;  %v1848_v36 = vmul.f32 %v5180_v58, %v6319_v8  ;;  %v2004_v50 = vmul.f32 %v5180_v58, %v6320_v12  ;;  %v6323_v24 = vmax.f32 %v6321_v54, %v6322_v9  ;;  %v6326_v18 = vld [vmem:[#allocation75_spill] sm:$0xff] }
 0x24a   :  { %v5272_v31 = vadd.f32 %v2299_v51, %v5203_v59  ;;  %v2162_v62 = vadd.f32 %v2159_v61, %v6324_v32  ;;  %v5277_v34 = vmul.f32 %v5086_v28, %v6325_v49  ;;  %v2460_v45 = vmul.f32 %v6309_v17, %v5146_v10  ;;  %v6327_v59 = vld [vmem:[#allocation107_spill] sm:$0xff] }
 0x24b   :  { %v5269_v57 = vmax.f32 %v6323_v24, %v5235_v2  ;;  %v1851_v16 = vadd.f32 %v5171_v43, %v1848_v36  ;;  %v2007_v33 = vadd.f32 %v5174_v22, %v2004_v50  ;;  %v5285_v24 = vadd.f32 %v6326_v18, %v6265_v56  ;;  %v6328_v9 = vld [vmem:[#allocation59_spill] sm:$0xff] }
 0x24c   :  { %v5287_v54 = vadd.f32 %v2453_v6, %v2452_v47  ;;  %v2318_v51 = vadd.f32 %v2315_v21, %v6327_v59  ;;  %v5290_v61 = vadd.f32 %v2156_v27, %v2155_v63  ;;  %v2160_v28 = vmul.f32 %v5180_v58, %v6261_v0 }
 0x24d   :  { %v2310_v25 = vrot.slane %v5258_v3, 2  ;;  %v1225_v10 = vmul.f32 %v5285_v24, %v6267_v19  ;;  %v1381_v43 = vmul.f32 %v5285_v24, %v6268_v39  ;;  %v1537_v56 = vmul.f32 %v5285_v24, %v6269_v53 }
 0x24e   :  { %v2316_v22 = vmul.f32 %v5180_v58, %v6262_v42  ;;  %v1693_v47 = vmul.f32 %v5285_v24, %v6271_v48  ;;  %v1849_v0 = vmul.f32 %v5285_v24, %v6272_v15  ;;  %v2005_v63 = vmul.f32 %v5285_v24, %v6273_v46 }
 0x24f   :  { %v2463_v19 = vadd.f32 %v5191_v7, %v2460_v45  ;;  %v1228_v6 = vadd.f32 %v1227_v38, %v1225_v10  ;;  %v1384_v21 = vadd.f32 %v1383_v14, %v1381_v43  ;;  %v1540_v39 = vadd.f32 %v1539_v55, %v1537_v56 }
 0x250   :  { %v2163_v27 = vadd.f32 %v2162_v62, %v2160_v28  ;;  %v1696_v8 = vadd.f32 %v1695_v13, %v1693_v47  ;;  %v1852_v53 = vadd.f32 %v1851_v16, %v1849_v0  ;;  %v2008_v36 = vadd.f32 %v2007_v33, %v2005_v63 }
 0x251   :  { %v1229_v12 = vrot.slane %v1228_v6, 4  ;;  %v1385_v42 = vrot.slane %v1384_v21, 4  ;;  %v1541_v50 = vrot.slane %v1540_v39, 4  ;;  %v2161_v48 = vmul.f32 %v5285_v24, %v6328_v9 }
 0x252   :  { %v2319_v32 = vadd.f32 %v2318_v51, %v2316_v22  ;;  %v1697_v15 = vrot.slane %v1696_v8, 4  ;;  %v1853_v49 = vrot.slane %v1852_v53, 4  ;;  %v2009_v18 = vrot.slane %v2008_v36, 4 }
 0x253   :  { %v1230_v46 = vadd.f32 %v1229_v12, %v1228_v6  ;;  %v1386_v59 = vadd.f32 %v1385_v42, %v1384_v21  ;;  %v1542_v7 = vadd.f32 %v1541_v50, %v1540_v39  ;;  %v2164_v38 = vadd.f32 %v2163_v27, %v2161_v48 }
 0x254   :  { %v1698_v14 = vadd.f32 %v1697_v15, %v1696_v8  ;;  %v1854_v55 = vadd.f32 %v1853_v49, %v1852_v53  ;;  %v2010_v62 = vadd.f32 %v2009_v18, %v2008_v36  ;;  %v2317_v13 = vmul.f32 %v5285_v24, %v6312_v60 }
 0x255   :  { %v1231_v45 = vrot.slane %v1230_v46, 2  ;;  %v1387_v16 = vrot.slane %v1386_v59, 2  ;;  %v1543_v33 = vrot.slane %v1542_v7, 2  ;;  %v2165_v28 = vrot.slane %v2164_v38, 4 }
 0x256   :  { %v1699_v10 = vrot.slane %v1698_v14, 2  ;;  %v1855_v43 = vrot.slane %v1854_v55, 2  ;;  %v2011_v51 = vrot.slane %v2010_v62, 2  ;;  %v2320_v56 = vadd.f32 %v2319_v32, %v2317_v13 }
 0x257   :  { %v1232_v22 = vadd.f32 %v1231_v45, %v1230_v46  ;;  %v1388_v47 = vadd.f32 %v1387_v16, %v1386_v59  ;;  %v1544_v0 = vadd.f32 %v1543_v33, %v1542_v7  ;;  %v2166_v63 = vadd.f32 %v2165_v28, %v2164_v38 }
 0x258   :  { %v2464_v6 = vrot.slane %v2463_v19, 4  ;;  %v1700_v21 = vadd.f32 %v1699_v10, %v1698_v14  ;;  %v1856_v39 = vadd.f32 %v1855_v43, %v1854_v55  ;;  %v2012_v27 = vadd.f32 %v2011_v51, %v2010_v62  ;;  %v6333_v51 = vld [vmem:[#allocation15_spill] sm:$0xff] }
 0x259   :  { %v1233_v8 = vrot.slane %v1232_v22, 1  ;;  %v1389_v53 = vrot.slane %v1388_v47, 1  ;;  %v1545_v36 = vrot.slane %v1544_v0, 1  ;;  %v2321_v60 = vrot.slane %v2320_v56, 4 }
 0x25a   :  { %v1701_v12 = vrot.slane %v1700_v21, 1  ;;  %v1857_v42 = vrot.slane %v1856_v39, 1  ;;  %v2013_v50 = vrot.slane %v2012_v27, 1  ;;  %v2167_v9 = vrot.slane %v2166_v63, 2 }
 0x25b   :  { %v2311_v48 = vadd.f32 %v2310_v25, %v5258_v3  ;;  %v1234_v15 = vadd.f32 %v1233_v8, %v1232_v22  ;;  %v1390_v32 = vadd.f32 %v1389_v53, %v1388_v47  ;;  %v1546_v49 = vadd.f32 %v1545_v36, %v1544_v0  ;;  %v6336_v47 = vld [vmem:[#allocation98_spill] sm:$0xff] }
 0x25c   :  { %v2465_v18 = vadd.f32 %v2464_v6, %v2463_v19  ;;  %v1702_v46 = vadd.f32 %v1701_v12, %v1700_v21  ;;  %v5315_v59 = vadd.f32 %v1857_v42, %v1856_v39  ;;  %v5317_v7 = vadd.f32 %v2013_v50, %v2012_v27  ;;  %v6337_v21 = vld [vmem:[#allocation43_spill] sm:$0xff]  ;;  %v6338_v27 = vld [vmem:[#allocation96_spill] sm:$0xff]  ;;  %v6339_v8 = vld [vmem:[#allocation14_spill] sm:$0xff] }
 0x25d   :  { %v5322_v38 = vmax.f32 %v1241_v30, %v1234_v15  ;;  %v5327_v14 = vmax.f32 %v1397_v4, %v1390_v32  ;;  %v5332_v3 = vmax.f32 %v1553_v26, %v1546_v49  ;;  %v2322_v25 = vadd.f32 %v2321_v60, %v2320_v56  ;;  %v6332_v26 = vld [vmem:[#allocation106_spill] sm:$0xff]  ;;  %v6335_v56 = vld [vmem:[#allocation16_spill] sm:$0xff] }
 0x25e   :  { %v6329_v19 = vmax.f32 %v5126_v23, %v5222_v37  ;;  %v6330_v20 = vmax.f32 %v5132_v35, %v5224_v5  ;;  %v6331_v41 = vmax.f32 %v5138_v44, %v5239_v29  ;;  %v2168_v40 = vadd.f32 %v2167_v9, %v2166_v63 }
 0x25f   :  { %v2472_v62 = vmul.f32 %v5180_v58, %v6332_v26  ;;  %v1251_v23 = vsub.f32 %v1234_v15, %v5322_v38  ;;  %v1407_v13 = vsub.f32 %v1390_v32, %v5327_v14  ;;  %v1563_v45 = vsub.f32 %v1546_v49, %v5332_v3 }
 0x260   :  { %v5337_v55 = vmax.f32 %v6329_v19, %v1702_v46  ;;  %v5343_v30 = vmax.f32 %v6330_v20, %v5315_v59  ;;  %v5349_v4 = vmax.f32 %v6331_v41, %v5317_v7  ;;  %v2312_v16 = vrot.slane %v2311_v48, 1  ;;  %v6344_v20 = vld [vmem:[#allocation100_spill] sm:$0xff]  ;;  %v6346_v41 = vld [vmem:[#allocation10_spill] sm:$0xff] }
 0x261   :  { %v2466_v28 = vrot.slane %v2465_v18, 2  ;;  %v1254_v10 = vmul.f32 1.442695, %v1251_v23  ;;  %v2323_v43 = vrot.slane %v2322_v25, 2  ;;  %v6334_v58 = vrot.slane %v6333_v51, 3  ;;  %v6349_v23 = vld [vmem:[#allocation78_spill] sm:$0xff] }
 0x262   :  { %v1719_v35 = vsub.f32 %v1702_v46, %v5337_v55  ;;  %v1875_v33 = vsub.f32 %v5315_v59, %v5343_v30  ;;  %v2031_v44 = vsub.f32 %v5317_v7, %v5349_v4  ;;  %v2474_v0 = vadd.f32 %v5277_v34, %v6336_v47  ;;  %v6341_v59 = vld [vmem:[#allocation5_spill] sm:$0xff]  ;;  %v6342_v7 = vld [vmem:[#allocation24_spill] sm:$0xff] }
 0x263   :  { %v1067_v22 = vsel %vm1066_vm6, %v6335_v56, %v6334_v58  ;;  %v1410_v63 = vmul.f32 1.442695, %v1407_v13  ;;  %v2169_v6 = vrot.slane %v2168_v40, 1  ;;  %v2442_v39 = vrot.slane %v6337_v21, 1  ;;  %v6350_v13 = vld [vmem:[#allocation17_spill] sm:$0xff]  ;;  %v6355_v58 = vld [vmem:[#allocation90_spill] sm:$0xff] }
 0x264   :  { %v6340_v53 = vmax.f32 %v6338_v27, %v6339_v8  ;;  %v1566_v60 = vmul.f32 1.442695, %v1563_v45  ;;  %v2473_v12 = vmul.f32 %v5285_v24, %v6309_v17  ;;  %v2455_v42 = vrot.slane %v5287_v54, 1  ;;  %v6343_v24 = vld [vmem:[#allocation99_spill] sm:$0xff] }
 0x265   :  { %v2177_v50 = vmax.f32 %v5269_v57, %v5290_v61  ;;  %v5379_v34 = vadd.f32 %v2312_v16, %v2311_v48  ;;  %v2475_v9 = vadd.f32 %v2474_v0, %v2472_v62  ;;  %v5381_v15 = vadd.f32 %v2466_v28, %v2465_v18  ;;  %v6345_v48 = vld [vmem:[#allocation23_spill] sm:$0xff]  ;;  %v6347_v62 = vld [vmem:[#allocation25_spill] sm:$0xff]  ;;  %v6351_v16 = vld [vmem:[#allocation62_spill] sm:$0xff] }
 0x266   :  { %v5372_v36 = vmax.f32 %v6340_v53, %v5272_v31  ;;  %2755 = vpow2.f32 %v1254_v10  ;;  %v1722_v32 = vmul.f32 1.442695, %v1719_v35  ;;  %v2324_v49 = vadd.f32 %v2323_v43, %v2322_v25  ;;  %v6348_v25 = vld [vmem:[#allocation108_spill] sm:$0xff]  ;;  %v6352_v35 = vld [vmem:[#allocation19_spill] sm:$0xff]  ;;  %v6353_v10 = vld [vmem:[#allocation18_spill] sm:$0xff] }
 0x267   :  { %2757 = vpow2.f32 %v1410_v63  ;;  %v5383_v46 = vadd.f32 %v2169_v6, %v2168_v40  ;;  %v943_v19 = vadd.f32 %v6342_v7, %v6341_v59  ;;  %v2476_v17 = vadd.f32 %v2475_v9, %v2473_v12  ;;  %v6354_v43 = vld [vmem:[#allocation54_spill] sm:$0xff]  ;;  %v1073_v12 = vld [vmem:[%s5730_s1 + $0x8] sm:$0x1] }
 0x268   :  { %2759 = vpow2.f32 %v1566_v60  ;;  %v1248_v57 = vsel %vm1068_vm7, %v6344_v20, %v6343_v24  ;;  %v1404_v18 = vsel %vm1068_vm7, %v6346_v41, %v6345_v48  ;;  %v1560_v40 = vsel %vm1068_vm7, %v6348_v25, %v6347_v62 }
 0x269   :  { %v1053_v26 = vrot.slane %v943_v19, 2  ;;  %v1716_v45 = vsel %vm1068_vm7, %v6350_v13, %v6349_v23  ;;  %v1872_v28 = vsel %vm1068_vm7, %v6352_v35, %v6351_v16  ;;  %2761 = vpow2.f32 %v1722_v32  ;;  %v6357_v35 = vld [vmem:[#allocation50_spill] sm:$0xff] }
 0x26a   :  { %v2028_v51 = vsel %vm1068_vm7, %v6354_v43, %v6353_v10  ;;  %v945_v56 = vadd.f32 %v6355_v58, %v6341_v59  ;;  %v1249_v0 = vsel %vm1070_vm8, %v1248_v57, %v5216_v1  ;;  %v1405_v63 = vsel %vm1070_vm8, %v1404_v18, %v5218_v11  ;;  %v6356_v11 = vld [vmem:[#allocation116_spill] sm:$0xff] }
 0x26b   :  { %v1069_v47 = vsel %vm1068_vm7, %v1067_v22, %v1053_v26  ;;  %v1561_v6 = vsel %vm1070_vm8, %v1560_v40, %v5220_v52  ;;  %v2325_v27 = vrot.slane %v2324_v49, 1  ;;  %v1250_v53 = vsub.f32 %v1249_v0, %v5322_v38  ;;  %v1072_v52 = vld [vmem:[%s5730_s1] sm:$0xff] }
 0x26c   :  { %v1056_v8 = vrot.slane %v945_v56, 1  ;;  %v1406_v60 = vsub.f32 %v1405_v63, %v5327_v14  ;;  %v1878_v22 = vmul.f32 1.442695, %v1875_v33  ;;  %v1562_v9 = vsub.f32 %v1561_v6, %v5332_v3 }
 0x26d   :  { %v1717_v1 = vsel %vm1070_vm8, %v1716_v45, %v5222_v37  ;;  %v1032_v32 = vadd.f32 %v6356_v11, %v6341_v59  ;;  %v2477_v38 = vrot.slane %v2476_v17, 4  ;;  %v1252_v7 = vmul.f32 1.442695, %v1250_v53  ;;  %v6360_v11 = vld [vmem:[#allocation32_spill] sm:$0xff] }
 0x26e   :  { %v1071_v14 = vsel %vm1070_vm8, %v1069_v47, %v1056_v8  ;;  %v1408_v19 = vmul.f32 1.442695, %v1406_v60  ;;  %v2034_v24 = vmul.f32 1.442695, %v2031_v44  ;;  %v1564_v20 = vmul.f32 1.442695, %v1562_v9 }
 0x26f   :  { %v5428_v33 = vadd.f32 %v1073_v12, %v1032_v32  ;;  %v1718_v3 = vsub.f32 %v1717_v1, %v5337_v55  ;;  %v5431_v37 = vadd.f32 %v1072_v52, %v1071_v14  ;;  %v1873_v59 = vsel %vm1070_vm8, %v1872_v28, %v5224_v5  ;;  %v6359_v12 = vld [vmem:[#allocation41_spill] sm:$0xff] }
 0x270   :  { %2763 = vpow2.f32 %v1408_v19  ;;  %v2029_v57 = vsel %vm1070_vm8, %v2028_v51, %v5239_v29  ;;  %v1874_v44 = vsub.f32 %v1873_v59, %v5343_v30  ;;  %v2478_v18 = vadd.f32 %v2477_v38, %v2476_v17  ;;  %v6358_v51 = vld [vmem:[#allocation115_spill] sm:$0xff]  ;;  %v6361_v32 = vld [vmem:[#allocation97_spill] sm:$0xff] }
 0x271   :  { %v1076_v48 = vsel %vm1058_vm2, %v5428_v33, 0.0  ;;  %2765 = vpow2.f32 %v1252_v7  ;;  %v1720_v41 = vmul.f32 1.442695, %v1718_v3  ;;  %v2443_v5 = vadd.f32 %v2442_v39, %v6337_v21  ;;  %v6362_v3 = vld [vmem:[#allocation34_spill] sm:$0xff] }
 0x272   :  { %2767 = vpow2.f32 %v1878_v22  ;;  %v1077_v55 = vadd.f32 %v1076_v48, %v5431_v37  ;;  %v5447_v62 = vadd.f32 %v2455_v42, %v5287_v54  ;;  %v2178_v29 = vmax.f32 %v2177_v50, %v5383_v46 }
 0x273   :  { %v5441_v26 = vpop.eup %2755  ;;  %2769 = vpow2.f32 %v1564_v20  ;;  %v2326_v40 = vadd.f32 %v2325_v27, %v2324_v49  ;;  %v1876_v17 = vmul.f32 1.442695, %v1874_v44  ;;  %v2333_v13 = vmax.f32 %v5372_v36, %v5379_v34 }
 0x274   :  { %v5450_v25 = vpop.eup %2757  ;;  %v1078_v30 = vrot.slane %v1077_v55, 4  ;;  %2771 = vpow2.f32 %v1720_v41  ;;  %v2468_v45 = vrot.slane %v5381_v15, 1  ;;  %v2030_v21 = vsub.f32 %v2029_v57, %v5349_v4 }
 0x275   :  { %v5452_v23 = vpop.eup %2759  ;;  %2773 = vpow2.f32 %v2034_v24  ;;  %v2479_v54 = vrot.slane %v2478_v18, 2  ;;  %v1256_v42 = vsel %vm1058_vm2, %v5441_v26, 0.0  ;;  %v1412_v49 = vsel %vm1058_vm2, %v5450_v25, 0.0 }
 0x276   :  { %v1079_v39 = vadd.f32 %v1078_v30, %v1077_v55  ;;  %2775 = vpow2.f32 %v1876_v17  ;;  %v5460_v50 = vpop.eup %2761  ;;  %v2032_v16 = vmul.f32 1.442695, %v2030_v21  ;;  %v2184_v36 = vsel %vm1068_vm7, %v6357_v35, %v5235_v2 }
 0x277   :  { %v2187_v28 = vsub.f32 %v5383_v46, %v2178_v29  ;;  %v2185_v10 = vsel %vm1070_vm8, %v2184_v36, %v5290_v61  ;;  %v2334_v43 = vmax.f32 %v2333_v13, %v2326_v40  ;;  %v2340_v58 = vsel %vm1068_vm7, %v6358_v51, %v5272_v31 }
 0x278   :  { %v1080_v4 = vrot.slane %v1079_v39, 2  ;;  %2777 = vpow2.f32 %v2032_v16  ;;  %v2186_v56 = vsub.f32 %v2185_v10, %v2178_v29  ;;  %v2341_v0 = vsel %vm1070_vm8, %v2340_v58, %v5379_v34 }
 0x279   :  { %v2190_v47 = vmul.f32 1.442695, %v2187_v28  ;;  %v1568_v2 = vsel %vm1058_vm2, %v5452_v23, 0.0  ;;  %v2342_v46 = vsub.f32 %v2341_v0, %v2334_v43  ;;  %v2343_v6 = vsub.f32 %v2326_v40, %v2334_v43 }
 0x27a   :  { %v1081_v63 = vadd.f32 %v1080_v4, %v1079_v39  ;;  %v1724_v61 = vsel %vm1058_vm2, %v5460_v50, 0.0  ;;  %v2188_v27 = vmul.f32 1.442695, %v2186_v56  ;;  %v2480_v8 = vadd.f32 %v2479_v54, %v2478_v18 }
 0x27b   :  { %2779 = vpow2.f32 %v2190_v47  ;;  %v2344_v31 = vmul.f32 1.442695, %v2342_v46  ;;  %v2346_v60 = vmul.f32 1.442695, %v2343_v6  ;;  %v2487_v22 = vmax.f32 %v6359_v12, %v2443_v5 }
 0x27c   :  { %v1082_v53 = vrot.slane %v1081_v63, 1  ;;  %2781 = vpow2.f32 %v2188_v27  ;;  %v2469_v34 = vadd.f32 %v2468_v45, %v5381_v15  ;;  %v2481_v1 = vrot.slane %v2480_v8, 1 }
 0x27d   :  { %v5480_v9 = vpop.eup %2763  ;;  %v2493_v52 = vsel %vm1062_vm4, %v6361_v32, %v6360_v11  ;;  %2783 = vpow2.f32 %v2344_v31  ;;  %v2488_v19 = vmax.f32 %v2487_v22, %v5447_v62 }
 0x27e   :  { %v5486_v38 = vpop.eup %2765  ;;  %v1083_v14 = vadd.f32 %v1082_v53, %v1081_v63  ;;  %v5489_v7 = vadd.f32 %v5480_v9, %v1412_v49  ;;  %2785 = vpow2.f32 %v2346_v60  ;;  %v2482_v15 = vadd.f32 %v2481_v1, %v2480_v8 }
 0x27f   :  { %v5492_v24 = vpop.eup %2767  ;;  %v5495_v20 = vadd.f32 %v5486_v38, %v1256_v42  ;;  %v2494_v59 = vsel %vm1064_vm5, %v2493_v52, %v6362_v3  ;;  %v2489_v55 = vmax.f32 %v2488_v19, %v2469_v34 }
 0x280   :  { %v5499_v57 = vpop.eup %2769  ;;  %v1085_v48 = vmul.f32 0.11111111, %v1083_v14  ;;  %v2495_v41 = vsel %vm1066_vm6, %v2494_v59, %v2443_v5  ;;  %v1880_v45 = vsel %vm1058_vm2, %v5492_v24, 0.0 }
 0x281   :  { %v5502_v44 = vpop.eup %2771  ;;  %v1569_v18 = vadd.f32 %v5499_v57, %v1568_v2  ;;  %v2496_v29 = vsel %vm1068_vm7, %v2495_v41, %v5447_v62  ;;  %v2490_v21 = vmax.f32 %v2489_v55, %v2482_v15  ;;  %v1258_v3 = vrot.slane %v5495_v20, 4 }
 0x282   :  { %v5507_v40 = vpop.eup %2773  ;;  %v1086_v30 = vsub.f32 %v5431_v37, %v1085_v48  ;;  %v1087_v17 = vsub.f32 %v5428_v33, %v1085_v48  ;;  %v1725_v13 = vadd.f32 %v5502_v44, %v1724_v61  ;;  %v2497_v49 = vsel %vm1070_vm8, %v2496_v29, %v2469_v34 }
 0x283   :  { %v5514_v5 = vpop.eup %2775  ;;  %v2036_v62 = vsel %vm1058_vm2, %v5507_v40, 0.0  ;;  %v2498_v16 = vsub.f32 %v2497_v49, %v2490_v21  ;;  %v2499_v2 = vsub.f32 %v2482_v15, %v2490_v21  ;;  %v1414_v15 = vrot.slane %v5489_v7, 4 }
 0x284   :  { %v1088_v54 = vmul.f32 %v1086_v30, %v1086_v30  ;;  %v1089_v39 = vmul.f32 %v1087_v17, %v1087_v17  ;;  %v1881_v42 = vadd.f32 %v5514_v5, %v1880_v45  ;;  %v1570_v59 = vrot.slane %v1569_v18, 4 }
 0x285   :  { %v5520_v37 = vpop.eup %2777  ;;  %v2500_v61 = vmul.f32 1.442695, %v2498_v16  ;;  %v2502_v8 = vmul.f32 1.442695, %v2499_v2  ;;  %v1726_v48 = vrot.slane %v1725_v13, 4  ;;  %v1415_v41 = vadd.f32 %v1414_v15, %v5489_v7 }
 0x286   :  { %v1090_v33 = vsel %vm1058_vm2, %v1089_v39, 0.0  ;;  %v2037_v28 = vadd.f32 %v5520_v37, %v2036_v62  ;;  %v1882_v55 = vrot.slane %v1881_v42, 4  ;;  %v1259_v29 = vadd.f32 %v1258_v3, %v5495_v20 }
 0x287   :  { %v1091_v35 = vadd.f32 %v1090_v33, %v1088_v54  ;;  %2787 = vpow2.f32 %v2500_v61  ;;  %v1571_v45 = vadd.f32 %v1570_v59, %v1569_v18  ;;  %v1727_v54 = vadd.f32 %v1726_v48, %v1725_v13 }
 0x288   :  { %v5523_v36 = vpop.eup %2779  ;;  %2789 = vpow2.f32 %v2502_v8  ;;  %v2038_v21 = vrot.slane %v2037_v28, 4  ;;  %v1883_v39 = vadd.f32 %v1882_v55, %v1881_v42  ;;  %v1260_v49 = vrot.slane %v1259_v29, 2 }
 0x289   :  { %v1092_v4 = vrot.slane %v1091_v35, 4  ;;  %v5526_v10 = vpop.eup %2781  ;;  %v2192_v43 = vsel %vm1058_vm2, %v5523_v36, 0.0  ;;  %v1572_v33 = vrot.slane %v1571_v45, 2 }
 0x28a   :  { %v5530_v51 = vpop.eup %2783  ;;  %v2193_v47 = vadd.f32 %v5526_v10, %v2192_v43  ;;  %v2039_v16 = vadd.f32 %v2038_v21, %v2037_v28  ;;  %v1261_v20 = vadd.f32 %v1260_v49, %v1259_v29 }
 0x28b   :  { %v1093_v58 = vadd.f32 %v1092_v4, %v1091_v35  ;;  %v5532_v56 = vpop.eup %2785  ;;  %v1728_v35 = vrot.slane %v1727_v54, 2  ;;  %v1573_v13 = vadd.f32 %v1572_v33, %v1571_v45 }
 0x28c   :  { %v2348_v63 = vsel %vm1058_vm2, %v5532_v56, 0.0 }
 0x28d   :  { %v1094_v0 = vrot.slane %v1093_v58, 2  ;;  %v2349_v6 = vadd.f32 %v5530_v51, %v2348_v63  ;;  %v2040_v63 = vrot.slane %v2039_v16, 2 }
 0x28f   :  { %v1095_v46 = vadd.f32 %v1094_v0, %v1093_v58  ;;  %v2350_v62 = vrot.slane %v2349_v6, 4  ;;  %v1884_v0 = vrot.slane %v1883_v39, 2 }
 0x291   :  { %v1096_v27 = vrot.slane %v1095_v46, 1  ;;  %v2351_v7 = vadd.f32 %v2350_v62, %v2349_v6  ;;  %v2041_v6 = vadd.f32 %v2040_v63, %v2039_v16 }
 0x293   :  { %v1097_v53 = vadd.f32 %v1096_v27, %v1095_v46  ;;  %v1729_v46 = vadd.f32 %v1728_v35, %v1727_v54  ;;  %v1885_v27 = vadd.f32 %v1884_v0, %v1883_v39  ;;  %v1266_v35 = vlaneseq }
 0x294   :  { %v5538_v12 = vpop.eup %2787 }
 0x295   :  { %v1098_v31 = vmul.f32 0.125, %v1097_v53  ;;  %v5540_v22 = vpop.eup %2789 }
 0x296   :  { %v2504_v34 = vsel %vm1058_vm2, %v5540_v22, 0.0 }
 0x297   :  { %v1099_v60 = vadd.f32 1e-12, %v1098_v31  ;;  %v2505_v1 = vadd.f32 %v5538_v12, %v2504_v34  ;;  %v1262_v31 = vrot.slane %v1261_v20, 1 }
 0x299   :  { %2791 = vrsqrt.f32 %v1099_v60  ;;  %v2506_v8 = vrot.slane %v2505_v1, 4  ;;  %v1574_v60 = vrot.slane %v1573_v13, 1  ;;  %v1263_v59 = vadd.f32 %v1262_v31, %v1261_v20 }
 0x29b   :  { %v2507_v15 = vadd.f32 %v2506_v8, %v2505_v1  ;;  %v1575_v48 = vadd.f32 %v1574_v60, %v1573_v13 }
 0x2a6   :  { %v2792_v11 = vpop.eup %2791 }
 0x2a7   :  { %v1101_v32 = vmul.f32 %v2792_v11, %v1086_v30  ;;  %v1102_v52 = vmul.f32 %v2792_v11, %v1087_v17  ;;  %v2194_v30 = vrot.slane %v2193_v47, 4  ;;  %v1416_v17 = vrot.slane %v1415_v41, 2 }
 0x2a8   :  { %v1730_v11 = vrot.slane %v1729_v46, 1 }
 0x2a9   :  { %v1103_v14 = vmul.f32 1.442695, %v1101_v32  ;;  %v1105_v19 = vmul.f32 1.442695, %v1102_v52  ;;  %v2195_v4 = vadd.f32 %v2194_v30, %v2193_v47  ;;  %v1417_v58 = vadd.f32 %v1416_v17, %v1415_v41 }
 0x2aa   :  { %v2352_v47 = vrot.slane %v2351_v7, 2  ;;  %v2042_v41 = vrot.slane %v2041_v6, 1  ;;  %v1731_v29 = vadd.f32 %v1730_v11, %v1729_v46  ;;  %v2508_v30 = vrot.slane %v2507_v15, 2 }
 0x2ab   :  { %2793 = vpow2.f32 %v1103_v14  ;;  %v2196_v61 = vrot.slane %v2195_v4, 2  ;;  %v1418_v28 = vrot.slane %v1417_v58, 1  ;;  %v1886_v14 = vrot.slane %v1885_v27, 1 }
 0x2ac   :  { %2795 = vpow2.f32 %v1105_v19  ;;  %v2353_v19 = vadd.f32 %v2352_v47, %v2351_v7  ;;  %v2043_v39 = vadd.f32 %v2042_v41, %v2041_v6  ;;  %v2509_v33 = vadd.f32 %v2508_v30, %v2507_v15  ;;  %v5585_v30 = vpop.permute.xlu1 %467 }
 0x2ad   :  { %v2197_v32 = vadd.f32 %v2196_v61, %v2195_v4  ;;  %v1419_v52 = vadd.f32 %v1418_v28, %v1417_v58  ;;  %v1887_v21 = vadd.f32 %v1886_v14, %v1885_v27  ;;  %v5556_v7 = vshrl.u32 %v1266_v35, 7 }
 0x2ae   :  { %v2354_v54 = vrot.slane %v2353_v19, 1  ;;  %v2510_v16 = vrot.slane %v2509_v33, 1 }
 0x2af   :  { %v2198_v45 = vrot.slane %v2197_v32, 1  ;;  %2797 = vrcp.f32 %v1419_v52  ;;  %v1424_v46 = vsub.s32 1, %v5556_v7  ;;  %v1580_v27 = vsub.s32 2, %v5556_v7 }
 0x2b0   :  { %2799 = vrcp.f32 %v1263_v59  ;;  %v2355_v1 = vadd.f32 %v2354_v54, %v2353_v19  ;;  %v2511_v4 = vadd.f32 %v2510_v16, %v2509_v33  ;;  %v1736_v47 = vsub.s32 3, %v5556_v7 }
 0x2b1   :  { %2801 = vrcp.f32 %v1575_v48  ;;  %v2199_v49 = vadd.f32 %v2198_v45, %v2197_v32  ;;  %v1892_v8 = vsub.s32 4, %v5556_v7  ;;  %v2048_v60 = vsub.s32 5, %v5556_v7 }
 0x2b2   :  { %2803 = vrcp.f32 %v1731_v29  ;;  %v2204_v6 = vsub.s32 6, %v5556_v7 }
 0x2b3   :  { %2805 = vrcp.f32 %v1887_v21 }
 0x2b8   :  { %v5549_v43 = vpop.eup %2793 }
 0x2b9   :  { %v5551_v2 = vpop.eup %2795 }
 0x2ba   :  { %v1107_v18 = vsel %vm1058_vm2, %v5551_v2, 0.0 }
 0x2bb   :  { %v1108_v42 = vadd.f32 %v5549_v43, %v1107_v18 }
 0x2bc   :  { %v2798_v58 = vpop.eup %2797 }
 0x2bd   :  { %v1109_v53 = vrot.slane %v1108_v42, 4  ;;  %v2800_v0 = vpop.eup %2799 }
 0x2be   :  { %v2802_v20 = vpop.eup %2801 }
 0x2bf   :  { %v1110_v34 = vadd.f32 %v1109_v53, %v1108_v42  ;;  %v2804_v18 = vpop.eup %2803  ;;  %v5559_v42 = vsub.s32 0, %v5556_v7 }
 0x2c0   :  { %v2806_v13 = vpop.eup %2805 }
 0x2c1   :  { %v1111_v3 = vrot.slane %v1110_v34, 2  ;;  %6363 = vst [vmem:[#allocation73_spill] sm:$0xff] %v5559_v42 }
 0x2c3   :  { %v1112_v55 = vadd.f32 %v1111_v3, %v1110_v34  ;;  %v2360_v34 = vsub.s32 7, %v5556_v7 }
 0x2c5   :  { %v1113_v17 = vrot.slane %v1112_v55, 1 }
 0x2c7   :  { %v1114_v62 = vadd.f32 %v1113_v17, %v1112_v55 }
 0x2c9   :  { %2807 = vrcp.f32 %v1114_v62 }
 0x2ca   :  { %2809 = vrcp.f32 %v2043_v39 }
 0x2cb   :  { %2811 = vrcp.f32 %v2199_v49 }
 0x2cc   :  { %2813 = vrcp.f32 %v2355_v1  ;;  %v5591_v1 = vpop.permute.xlu0 %472 }
 0x2cd   :  { %2815 = vrcp.f32 %v2511_v4 }
 0x2d6   :  { %v2808_v63 = vpop.eup %2807 }
 0x2d7   :  { %v2810_v61 = vpop.eup %2809  ;;  %v1116_v28 = vmul.f32 %v2808_v63, %v5549_v43  ;;  %v1117_v31 = vmul.f32 %v2808_v63, %v5551_v2 }
 0x2d8   :  { %v2812_v53 = vpop.eup %2811 }
 0x2d9   :  { %v2814_v11 = vpop.eup %2813  ;;  %v1265_v32 = vmul.f32 %v2800_v0, %v1116_v28  ;;  %v1421_v52 = vmul.f32 %v2798_v58, %v1116_v28  ;;  %v1577_v14 = vmul.f32 %v2802_v20, %v1116_v28  ;;  %v1733_v43 = vmul.f32 %v2804_v18, %v1116_v28 }
 0x2da   :  { %v1889_v19 = vmul.f32 %v2806_v13, %v1116_v28  ;;  %v2045_v15 = vmul.f32 %v2810_v61, %v1116_v28  ;;  %v2201_v3 = vmul.f32 %v2812_v53, %v1116_v28  ;;  %v2357_v59 = vmul.f32 %v2814_v11, %v1116_v28  ;;  %v2816_v18 = vpop.eup %2815  ;;  %v6366_v53 = vld [vmem:[#allocation4_spill] sm:$0xff] }
 0x2db   :  { %v1269_v48 = vrot.slane %v1265_v32, %v5559_v42  ;;  %v1425_v2 = vrot.slane %v1421_v52, %v1424_v46  ;;  %v1581_v41 = vrot.slane %v1577_v14, %v1580_v27  ;;  %v1737_v55 = vrot.slane %v1733_v43, %v1736_v47  ;;  %v6367_v32 = vld [vmem:[#allocation6_spill] sm:$0xff] }
 0x2dc   :  { %v1893_v29 = vrot.slane %v1889_v19, %v1892_v8  ;;  %v2049_v45 = vrot.slane %v2045_v15, %v2048_v60  ;;  %v2205_v21 = vrot.slane %v2201_v3, %v2204_v6  ;;  %v2361_v54 = vrot.slane %v2357_v59, %v2360_v34  ;;  %v6370_v19 = vld [vmem:[#allocation11_spill] sm:$0xff] }
 0x2dd   :  { %v1270_v17 = vmul.f32 %v5486_v38, %v1269_v48  ;;  %v1271_v39 = vmul.f32 %v5441_v26, %v1269_v48  ;;  %v1426_v62 = vmul.f32 %v5480_v9, %v1425_v2  ;;  %v1427_v49 = vmul.f32 %v5450_v25, %v1425_v2  ;;  %v6371_v48 = vld [vmem:[#allocation13_spill] sm:$0xff] }
 0x2de   :  { %v1582_v33 = vmul.f32 %v5499_v57, %v1581_v41  ;;  %v1583_v16 = vmul.f32 %v5452_v23, %v1581_v41  ;;  %v1738_v35 = vmul.f32 %v5502_v44, %v1737_v55  ;;  %v1739_v4 = vmul.f32 %v5460_v50, %v1737_v55  ;;  %v5603_v23 = vpop.permute.xlu1 %477  ;;  %v6372_v41 = vld [vmem:[#allocation60_spill] sm:$0xff] }
 0x2df   :  { %v1428_v58 = vadd.f32 %v1426_v62, %v1270_v17  ;;  %v1429_v0 = vadd.f32 %v1427_v49, %v1271_v39  ;;  %v1894_v38 = vmul.f32 %v5514_v5, %v1893_v29  ;;  %v1895_v26 = vmul.f32 %v5492_v24, %v1893_v29  ;;  %v5607_v5 = vpop.permute.xlu0 %482  ;;  %v6374_v17 = vld [vmem:[#allocation66_spill] sm:$0xff] }
 0x2e0   :  { %v2050_v9 = vmul.f32 %v5520_v37, %v2049_v45  ;;  %v2051_v25 = vmul.f32 %v5507_v40, %v2049_v45  ;;  %v2206_v20 = vmul.f32 %v5526_v10, %v2205_v21  ;;  %v2207_v57 = vmul.f32 %v5523_v36, %v2205_v21  ;;  %v6364_v37 = vld [vmem:[#allocation2_spill] sm:$0xff]  ;;  %v6365_v40 = vld [vmem:[#allocation3_spill] sm:$0xff]  ;;  %v6373_v21 = vld [vmem:[#allocation64_spill] sm:$0xff] }
 0x2e1   :  { %v1584_v44 = vadd.f32 %v1582_v33, %v1428_v58  ;;  %v1585_v13 = vadd.f32 %v1583_v16, %v1429_v0  ;;  %v2362_v50 = vmul.f32 %v5530_v51, %v2361_v54  ;;  %v2363_v63 = vmul.f32 %v5532_v56, %v2361_v54  ;;  %v6368_v51 = vld [vmem:[#allocation8_spill] sm:$0xff]  ;;  %v6375_v33 = vld [vmem:[#allocation69_spill] sm:$0xff]  ;;  %v6377_v58 = vld [vmem:[#allocation79_spill] sm:$0xff] }
 0x2e2   :  { %v2513_v24 = vmul.f32 %v2816_v18, %v1117_v31  ;;  %v620_v61 = vadd.f32 %v6364_v37, %v5585_v30  ;;  %v622_v10 = vadd.f32 %v6365_v40, %v5585_v30  ;;  %v624_v11 = vadd.f32 %v6366_v53, %v5591_v1  ;;  %v6369_v31 = vld [vmem:[#allocation9_spill] sm:$0xff]  ;;  %v6380_v18 = vld [vmem:[#allocation82_spill] sm:$0xff]  ;;  %v6382_v37 = vld [vmem:[#allocation84_spill] sm:$0xff] }
 0x2e3   :  { %v1740_v28 = vadd.f32 %v1738_v35, %v1584_v44  ;;  %v1741_v36 = vadd.f32 %v1739_v4, %v1585_v13  ;;  %v626_v52 = vadd.f32 %v6367_v32, %v5591_v1  ;;  %v630_v56 = vadd.f32 %v6368_v51, %v5603_v23  ;;  %v6376_v35 = vld [vmem:[#allocation77_spill] sm:$0xff]  ;;  %v6381_v13 = vld [vmem:[#allocation83_spill] sm:$0xff] }
 0x2e4   :  { %v2517_v14 = vrot.slane %v2513_v24, %v5559_v42  ;;  %v632_v43 = vadd.f32 %v6369_v31, %v5603_v23  ;;  %v634_v15 = vadd.f32 %v6370_v19, %v5607_v5  ;;  %v636_v2 = vadd.f32 %v6371_v48, %v5607_v5  ;;  %v6384_v53 = vld [vmem:[#allocation87_spill] sm:$0xff]  ;;  %v6385_v51 = vld [vmem:[#allocation93_spill] sm:$0xff]  ;;  %v6386_v31 = vld [vmem:[#allocation94_spill] sm:$0xff] }
 0x2e5   :  { %v1896_v3 = vadd.f32 %v1894_v38, %v1740_v28  ;;  %v1897_v59 = vadd.f32 %v1895_v26, %v1741_v36  ;;  %v721_v55 = vadd.f32 %v6372_v41, %v5585_v30  ;;  %v723_v54 = vadd.f32 %v6373_v21, %v5585_v30  ;;  %v6379_v38 = vld [vmem:[#allocation81_spill] sm:$0xff]  ;;  %v6389_v21 = vld [vmem:[#allocation86_spill] sm:$0xff] }
 0x2e6   :  { %v2518_v29 = vmul.f32 %v5538_v12, %v2517_v14  ;;  %v2519_v45 = vmul.f32 %v5540_v22, %v2517_v14  ;;  %v725_v39 = vadd.f32 %v6374_v17, %v5591_v1  ;;  %v727_v16 = vadd.f32 %v6375_v33, %v5591_v1  ;;  %v6378_v12 = vld [vmem:[#allocation80_spill] sm:$0xff]  ;;  %v6383_v28 = vld [vmem:[#allocation85_spill] sm:$0xff]  ;;  %v6391_v33 = vld [vmem:[#allocation38_spill] sm:$0xff] }
 0x2e7   :  { %v2052_v62 = vadd.f32 %v2050_v9, %v1896_v3  ;;  %v2053_v49 = vadd.f32 %v2051_v25, %v1897_v59  ;;  %v731_v4 = vadd.f32 %v6376_v35, %v5603_v23  ;;  %v822_v0 = vadd.f32 %v6377_v58, %v5585_v30  ;;  %v6387_v3 = vld [vmem:[#allocation95_spill] sm:$0xff]  ;;  %v6388_v48 = vld [vmem:[#allocation61_spill] sm:$0xff] }
 0x2e8   :  { %v733_v22 = vadd.f32 %v6378_v12, %v5603_v23  ;;  %v5644_v26 = vadd.f32 %v6379_v38, %v5585_v30  ;;  %v735_v9 = vadd.f32 %v6380_v18, %v5607_v5  ;;  %v826_v24 = vadd.f32 %v6381_v13, %v5591_v1  ;;  %v6394_v38 = vld [vmem:[#allocation58_spill] sm:$0xff]  ;;  %v6397_v13 = vld [vmem:[#allocation111_spill] sm:$0xff] }
 0x2e9   :  { %v2208_v25 = vadd.f32 %v2206_v20, %v2052_v62  ;;  %v2209_v44 = vadd.f32 %v2207_v57, %v2053_v49  ;;  %v737_v40 = vadd.f32 %v6382_v37, %v5607_v5  ;;  %v828_v36 = vadd.f32 %v6383_v28, %v5591_v1  ;;  %v6390_v62 = vld [vmem:[#allocation103_spill] sm:$0xff]  ;;  %v6398_v28 = vld [vmem:[#allocation113_spill] sm:$0xff] }
 0x2ea   :  { %v832_v32 = vadd.f32 %v6384_v53, %v5603_v23  ;;  %v834_v14 = vadd.f32 %v6385_v51, %v5603_v23  ;;  %v836_v19 = vadd.f32 %v6386_v31, %v5607_v5  ;;  %v838_v59 = vadd.f32 %v6387_v3, %v5607_v5 }
 0x2eb   :  { %v2364_v20 = vadd.f32 %v2362_v50, %v2208_v25  ;;  %v2365_v57 = vadd.f32 %v2363_v63, %v2209_v44  ;;  %v923_v41 = vadd.f32 %v6388_v48, %v5585_v30  ;;  %v5666_v17 = vadd.f32 %v6389_v21, %v5585_v30  ;;  %v6392_v50 = vld [vmem:[#allocation56_spill] sm:$0xff]  ;;  %v6396_v25 = vld [vmem:[#allocation110_spill] sm:$0xff] }
 0x2ec   :  { %v927_v49 = vadd.f32 %v6390_v62, %v5591_v1  ;;  %v5672_v35 = vadd.f32 %v6391_v33, %v5591_v1  ;;  %v933_v63 = vadd.f32 %v6392_v50, %v5603_v23  ;;  %v5680_v18 = vadd.f32 %v6394_v38, %v5585_v30 }
 0x2ed   :  { %v2520_v58 = vadd.f32 %v2518_v29, %v2364_v20  ;;  %v5676_v12 = vadd.f32 %v2519_v45, %v2365_v57  ;;  %v935_v44 = vadd.f32 %v6396_v25, %v5603_v23  ;;  %v937_v37 = vadd.f32 %v6397_v13, %v5607_v5 }
 0x2ee   :  { %6395 = vst [vmem:[#allocation92_spill] sm:$0xff] %v5680_v18  ;;  %v939_v53 = vadd.f32 %v6398_v28, %v5607_v5 }
 0x2ef   :  { %6393 = vst [vmem:[#allocation48_spill] sm:$0xff] %v5676_v12  ;;  %v2525_v51 = vrot.slane %v2520_v58, %v5559_v42  ;;  %v2537_v29 = vrot.slane %v2520_v58, %v1424_v46  ;;  %v2549_v45 = vrot.slane %v2520_v58, %v1580_v27  ;;  %v2561_v30 = vrot.slane %v2520_v58, %v1736_v47 }
 0x2f0   :  { %v2573_v31 = vrot.slane %v2520_v58, %v1892_v8  ;;  %v2585_v20 = vrot.slane %v2520_v58, %v2048_v60  ;;  %v2597_v57 = vrot.slane %v2520_v58, %v2204_v6  ;;  %v2609_v3 = vrot.slane %v2520_v58, %v2360_v34 }
 0x2f1   :  { %v2526_v48 = vmul.f32 %v2525_v51, %v620_v61  ;;  %v2527_v46 = vmul.f32 %v2525_v51, %v624_v11  ;;  %v2528_v21 = vmul.f32 %v2525_v51, %v630_v56  ;;  %v2529_v62 = vmul.f32 %v2525_v51, %v634_v15 }
 0x2f2   :  { %v2538_v27 = vmul.f32 %v2537_v29, %v622_v10  ;;  %v2539_v33 = vmul.f32 %v2537_v29, %v626_v52  ;;  %v2540_v50 = vmul.f32 %v2537_v29, %v632_v43  ;;  %v2541_v47 = vmul.f32 %v2537_v29, %v636_v2 }
 0x2f3   :  { %v2550_v38 = vmul.f32 %v2549_v45, %v721_v55  ;;  %v2551_v25 = vmul.f32 %v2549_v45, %v725_v39  ;;  %v2552_v8 = vmul.f32 %v2549_v45, %v731_v4  ;;  %v2553_v13 = vmul.f32 %v2549_v45, %v735_v9 }
 0x2f4   :  { %v2542_v28 = vadd.f32 %v2538_v27, %v2526_v48  ;;  %v2543_v60 = vadd.f32 %v2539_v33, %v2527_v46  ;;  %v2544_v18 = vadd.f32 %v2540_v50, %v2528_v21  ;;  %v2545_v12 = vadd.f32 %v2541_v47, %v2529_v62  ;;  %v6399_v21 = vld [vmem:[#allocation112_spill] sm:$0xff]  ;;  %v6402_v62 = vld [vmem:[#allocation73_spill] sm:$0xff] }
 0x2f5   :  { %v2562_v6 = vmul.f32 %v2561_v30, %v723_v54  ;;  %v2563_v42 = vmul.f32 %v2561_v30, %v727_v16  ;;  %v2564_v7 = vmul.f32 %v2561_v30, %v733_v22  ;;  %v2565_v34 = vmul.f32 %v2561_v30, %v737_v40 }
 0x2f6   :  { %v2554_v61 = vadd.f32 %v2550_v38, %v2542_v28  ;;  %v2555_v11 = vadd.f32 %v2551_v25, %v2543_v60  ;;  %v2556_v56 = vadd.f32 %v2552_v8, %v2544_v18  ;;  %v2557_v15 = vadd.f32 %v2553_v13, %v2545_v12  ;;  %v6403_v27 = vld [vmem:[#allocation48_spill] sm:$0xff] }
 0x2f7   :  { %v2574_v10 = vmul.f32 %v2573_v31, %v822_v0  ;;  %v2575_v52 = vmul.f32 %v2573_v31, %v826_v24  ;;  %v2576_v43 = vmul.f32 %v2573_v31, %v832_v32  ;;  %v2577_v2 = vmul.f32 %v2573_v31, %v836_v19 }
 0x2f8   :  { %v2566_v55 = vadd.f32 %v2562_v6, %v2554_v61  ;;  %v2567_v39 = vadd.f32 %v2563_v42, %v2555_v11  ;;  %v2568_v4 = vadd.f32 %v2564_v7, %v2556_v56  ;;  %v2569_v9 = vadd.f32 %v2565_v34, %v2557_v15 }
 0x2f9   :  { %v2586_v58 = vmul.f32 %v2585_v20, %v5644_v26  ;;  %v2587_v51 = vmul.f32 %v2585_v20, %v828_v36  ;;  %v2588_v29 = vmul.f32 %v2585_v20, %v834_v14  ;;  %v2589_v54 = vmul.f32 %v2585_v20, %v838_v59 }
 0x2fa   :  { %v2578_v16 = vadd.f32 %v2574_v10, %v2566_v55  ;;  %v2579_v22 = vadd.f32 %v2575_v52, %v2567_v39  ;;  %v2580_v40 = vadd.f32 %v2576_v43, %v2568_v4  ;;  %v2581_v45 = vadd.f32 %v2577_v2, %v2569_v9 }
 0x2fb   :  { %v2598_v30 = vmul.f32 %v2597_v57, %v923_v41  ;;  %v2599_v18 = vmul.f32 %v2597_v57, %v927_v49  ;;  %v2600_v12 = vmul.f32 %v2597_v57, %v933_v63  ;;  %v2601_v0 = vmul.f32 %v2597_v57, %v937_v37  ;;  %v6400_v49 = vld [vmem:[#allocation114_spill] sm:$0xff]  ;;  %v6401_v37 = vld [vmem:[#allocation12_spill] sm:$0xff] }
 0x2fc   :  { %v2590_v24 = vadd.f32 %v2586_v58, %v2578_v16  ;;  %v2591_v32 = vadd.f32 %v2587_v51, %v2579_v22  ;;  %v2592_v19 = vadd.f32 %v2588_v29, %v2580_v40  ;;  %v2593_v31 = vadd.f32 %v2589_v54, %v2581_v45 }
 0x2fd   :  { %v2610_v42 = vmul.f32 %v2609_v3, %v5666_v17  ;;  %v2611_v48 = vmul.f32 %v2609_v3, %v5672_v35  ;;  %v2612_v26 = vmul.f32 %v2609_v3, %v935_v44  ;;  %v2613_v36 = vmul.f32 %v2609_v3, %v939_v53  ;;  %v6404_v3 = vld [vmem:[#allocation92_spill] sm:$0xff] }
 0x2fe   :  { %v2602_v14 = vadd.f32 %v2598_v30, %v2590_v24  ;;  %v2603_v59 = vadd.f32 %v2599_v18, %v2591_v32  ;;  %v2604_v20 = vadd.f32 %v2600_v12, %v2592_v19  ;;  %v2605_v46 = vadd.f32 %v2601_v0, %v2593_v31 }
 0x2ff   :  { %v1019_v41 = vadd.f32 %v6399_v21, %v5591_v1  ;;  %v1024_v63 = vadd.f32 %v6400_v49, %v5603_v23  ;;  %v1027_v57 = vadd.f32 %v6401_v37, %v5607_v5  ;;  %v2621_v17 = vrot.slane %v6403_v27, %v6402_v62 }
 0x300   :  { %v2614_v33 = vadd.f32 %v2610_v42, %v2602_v14  ;;  %v2615_v35 = vadd.f32 %v2611_v48, %v2603_v59  ;;  %v2616_v44 = vadd.f32 %v2612_v26, %v2604_v20  ;;  %v2617_v53 = vadd.f32 %v2613_v36, %v2605_v46 }
 0x301   :  { %v2622_v50 = vmul.f32 %v2621_v17, %v6404_v3  ;;  %v2623_v47 = vmul.f32 %v2621_v17, %v1019_v41  ;;  %v2624_v38 = vmul.f32 %v2621_v17, %v1024_v63  ;;  %v2625_v25 = vmul.f32 %v2621_v17, %v1027_v57 }
 0x303   :  { %v2626_v8 = vadd.f32 %v2622_v50, %v2614_v33  ;;  %v2627_v1 = vadd.f32 %v2623_v47, %v2615_v35  ;;  %v2628_v13 = vadd.f32 %v2624_v38, %v2616_v44  ;;  %v2629_v28 = vadd.f32 %v2625_v25, %v2617_v53 }
 0x305   :  { %2630 = vst [vmem:[%s5731_s4] sm:$0xff] %v2626_v8  ;;  %2631 = vst [vmem:[%s5731_s4 + $0x8] sm:$0xff] %v2627_v1 }
 0x306   :  { %2632 = vst [vmem:[%s5731_s4 + $0x10] sm:$0xff] %v2628_v13  ;;  %2633 = vst [vmem:[%s5731_s4 + $0x18] sm:$0xff] %v2629_v28 }

</bundles_post_ra>
